<compile_context>
chip_gen: v7x
topology: tpu7x:2x2x1
jax: 0.10.0
libtpu: 0.0.40
codegen_flags: <defaults>
</compile_context>

<pallas_src>
import numpy as np
import jax
import jax.numpy as jnp
from jax import lax
from jax.experimental import pallas as pl
from jax.experimental.pallas import tpu as pltpu


# ----------------------------------------------------------------------------
# Fused encoder kernel: all LSTM layers (both directions) + FC heads.
# ----------------------------------------------------------------------------
def make_encoder_kernel(T_k, BP, H, n_layers):
    H2, H8 = 2 * H, 8 * H
    n_in = 2 + 3 * n_layers + 4
    unroll = T_k if T_k <= 8 else 8          # bound the unroll for long sequences

    def kernel(*args):
        in_refs = args[:n_in]
        out_ref, hid_ref, cell_ref = args[n_in:n_in + 3]
        xproj_sc, mid_sc = args[n_in + 3:]

        x_ref, mask_ref = in_refs[0], in_refs[1]
        layer_refs = in_refs[2:2 + 3 * n_layers]
        whT_ref, bh_ref, wcT_ref, bc_ref = in_refs[2 + 3 * n_layers:]

        # Lane selectors, hoisted once (JAX does not CSE broadcasts/iotas).
        lane = lax.broadcasted_iota(jnp.int32, (BP, H8), 1)
        g_sel = (lane >= 2 * H2) & (lane < 3 * H2)        # g-gate cols (both dirs)
        fwd_col = ((lane < H) |                            # fwd-direction columns
                   ((lane >= 2 * H) & (lane < 3 * H)) |
                   ((lane >= 4 * H) & (lane < 5 * H)) |
                   ((lane >= 6 * H) & (lane < 7 * H)))

        zero2 = jnp.zeros((BP, H2), jnp.float32)

        h_finals, c_finals = [], []
        for l in range(n_layers):
            w_ih = layer_refs[3 * l][...]                  # (Din, 8H)
            w_hh = layer_refs[3 * l + 1][...]              # (2H, 8H) block-diag
            b = layer_refs[3 * l + 2][...]                 # (1, 8H)
            src = x_ref if l == 0 else mid_sc
            # Hoisted input projection (+bias) for the whole sequence: ONE matmul.
            xproj_sc[...] = (jnp.dot(src[...], w_ih,
                                     preferred_element_type=jnp.float32) + b)
            dst = out_ref if l == n_layers - 1 else mid_sc

            def step(t, carry, w_hh=w_hh, dst=dst):
                h, c = carry                               # (BP, 2H): [fwd | bwd]
                t8 = pl.multiple_of(t * BP, BP)
                tb = T_k - 1 - t
                tb8 = pl.multiple_of(tb * BP, BP)
                # fwd gates read timestep t, bwd gates read timestep tb.
                xg = jnp.where(fwd_col,
                               xproj_sc[pl.ds(t8, BP), :],
                               xproj_sc[pl.ds(tb8, BP), :])
                gates = xg + jnp.dot(h, w_hh,
                                     preferred_element_type=jnp.float32)
                ta = jnp.tanh(gates)                       # single EUP pass over 8H
                acts = jnp.where(g_sel, ta, 0.5 * ta + 0.5)  # sigmoid via tanh
                i_g = acts[:, 0:H2]
                f_g = acts[:, H2:2 * H2]
                g_g = acts[:, 2 * H2:3 * H2]
                o_g = acts[:, 3 * H2:4 * H2]
                c_new = f_g * c + i_g * g_g
                h_new = o_g * jnp.tanh(c_new)
                # Precomputed packed-sequence mask: [t < len | tb < len].
                m = mask_ref[pl.ds(t8, BP), :] != 0.0
                h = jnp.where(m, h_new, h)                 # freeze past the length
                c = jnp.where(m, c_new, c)
                y = jnp.where(m, h_new, 0.0)               # pad_packed -> zeros
                dst[pl.ds(t8, BP), 0:H] = y[:, 0:H]        # fwd output @ time t
                dst[pl.ds(tb8, BP), H:H2] = y[:, H:H2]     # bwd output @ time tb
                return h, c

            h_fin, c_fin = lax.fori_loop(0, T_k, step, (zero2, zero2),
                                         unroll=unroll)
            # h_n / c_n ordering: l0_fwd, l0_bwd, l1_fwd, l1_bwd, ...
            h_finals.append(h_fin)
            c_finals.append(c_fin)

        # FC heads fused into the epilogue (fc_hidden / fc_cell).
        h_cat = jnp.concatenate(h_finals, axis=-1)         # (BP, 2*L*H)
        c_cat = jnp.concatenate(c_finals, axis=-1)
        hid_ref[...] = (jnp.dot(h_cat, whT_ref[...],
                                preferred_element_type=jnp.float32) + bh_ref[...])
        cell_ref[...] = (jnp.dot(c_cat, wcT_ref[...],
                                 preferred_element_type=jnp.float32) + bc_ref[...])

    return kernel


# ----------------------------------------------------------------------------
# Parameter init (deterministic, synthetic — mimics PyTorch default ranges).
# Kernel-ready packing: per layer one (Din, 8H) input matrix, one (2H, 8H)
# block-diagonal recurrent matrix and one folded (1, 8H) bias, with gate/dir
# column layout [i_f i_b | f_f f_b | g_f g_b | o_f o_b] and i/f/o columns
# pre-scaled by 0.5 (sigmoid-via-tanh trick).  Raw weights kept for reference.
# ----------------------------------------------------------------------------
def init_params(key, input_dim, emb_dim, hid_dim, n_layers):
    H = hid_dim
    kscale = 1.0 / np.sqrt(H)

    def uni(k, shape, s):
        return np.asarray(jax.random.uniform(k, shape, jnp.float32, -s, s))

    keys = iter(jax.random.split(key, 1 + n_layers * 2 * 4 + 4))
    params = {"n_layers": n_layers, "hid_dim": H}
    params["embedding"] = jax.random.normal(next(keys), (input_dim, emb_dim),
                                            jnp.float32)

    # Halve i/f/o gate pre-activations so sigmoid(z) = 0.5*tanh(z/2)+0.5 needs
    # only one whole-slab tanh in-kernel; g columns are untouched.
    col_scale = np.full((8 * H,), 0.5, np.float32)
    col_scale[4 * H:6 * H] = 1.0                              # g-gate columns

    w_ih_list, w_hh_list, b_list, raw = [], [], [], []
    for l in range(n_layers):
        din = emb_dim if l == 0 else 2 * H
        w_ih_cat = np.zeros((din, 8 * H), np.float32)
        w_hh_blk = np.zeros((2 * H, 8 * H), np.float32)
        bias = np.zeros((8 * H,), np.float32)
        layer_raw = []
        for d in range(2):                                    # 0 = fwd, 1 = bwd
            w_ih = uni(next(keys), (4 * H, din), kscale)
            w_hh = uni(next(keys), (4 * H, H), kscale)
            b_ih = uni(next(keys), (4 * H,), kscale)
            b_hh = uni(next(keys), (4 * H,), kscale)
            layer_raw.append((w_ih, w_hh, b_ih, b_hh))
            for j in range(4):                                # gates i, f, g, o
                cols = slice(j * 2 * H + d * H, j * 2 * H + (d + 1) * H)
                rows = slice(j * H, (j + 1) * H)
                w_ih_cat[:, cols] = w_ih.T[:, rows]
                w_hh_blk[d * H:(d + 1) * H, cols] = w_hh.T[:, rows]
                bias[cols] = (b_ih + b_hh)[rows]
        raw.append(layer_raw)
        w_ih_list.append(jnp.asarray(w_ih_cat * col_scale[None, :]))
        w_hh_list.append(jnp.asarray(w_hh_blk * col_scale[None, :]))
        b_list.append(jnp.asarray((bias * col_scale).reshape(1, 8 * H)))
    params["w_ih"], params["w_hh"], params["b"] = w_ih_list, w_hh_list, b_list
    params["raw_lstm"] = raw

    fc_in = H * 2 * n_layers
    fscale = 1.0 / np.sqrt(fc_in)
    wh = uni(next(keys), (H, fc_in), fscale)
    bh = uni(next(keys), (H,), fscale)
    wc = uni(next(keys), (H, fc_in), fscale)
    bc = uni(next(keys), (H,), fscale)
    params["fc_hidden_wT"] = jnp.asarray(wh.T)
    params["fc_hidden_b"] = jnp.asarray(bh.reshape(1, H))
    params["fc_cell_wT"] = jnp.asarray(wc.T)
    params["fc_cell_b"] = jnp.asarray(bc.reshape(1, H))
    return params


# ----------------------------------------------------------------------------
# Full forward pass (mirrors Encoder.forward).  One pallas_call total.
# ----------------------------------------------------------------------------
def encoder_forward(params, src, src_len):
    B, T = src.shape
    H = params["hid_dim"]
    L = params["n_layers"]
    E = params["embedding"].shape[1]
    BP = ((B + 7) // 8) * 8                                   # sublane-aligned batch

    src_len_np = np.asarray(src_len).astype(np.int32)         # host lengths, like
    T_out = int(src_len_np.max())                             # pack_padded_sequence
    # Bucket the kernel's time extent to a multiple of 8 (capped at T) so varying
    # max lengths hit a handful of compiled variants instead of one per T_out.
    T_k = min(T, ((T_out + 7) // 8) * 8)

    emb = jnp.take(params["embedding"], src, axis=0).astype(jnp.float32)  # (B,T,E)
    # nn.Dropout: eval-mode identity.
    # TODO(synk): training-mode dropout (post-embedding) not implemented.

    x = jnp.transpose(emb[:, :T_k, :], (1, 0, 2))             # (T_k, B, E)
    x2d = jnp.pad(x, ((0, 0), (0, BP - B), (0, 0))).reshape(T_k * BP, E)

    # Combined fwd/bwd length mask precomputed on the host:
    # row (t, b) = [t < len_b (lanes :H) | T_k-1-t < len_b (lanes H:)].
    tt = np.arange(T_k, dtype=np.int32)
    m_f = (tt[:, None] < src_len_np[None, :]).astype(np.float32)
    m_b = ((T_k - 1 - tt)[:, None] < src_len_np[None, :]).astype(np.float32)
    mask = np.zeros((T_k, BP, 2 * H), np.float32)
    mask[:, :B, :H] = m_f[:, :, None]
    mask[:, :B, H:] = m_b[:, :, None]
    mask2d = jnp.asarray(mask.reshape(T_k * BP, 2 * H))

    inputs = [x2d, mask2d]
    for l in range(L):
        inputs += [params["w_ih"][l], params["w_hh"][l], params["b"][l]]
    inputs += [params["fc_hidden_wT"], params["fc_hidden_b"],
               params["fc_cell_wT"], params["fc_cell_b"]]

    out2d, hid, cell = pl.pallas_call(
        make_encoder_kernel(T_k, BP, H, L),
        out_shape=(
            jax.ShapeDtypeStruct((T_k * BP, 2 * H), jnp.float32),
            jax.ShapeDtypeStruct((BP, H), jnp.float32),
            jax.ShapeDtypeStruct((BP, H), jnp.float32),
        ),
        scratch_shapes=[
            pltpu.VMEM((T_k * BP, 8 * H), jnp.float32),       # hoisted x-projections
            pltpu.VMEM((T_k * BP, 2 * H), jnp.float32),       # inter-layer activations
        ],
    )(*inputs)

    enc = out2d.reshape(T_k, BP, 2 * H)[:T_out, :B]           # drop pad rows/steps
    encoder_states = jnp.transpose(enc, (1, 0, 2))            # (B, T_out, 2H)
    hidden = hid[:B][None]                                    # (1, B, H)
    cell = cell[:B][None]
    return encoder_states, hidden, cell


# ----------------------------------------------------------------------------
# Pure-JAX reference using the RAW (PyTorch-layout, unscaled) weights, so the
# packing, block-diag fusion, tanh trick and masking are all cross-checked.
# ----------------------------------------------------------------------------
def encoder_reference(params, src, src_len):
    B, T = src.shape
    H = params["hid_dim"]
    L = params["n_layers"]
    emb = jnp.take(params["embedding"], src, axis=0).astype(jnp.float32)
    T_out = int(np.asarray(src_len).max())
    x = jnp.transpose(emb, (1, 0, 2))[:T_out]
    lens = jnp.asarray(np.asarray(src_len), jnp.int32).reshape(B, 1)

    def run_dir(x_seq, w_ih, w_hh, b_ih, b_hh, reverse):
        Tn = x_seq.shape[0]
        order = range(Tn - 1, -1, -1) if reverse else range(Tn)
        h = jnp.zeros((B, H), jnp.float32)
        c = jnp.zeros((B, H), jnp.float32)
        outs = [None] * Tn
        for t in order:
            gates = x_seq[t] @ w_ih.T + h @ w_hh.T + b_ih + b_hh
            i = jax.nn.sigmoid(gates[:, 0:H])
            f = jax.nn.sigmoid(gates[:, H:2 * H])
            g = jnp.tanh(gates[:, 2 * H:3 * H])
            o = jax.nn.sigmoid(gates[:, 3 * H:4 * H])
            c_new = f * c + i * g
            h_new = o * jnp.tanh(c_new)
            m = t < lens
            h = jnp.where(m, h_new, h)
            c = jnp.where(m, c_new, c)
            outs[t] = jnp.where(m, h_new, 0.0)
        return jnp.stack(outs), h, c

    h_fin, c_fin = [], []
    for l in range(L):
        (wf_ih, wf_hh, bf_ih, bf_hh), (wb_ih, wb_hh, bb_ih, bb_hh) = params["raw_lstm"][l]
        of, hf, cf = run_dir(x, wf_ih, wf_hh, bf_ih, bf_hh, False)
        ob, hb, cb = run_dir(x, wb_ih, wb_hh, bb_ih, bb_hh, True)
        x = jnp.concatenate([of, ob], axis=-1)
        h_fin += [hf, hb]
        c_fin += [cf, cb]

    enc = jnp.transpose(x, (1, 0, 2))
    hcat = jnp.concatenate(h_fin, axis=-1)
    ccat = jnp.concatenate(c_fin, axis=-1)
    hidden = hcat @ params["fc_hidden_wT"] + params["fc_hidden_b"]
    cell = ccat @ params["fc_cell_wT"] + params["fc_cell_b"]
    return enc, hidden[None], cell[None]


if __name__ == "__main__":
    INPUT_DIM, EMB_DIM, HID_DIM, N_LAYERS, DROPOUT = 20, 16, 32, 2, 0.1
    B, T = 2, 8

    key = jax.random.PRNGKey(0)
    params = init_params(key, INPUT_DIM, EMB_DIM, HID_DIM, N_LAYERS)

    src = jax.random.randint(jax.random.fold_in(key, 123), (B, T), 0, INPUT_DIM,
                             dtype=jnp.int32)
    src_len = np.array([T, 5], dtype=np.int32)   # host lengths, unsorted OK

    enc_states, hidden, cell = encoder_forward(params, src, src_len)
    jax.block_until_ready((enc_states, hidden, cell))

    # Shape / padding checks (pad_packed_sequence with padding_value=0).
    assert enc_states.shape == (B, int(src_len.max()), 2 * HID_DIM)
    assert hidden.shape == (1, B, HID_DIM)
    assert cell.shape == (1, B, HID_DIM)
    assert np.allclose(np.asarray(enc_states[1, int(src_len[1]):, :]), 0.0)

    # Numerical cross-check vs. pure-JAX reference (tight tolerance).
    ref_enc, ref_hid, ref_cell = encoder_reference(params, src, src_len)
    np.testing.assert_allclose(np.asarray(enc_states), np.asarray(ref_enc),
                               rtol=2e-4, atol=2e-5)
    np.testing.assert_allclose(np.asarray(hidden), np.asarray(ref_hid),
                               rtol=2e-4, atol=2e-5)
    np.testing.assert_allclose(np.asarray(cell), np.asarray(ref_cell),
                               rtol=2e-4, atol=2e-5)

    print("KERNEL_OK")
</pallas_src>

<mosaic_0001>
module attributes {stable_mosaic.version = 11 : i64} {
  func.func @kernel(%arg0: memref<64x16xf32, #tpu.memory_space<vmem>>, %arg1: memref<64x64xf32, #tpu.memory_space<vmem>>, %arg2: memref<16x256xf32, #tpu.memory_space<vmem>>, %arg3: memref<64x256xf32, #tpu.memory_space<vmem>>, %arg4: memref<1x256xf32, #tpu.memory_space<vmem>>, %arg5: memref<64x256xf32, #tpu.memory_space<vmem>>, %arg6: memref<64x256xf32, #tpu.memory_space<vmem>>, %arg7: memref<1x256xf32, #tpu.memory_space<vmem>>, %arg8: memref<128x32xf32, #tpu.memory_space<vmem>>, %arg9: memref<1x32xf32, #tpu.memory_space<vmem>>, %arg10: memref<128x32xf32, #tpu.memory_space<vmem>>, %arg11: memref<1x32xf32, #tpu.memory_space<vmem>>, %arg12: memref<64x64xf32, #tpu.memory_space<vmem>>, %arg13: memref<8x32xf32, #tpu.memory_space<vmem>>, %arg14: memref<8x32xf32, #tpu.memory_space<vmem>>, %arg15: memref<64x256xf32, #tpu.memory_space<vmem>>, %arg16: memref<64x64xf32, #tpu.memory_space<vmem>>) attributes {dimension_semantics = [], scalar_prefetch = 0 : i64, scratch_operands = 2 : i64, tpu.core_type = #tpu.core_type<tc>} {
    %0 = tpu.iota {dimensions = array<i32: 1>} : vector<8x256xi32>
    %c128_i32 = arith.constant 128 : i32
    %1 = vector.broadcast %c128_i32 : i32 to vector<8x256xi32>
    %2 = arith.cmpi sge, %0, %1 : vector<8x256xi32>
    %c192_i32 = arith.constant 192 : i32
    %3 = vector.broadcast %c192_i32 : i32 to vector<8x256xi32>
    %4 = arith.cmpi slt, %0, %3 : vector<8x256xi32>
    %5 = arith.andi %2, %4 : vector<8x256xi1>
    %c32_i32 = arith.constant 32 : i32
    %6 = vector.broadcast %c32_i32 : i32 to vector<8x256xi32>
    %7 = arith.cmpi slt, %0, %6 : vector<8x256xi32>
    %c64_i32 = arith.constant 64 : i32
    %8 = vector.broadcast %c64_i32 : i32 to vector<8x256xi32>
    %9 = arith.cmpi sge, %0, %8 : vector<8x256xi32>
    %c96_i32 = arith.constant 96 : i32
    %10 = vector.broadcast %c96_i32 : i32 to vector<8x256xi32>
    %11 = arith.cmpi slt, %0, %10 : vector<8x256xi32>
    %12 = arith.andi %9, %11 : vector<8x256xi1>
    %13 = arith.ori %7, %12 : vector<8x256xi1>
    %c128_i32_0 = arith.constant 128 : i32
    %14 = vector.broadcast %c128_i32_0 : i32 to vector<8x256xi32>
    %15 = arith.cmpi sge, %0, %14 : vector<8x256xi32>
    %c160_i32 = arith.constant 160 : i32
    %16 = vector.broadcast %c160_i32 : i32 to vector<8x256xi32>
    %17 = arith.cmpi slt, %0, %16 : vector<8x256xi32>
    %18 = arith.andi %15, %17 : vector<8x256xi1>
    %19 = arith.ori %13, %18 : vector<8x256xi1>
    %c192_i32_1 = arith.constant 192 : i32
    %20 = vector.broadcast %c192_i32_1 : i32 to vector<8x256xi32>
    %21 = arith.cmpi sge, %0, %20 : vector<8x256xi32>
    %c224_i32 = arith.constant 224 : i32
    %22 = vector.broadcast %c224_i32 : i32 to vector<8x256xi32>
    %23 = arith.cmpi slt, %0, %22 : vector<8x256xi32>
    %24 = arith.andi %21, %23 : vector<8x256xi1>
    %25 = arith.ori %19, %24 : vector<8x256xi1>
    %cst = arith.constant 0.000000e+00 : f32
    %26 = vector.broadcast %cst : f32 to vector<8x64xf32>
    %c0 = arith.constant 0 : index
    %c0_2 = arith.constant 0 : index
    %27 = vector.load %arg2[%c0, %c0_2] : memref<16x256xf32, #tpu.memory_space<vmem>>, vector<16x256xf32>
    %c0_3 = arith.constant 0 : index
    %c0_4 = arith.constant 0 : index
    %28 = vector.load %arg3[%c0_3, %c0_4] : memref<64x256xf32, #tpu.memory_space<vmem>>, vector<64x256xf32>
    %c0_5 = arith.constant 0 : index
    %c0_6 = arith.constant 0 : index
    %29 = vector.load %arg4[%c0_5, %c0_6] : memref<1x256xf32, #tpu.memory_space<vmem>>, vector<1x256xf32>
    %c0_7 = arith.constant 0 : index
    %c0_8 = arith.constant 0 : index
    %30 = vector.load %arg0[%c0_7, %c0_8] : memref<64x16xf32, #tpu.memory_space<vmem>>, vector<64x16xf32>
    %cst_9 = arith.constant dense<0.000000e+00> : vector<64x256xf32>
    %31 = tpu.matmul %30, %27, %cst_9 {dimension_numbers = #tpu.dot_dimension_numbers<[1], [0], [0], [1], [0, 0, 1, 1], [], []>} : vector<64x16xf32>, vector<16x256xf32>, vector<64x256xf32> -> vector<64x256xf32>
    %32 = vector.broadcast %29 : vector<1x256xf32> to vector<64x256xf32>
    %33 = arith.addf %31, %32 : vector<64x256xf32>
    %c0_10 = arith.constant 0 : index
    %c0_11 = arith.constant 0 : index
    %34 = vector.load %arg15[%c0_10, %c0_11] : memref<64x256xf32, #tpu.memory_space<vmem>>, vector<64x256xf32>
    tpu.vector_store %arg15[%c0_10, %c0_11], %33 {strides = array<i32>} : memref<64x256xf32, #tpu.memory_space<vmem>>, vector<64x256xf32>,
    %c0_i32 = arith.constant 0 : i32
    %c8_i32 = arith.constant 8 : i32
    %35 = arith.muli %c0_i32, %c8_i32 : i32
    %36 = tpu.assume_multiple %35, 8 : i32
    %c7_i32 = arith.constant 7 : i32
    %37 = arith.subi %c7_i32, %c0_i32 : i32
    %c8_i32_12 = arith.constant 8 : i32
    %38 = arith.muli %37, %c8_i32_12 : i32
    %39 = tpu.assume_multiple %38, 8 : i32
    %40 = arith.index_cast %36 : i32 to index
    %c0_13 = arith.constant 0 : index
    %41 = vector.load %arg15[%40, %c0_13] : memref<64x256xf32, #tpu.memory_space<vmem>>, vector<8x256xf32>
    %42 = arith.index_cast %39 : i32 to index
    %c0_14 = arith.constant 0 : index
    %43 = vector.load %arg15[%42, %c0_14] : memref<64x256xf32, #tpu.memory_space<vmem>>, vector<8x256xf32>
    %44 = arith.select %25, %41, %43 : vector<8x256xi1>, vector<8x256xf32>
    %cst_15 = arith.constant dense<0.000000e+00> : vector<8x256xf32>
    %45 = tpu.matmul %26, %28, %cst_15 {dimension_numbers = #tpu.dot_dimension_numbers<[1], [0], [0], [1], [0, 0, 1, 1], [], []>} : vector<8x64xf32>, vector<64x256xf32>, vector<8x256xf32> -> vector<8x256xf32>
    %46 = arith.addf %44, %45 : vector<8x256xf32>
    %47 = math.tanh %46 : vector<8x256xf32>
    %cst_16 = arith.constant 5.000000e-01 : f32
    %48 = vector.broadcast %cst_16 : f32 to vector<8x256xf32>
    %49 = arith.mulf %48, %47 : vector<8x256xf32>
    %cst_17 = arith.constant 5.000000e-01 : f32
    %50 = vector.broadcast %cst_17 : f32 to vector<8x256xf32>
    %51 = arith.addf %49, %50 : vector<8x256xf32>
    %52 = arith.select %5, %47, %51 : vector<8x256xi1>, vector<8x256xf32>
    %53 = vector.extract_strided_slice %52 {offsets = [0, 0], sizes = [8, 64], strides = [1, 1]} : vector<8x256xf32> to vector<8x64xf32>
    %54 = vector.extract_strided_slice %52 {offsets = [0, 64], sizes = [8, 64], strides = [1, 1]} : vector<8x256xf32> to vector<8x64xf32>
    %55 = vector.extract_strided_slice %52 {offsets = [0, 128], sizes = [8, 64], strides = [1, 1]} : vector<8x256xf32> to vector<8x64xf32>
    %56 = vector.extract_strided_slice %52 {offsets = [0, 192], sizes = [8, 64], strides = [1, 1]} : vector<8x256xf32> to vector<8x64xf32>
    %57 = arith.mulf %54, %26 : vector<8x64xf32>
    %58 = arith.mulf %53, %55 : vector<8x64xf32>
    %59 = arith.addf %57, %58 : vector<8x64xf32>
    %60 = math.tanh %59 : vector<8x64xf32>
    %61 = arith.mulf %56, %60 : vector<8x64xf32>
    %62 = arith.index_cast %36 : i32 to index
    %c0_18 = arith.constant 0 : index
    %63 = vector.load %arg1[%62, %c0_18] : memref<64x64xf32, #tpu.memory_space<vmem>>, vector<8x64xf32>
    %cst_19 = arith.constant 0.000000e+00 : f32
    %64 = vector.broadcast %cst_19 : f32 to vector<8x64xf32>
    %65 = arith.cmpf one, %63, %64 : vector<8x64xf32>
    %66 = arith.select %65, %61, %26 : vector<8x64xi1>, vector<8x64xf32>
    %67 = arith.select %65, %59, %26 : vector<8x64xi1>, vector<8x64xf32>
    %cst_20 = arith.constant 0.000000e+00 : f32
    %68 = vector.broadcast %cst_20 : f32 to vector<8x64xf32>
    %69 = arith.select %65, %61, %68 : vector<8x64xi1>, vector<8x64xf32>
    %70 = vector.extract_strided_slice %69 {offsets = [0, 0], sizes = [8, 32], strides = [1, 1]} : vector<8x64xf32> to vector<8x32xf32>
    %71 = arith.index_cast %36 : i32 to index
    %c0_21 = arith.constant 0 : index
    %72 = vector.load %arg16[%71, %c0_21] : memref<64x64xf32, #tpu.memory_space<vmem>>, vector<8x32xf32>
    tpu.vector_store %arg16[%71, %c0_21], %70 {strides = array<i32>} : memref<64x64xf32, #tpu.memory_space<vmem>>, vector<8x32xf32>,
    %73 = vector.extract_strided_slice %69 {offsets = [0, 32], sizes = [8, 32], strides = [1, 1]} : vector<8x64xf32> to vector<8x32xf32>
    %74 = arith.index_cast %39 : i32 to index
    %c32 = arith.constant 32 : index
    %75 = vector.load %arg16[%74, %c32] : memref<64x64xf32, #tpu.memory_space<vmem>>, vector<8x32xf32>
    tpu.vector_store %arg16[%74, %c32], %73 {strides = array<i32>} : memref<64x64xf32, #tpu.memory_space<vmem>>, vector<8x32xf32>,
    %c1_i32 = arith.constant 1 : i32
    %c8_i32_22 = arith.constant 8 : i32
    %76 = arith.muli %c1_i32, %c8_i32_22 : i32
    %77 = tpu.assume_multiple %76, 8 : i32
    %c7_i32_23 = arith.constant 7 : i32
    %78 = arith.subi %c7_i32_23, %c1_i32 : i32
    %c8_i32_24 = arith.constant 8 : i32
    %79 = arith.muli %78, %c8_i32_24 : i32
    %80 = tpu.assume_multiple %79, 8 : i32
    %81 = arith.index_cast %77 : i32 to index
    %c0_25 = arith.constant 0 : index
    %82 = vector.load %arg15[%81, %c0_25] : memref<64x256xf32, #tpu.memory_space<vmem>>, vector<8x256xf32>
    %83 = arith.index_cast %80 : i32 to index
    %c0_26 = arith.constant 0 : index
    %84 = vector.load %arg15[%83, %c0_26] : memref<64x256xf32, #tpu.memory_space<vmem>>, vector<8x256xf32>
    %85 = arith.select %25, %82, %84 : vector<8x256xi1>, vector<8x256xf32>
    %cst_27 = arith.constant dense<0.000000e+00> : vector<8x256xf32>
    %86 = tpu.matmul %66, %28, %cst_27 {dimension_numbers = #tpu.dot_dimension_numbers<[1], [0], [0], [1], [0, 0, 1, 1], [], []>} : vector<8x64xf32>, vector<64x256xf32>, vector<8x256xf32> -> vector<8x256xf32>
    %87 = arith.addf %85, %86 : vector<8x256xf32>
    %88 = math.tanh %87 : vector<8x256xf32>
    %cst_28 = arith.constant 5.000000e-01 : f32
    %89 = vector.broadcast %cst_28 : f32 to vector<8x256xf32>
    %90 = arith.mulf %89, %88 : vector<8x256xf32>
    %cst_29 = arith.constant 5.000000e-01 : f32
    %91 = vector.broadcast %cst_29 : f32 to vector<8x256xf32>
    %92 = arith.addf %90, %91 : vector<8x256xf32>
    %93 = arith.select %5, %88, %92 : vector<8x256xi1>, vector<8x256xf32>
    %94 = vector.extract_strided_slice %93 {offsets = [0, 0], sizes = [8, 64], strides = [1, 1]} : vector<8x256xf32> to vector<8x64xf32>
    %95 = vector.extract_strided_slice %93 {offsets = [0, 64], sizes = [8, 64], strides = [1, 1]} : vector<8x256xf32> to vector<8x64xf32>
    %96 = vector.extract_strided_slice %93 {offsets = [0, 128], sizes = [8, 64], strides = [1, 1]} : vector<8x256xf32> to vector<8x64xf32>
    %97 = vector.extract_strided_slice %93 {offsets = [0, 192], sizes = [8, 64], strides = [1, 1]} : vector<8x256xf32> to vector<8x64xf32>
    %98 = arith.mulf %95, %67 : vector<8x64xf32>
    %99 = arith.mulf %94, %96 : vector<8x64xf32>
    %100 = arith.addf %98, %99 : vector<8x64xf32>
    %101 = math.tanh %100 : vector<8x64xf32>
    %102 = arith.mulf %97, %101 : vector<8x64xf32>
    %103 = arith.index_cast %77 : i32 to index
    %c0_30 = arith.constant 0 : index
    %104 = vector.load %arg1[%103, %c0_30] : memref<64x64xf32, #tpu.memory_space<vmem>>, vector<8x64xf32>
    %cst_31 = arith.constant 0.000000e+00 : f32
    %105 = vector.broadcast %cst_31 : f32 to vector<8x64xf32>
    %106 = arith.cmpf one, %104, %105 : vector<8x64xf32>
    %107 = arith.select %106, %102, %66 : vector<8x64xi1>, vector<8x64xf32>
    %108 = arith.select %106, %100, %67 : vector<8x64xi1>, vector<8x64xf32>
    %cst_32 = arith.constant 0.000000e+00 : f32
    %109 = vector.broadcast %cst_32 : f32 to vector<8x64xf32>
    %110 = arith.select %106, %102, %109 : vector<8x64xi1>, vector<8x64xf32>
    %111 = vector.extract_strided_slice %110 {offsets = [0, 0], sizes = [8, 32], strides = [1, 1]} : vector<8x64xf32> to vector<8x32xf32>
    %112 = arith.index_cast %77 : i32 to index
    %c0_33 = arith.constant 0 : index
    %113 = vector.load %arg16[%112, %c0_33] : memref<64x64xf32, #tpu.memory_space<vmem>>, vector<8x32xf32>
    tpu.vector_store %arg16[%112, %c0_33], %111 {strides = array<i32>} : memref<64x64xf32, #tpu.memory_space<vmem>>, vector<8x32xf32>,
    %114 = vector.extract_strided_slice %110 {offsets = [0, 32], sizes = [8, 32], strides = [1, 1]} : vector<8x64xf32> to vector<8x32xf32>
    %115 = arith.index_cast %80 : i32 to index
    %c32_34 = arith.constant 32 : index
    %116 = vector.load %arg16[%115, %c32_34] : memref<64x64xf32, #tpu.memory_space<vmem>>, vector<8x32xf32>
    tpu.vector_store %arg16[%115, %c32_34], %114 {strides = array<i32>} : memref<64x64xf32, #tpu.memory_space<vmem>>, vector<8x32xf32>,
    %c2_i32 = arith.constant 2 : i32
    %c8_i32_35 = arith.constant 8 : i32
    %117 = arith.muli %c2_i32, %c8_i32_35 : i32
    %118 = tpu.assume_multiple %117, 8 : i32
    %c7_i32_36 = arith.constant 7 : i32
    %119 = arith.subi %c7_i32_36, %c2_i32 : i32
    %c8_i32_37 = arith.constant 8 : i32
    %120 = arith.muli %119, %c8_i32_37 : i32
    %121 = tpu.assume_multiple %120, 8 : i32
    %122 = arith.index_cast %118 : i32 to index
    %c0_38 = arith.constant 0 : index
    %123 = vector.load %arg15[%122, %c0_38] : memref<64x256xf32, #tpu.memory_space<vmem>>, vector<8x256xf32>
    %124 = arith.index_cast %121 : i32 to index
    %c0_39 = arith.constant 0 : index
    %125 = vector.load %arg15[%124, %c0_39] : memref<64x256xf32, #tpu.memory_space<vmem>>, vector<8x256xf32>
    %126 = arith.select %25, %123, %125 : vector<8x256xi1>, vector<8x256xf32>
    %cst_40 = arith.constant dense<0.000000e+00> : vector<8x256xf32>
    %127 = tpu.matmul %107, %28, %cst_40 {dimension_numbers = #tpu.dot_dimension_numbers<[1], [0], [0], [1], [0, 0, 1, 1], [], []>} : vector<8x64xf32>, vector<64x256xf32>, vector<8x256xf32> -> vector<8x256xf32>
    %128 = arith.addf %126, %127 : vector<8x256xf32>
    %129 = math.tanh %128 : vector<8x256xf32>
    %cst_41 = arith.constant 5.000000e-01 : f32
    %130 = vector.broadcast %cst_41 : f32 to vector<8x256xf32>
    %131 = arith.mulf %130, %129 : vector<8x256xf32>
    %cst_42 = arith.constant 5.000000e-01 : f32
    %132 = vector.broadcast %cst_42 : f32 to vector<8x256xf32>
    %133 = arith.addf %131, %132 : vector<8x256xf32>
    %134 = arith.select %5, %129, %133 : vector<8x256xi1>, vector<8x256xf32>
    %135 = vector.extract_strided_slice %134 {offsets = [0, 0], sizes = [8, 64], strides = [1, 1]} : vector<8x256xf32> to vector<8x64xf32>
    %136 = vector.extract_strided_slice %134 {offsets = [0, 64], sizes = [8, 64], strides = [1, 1]} : vector<8x256xf32> to vector<8x64xf32>
    %137 = vector.extract_strided_slice %134 {offsets = [0, 128], sizes = [8, 64], strides = [1, 1]} : vector<8x256xf32> to vector<8x64xf32>
    %138 = vector.extract_strided_slice %134 {offsets = [0, 192], sizes = [8, 64], strides = [1, 1]} : vector<8x256xf32> to vector<8x64xf32>
    %139 = arith.mulf %136, %108 : vector<8x64xf32>
    %140 = arith.mulf %135, %137 : vector<8x64xf32>
    %141 = arith.addf %139, %140 : vector<8x64xf32>
    %142 = math.tanh %141 : vector<8x64xf32>
    %143 = arith.mulf %138, %142 : vector<8x64xf32>
    %144 = arith.index_cast %118 : i32 to index
    %c0_43 = arith.constant 0 : index
    %145 = vector.load %arg1[%144, %c0_43] : memref<64x64xf32, #tpu.memory_space<vmem>>, vector<8x64xf32>
    %cst_44 = arith.constant 0.000000e+00 : f32
    %146 = vector.broadcast %cst_44 : f32 to vector<8x64xf32>
    %147 = arith.cmpf one, %145, %146 : vector<8x64xf32>
    %148 = arith.select %147, %143, %107 : vector<8x64xi1>, vector<8x64xf32>
    %149 = arith.select %147, %141, %108 : vector<8x64xi1>, vector<8x64xf32>
    %cst_45 = arith.constant 0.000000e+00 : f32
    %150 = vector.broadcast %cst_45 : f32 to vector<8x64xf32>
    %151 = arith.select %147, %143, %150 : vector<8x64xi1>, vector<8x64xf32>
    %152 = vector.extract_strided_slice %151 {offsets = [0, 0], sizes = [8, 32], strides = [1, 1]} : vector<8x64xf32> to vector<8x32xf32>
    %153 = arith.index_cast %118 : i32 to index
    %c0_46 = arith.constant 0 : index
    %154 = vector.load %arg16[%153, %c0_46] : memref<64x64xf32, #tpu.memory_space<vmem>>, vector<8x32xf32>
    tpu.vector_store %arg16[%153, %c0_46], %152 {strides = array<i32>} : memref<64x64xf32, #tpu.memory_space<vmem>>, vector<8x32xf32>,
    %155 = vector.extract_strided_slice %151 {offsets = [0, 32], sizes = [8, 32], strides = [1, 1]} : vector<8x64xf32> to vector<8x32xf32>
    %156 = arith.index_cast %121 : i32 to index
    %c32_47 = arith.constant 32 : index
    %157 = vector.load %arg16[%156, %c32_47] : memref<64x64xf32, #tpu.memory_space<vmem>>, vector<8x32xf32>
    tpu.vector_store %arg16[%156, %c32_47], %155 {strides = array<i32>} : memref<64x64xf32, #tpu.memory_space<vmem>>, vector<8x32xf32>,
    %c3_i32 = arith.constant 3 : i32
    %c8_i32_48 = arith.constant 8 : i32
    %158 = arith.muli %c3_i32, %c8_i32_48 : i32
    %159 = tpu.assume_multiple %158, 8 : i32
    %c7_i32_49 = arith.constant 7 : i32
    %160 = arith.subi %c7_i32_49, %c3_i32 : i32
    %c8_i32_50 = arith.constant 8 : i32
    %161 = arith.muli %160, %c8_i32_50 : i32
    %162 = tpu.assume_multiple %161, 8 : i32
    %163 = arith.index_cast %159 : i32 to index
    %c0_51 = arith.constant 0 : index
    %164 = vector.load %arg15[%163, %c0_51] : memref<64x256xf32, #tpu.memory_space<vmem>>, vector<8x256xf32>
    %165 = arith.index_cast %162 : i32 to index
    %c0_52 = arith.constant 0 : index
    %166 = vector.load %arg15[%165, %c0_52] : memref<64x256xf32, #tpu.memory_space<vmem>>, vector<8x256xf32>
    %167 = arith.select %25, %164, %166 : vector<8x256xi1>, vector<8x256xf32>
    %cst_53 = arith.constant dense<0.000000e+00> : vector<8x256xf32>
    %168 = tpu.matmul %148, %28, %cst_53 {dimension_numbers = #tpu.dot_dimension_numbers<[1], [0], [0], [1], [0, 0, 1, 1], [], []>} : vector<8x64xf32>, vector<64x256xf32>, vector<8x256xf32> -> vector<8x256xf32>
    %169 = arith.addf %167, %168 : vector<8x256xf32>
    %170 = math.tanh %169 : vector<8x256xf32>
    %cst_54 = arith.constant 5.000000e-01 : f32
    %171 = vector.broadcast %cst_54 : f32 to vector<8x256xf32>
    %172 = arith.mulf %171, %170 : vector<8x256xf32>
    %cst_55 = arith.constant 5.000000e-01 : f32
    %173 = vector.broadcast %cst_55 : f32 to vector<8x256xf32>
    %174 = arith.addf %172, %173 : vector<8x256xf32>
    %175 = arith.select %5, %170, %174 : vector<8x256xi1>, vector<8x256xf32>
    %176 = vector.extract_strided_slice %175 {offsets = [0, 0], sizes = [8, 64], strides = [1, 1]} : vector<8x256xf32> to vector<8x64xf32>
    %177 = vector.extract_strided_slice %175 {offsets = [0, 64], sizes = [8, 64], strides = [1, 1]} : vector<8x256xf32> to vector<8x64xf32>
    %178 = vector.extract_strided_slice %175 {offsets = [0, 128], sizes = [8, 64], strides = [1, 1]} : vector<8x256xf32> to vector<8x64xf32>
    %179 = vector.extract_strided_slice %175 {offsets = [0, 192], sizes = [8, 64], strides = [1, 1]} : vector<8x256xf32> to vector<8x64xf32>
    %180 = arith.mulf %177, %149 : vector<8x64xf32>
    %181 = arith.mulf %176, %178 : vector<8x64xf32>
    %182 = arith.addf %180, %181 : vector<8x64xf32>
    %183 = math.tanh %182 : vector<8x64xf32>
    %184 = arith.mulf %179, %183 : vector<8x64xf32>
    %185 = arith.index_cast %159 : i32 to index
    %c0_56 = arith.constant 0 : index
    %186 = vector.load %arg1[%185, %c0_56] : memref<64x64xf32, #tpu.memory_space<vmem>>, vector<8x64xf32>
    %cst_57 = arith.constant 0.000000e+00 : f32
    %187 = vector.broadcast %cst_57 : f32 to vector<8x64xf32>
    %188 = arith.cmpf one, %186, %187 : vector<8x64xf32>
    %189 = arith.select %188, %184, %148 : vector<8x64xi1>, vector<8x64xf32>
    %190 = arith.select %188, %182, %149 : vector<8x64xi1>, vector<8x64xf32>
    %cst_58 = arith.constant 0.000000e+00 : f32
    %191 = vector.broadcast %cst_58 : f32 to vector<8x64xf32>
    %192 = arith.select %188, %184, %191 : vector<8x64xi1>, vector<8x64xf32>
    %193 = vector.extract_strided_slice %192 {offsets = [0, 0], sizes = [8, 32], strides = [1, 1]} : vector<8x64xf32> to vector<8x32xf32>
    %194 = arith.index_cast %159 : i32 to index
    %c0_59 = arith.constant 0 : index
    %195 = vector.load %arg16[%194, %c0_59] : memref<64x64xf32, #tpu.memory_space<vmem>>, vector<8x32xf32>
    tpu.vector_store %arg16[%194, %c0_59], %193 {strides = array<i32>} : memref<64x64xf32, #tpu.memory_space<vmem>>, vector<8x32xf32>,
    %196 = vector.extract_strided_slice %192 {offsets = [0, 32], sizes = [8, 32], strides = [1, 1]} : vector<8x64xf32> to vector<8x32xf32>
    %197 = arith.index_cast %162 : i32 to index
    %c32_60 = arith.constant 32 : index
    %198 = vector.load %arg16[%197, %c32_60] : memref<64x64xf32, #tpu.memory_space<vmem>>, vector<8x32xf32>
    tpu.vector_store %arg16[%197, %c32_60], %196 {strides = array<i32>} : memref<64x64xf32, #tpu.memory_space<vmem>>, vector<8x32xf32>,
    %c4_i32 = arith.constant 4 : i32
    %c8_i32_61 = arith.constant 8 : i32
    %199 = arith.muli %c4_i32, %c8_i32_61 : i32
    %200 = tpu.assume_multiple %199, 8 : i32
    %c7_i32_62 = arith.constant 7 : i32
    %201 = arith.subi %c7_i32_62, %c4_i32 : i32
    %c8_i32_63 = arith.constant 8 : i32
    %202 = arith.muli %201, %c8_i32_63 : i32
    %203 = tpu.assume_multiple %202, 8 : i32
    %204 = arith.index_cast %200 : i32 to index
    %c0_64 = arith.constant 0 : index
    %205 = vector.load %arg15[%204, %c0_64] : memref<64x256xf32, #tpu.memory_space<vmem>>, vector<8x256xf32>
    %206 = arith.index_cast %203 : i32 to index
    %c0_65 = arith.constant 0 : index
    %207 = vector.load %arg15[%206, %c0_65] : memref<64x256xf32, #tpu.memory_space<vmem>>, vector<8x256xf32>
    %208 = arith.select %25, %205, %207 : vector<8x256xi1>, vector<8x256xf32>
    %cst_66 = arith.constant dense<0.000000e+00> : vector<8x256xf32>
    %209 = tpu.matmul %189, %28, %cst_66 {dimension_numbers = #tpu.dot_dimension_numbers<[1], [0], [0], [1], [0, 0, 1, 1], [], []>} : vector<8x64xf32>, vector<64x256xf32>, vector<8x256xf32> -> vector<8x256xf32>
    %210 = arith.addf %208, %209 : vector<8x256xf32>
    %211 = math.tanh %210 : vector<8x256xf32>
    %cst_67 = arith.constant 5.000000e-01 : f32
    %212 = vector.broadcast %cst_67 : f32 to vector<8x256xf32>
    %213 = arith.mulf %212, %211 : vector<8x256xf32>
    %cst_68 = arith.constant 5.000000e-01 : f32
    %214 = vector.broadcast %cst_68 : f32 to vector<8x256xf32>
    %215 = arith.addf %213, %214 : vector<8x256xf32>
    %216 = arith.select %5, %211, %215 : vector<8x256xi1>, vector<8x256xf32>
    %217 = vector.extract_strided_slice %216 {offsets = [0, 0], sizes = [8, 64], strides = [1, 1]} : vector<8x256xf32> to vector<8x64xf32>
    %218 = vector.extract_strided_slice %216 {offsets = [0, 64], sizes = [8, 64], strides = [1, 1]} : vector<8x256xf32> to vector<8x64xf32>
    %219 = vector.extract_strided_slice %216 {offsets = [0, 128], sizes = [8, 64], strides = [1, 1]} : vector<8x256xf32> to vector<8x64xf32>
    %220 = vector.extract_strided_slice %216 {offsets = [0, 192], sizes = [8, 64], strides = [1, 1]} : vector<8x256xf32> to vector<8x64xf32>
    %221 = arith.mulf %218, %190 : vector<8x64xf32>
    %222 = arith.mulf %217, %219 : vector<8x64xf32>
    %223 = arith.addf %221, %222 : vector<8x64xf32>
    %224 = math.tanh %223 : vector<8x64xf32>
    %225 = arith.mulf %220, %224 : vector<8x64xf32>
    %226 = arith.index_cast %200 : i32 to index
    %c0_69 = arith.constant 0 : index
    %227 = vector.load %arg1[%226, %c0_69] : memref<64x64xf32, #tpu.memory_space<vmem>>, vector<8x64xf32>
    %cst_70 = arith.constant 0.000000e+00 : f32
    %228 = vector.broadcast %cst_70 : f32 to vector<8x64xf32>
    %229 = arith.cmpf one, %227, %228 : vector<8x64xf32>
    %230 = arith.select %229, %225, %189 : vector<8x64xi1>, vector<8x64xf32>
    %231 = arith.select %229, %223, %190 : vector<8x64xi1>, vector<8x64xf32>
    %cst_71 = arith.constant 0.000000e+00 : f32
    %232 = vector.broadcast %cst_71 : f32 to vector<8x64xf32>
    %233 = arith.select %229, %225, %232 : vector<8x64xi1>, vector<8x64xf32>
    %234 = vector.extract_strided_slice %233 {offsets = [0, 0], sizes = [8, 32], strides = [1, 1]} : vector<8x64xf32> to vector<8x32xf32>
    %235 = arith.index_cast %200 : i32 to index
    %c0_72 = arith.constant 0 : index
    %236 = vector.load %arg16[%235, %c0_72] : memref<64x64xf32, #tpu.memory_space<vmem>>, vector<8x32xf32>
    tpu.vector_store %arg16[%235, %c0_72], %234 {strides = array<i32>} : memref<64x64xf32, #tpu.memory_space<vmem>>, vector<8x32xf32>,
    %237 = vector.extract_strided_slice %233 {offsets = [0, 32], sizes = [8, 32], strides = [1, 1]} : vector<8x64xf32> to vector<8x32xf32>
    %238 = arith.index_cast %203 : i32 to index
    %c32_73 = arith.constant 32 : index
    %239 = vector.load %arg16[%238, %c32_73] : memref<64x64xf32, #tpu.memory_space<vmem>>, vector<8x32xf32>
    tpu.vector_store %arg16[%238, %c32_73], %237 {strides = array<i32>} : memref<64x64xf32, #tpu.memory_space<vmem>>, vector<8x32xf32>,
    %c5_i32 = arith.constant 5 : i32
    %c8_i32_74 = arith.constant 8 : i32
    %240 = arith.muli %c5_i32, %c8_i32_74 : i32
    %241 = tpu.assume_multiple %240, 8 : i32
    %c7_i32_75 = arith.constant 7 : i32
    %242 = arith.subi %c7_i32_75, %c5_i32 : i32
    %c8_i32_76 = arith.constant 8 : i32
    %243 = arith.muli %242, %c8_i32_76 : i32
    %244 = tpu.assume_multiple %243, 8 : i32
    %245 = arith.index_cast %241 : i32 to index
    %c0_77 = arith.constant 0 : index
    %246 = vector.load %arg15[%245, %c0_77] : memref<64x256xf32, #tpu.memory_space<vmem>>, vector<8x256xf32>
    %247 = arith.index_cast %244 : i32 to index
    %c0_78 = arith.constant 0 : index
    %248 = vector.load %arg15[%247, %c0_78] : memref<64x256xf32, #tpu.memory_space<vmem>>, vector<8x256xf32>
    %249 = arith.select %25, %246, %248 : vector<8x256xi1>, vector<8x256xf32>
    %cst_79 = arith.constant dense<0.000000e+00> : vector<8x256xf32>
    %250 = tpu.matmul %230, %28, %cst_79 {dimension_numbers = #tpu.dot_dimension_numbers<[1], [0], [0], [1], [0, 0, 1, 1], [], []>} : vector<8x64xf32>, vector<64x256xf32>, vector<8x256xf32> -> vector<8x256xf32>
    %251 = arith.addf %249, %250 : vector<8x256xf32>
    %252 = math.tanh %251 : vector<8x256xf32>
    %cst_80 = arith.constant 5.000000e-01 : f32
    %253 = vector.broadcast %cst_80 : f32 to vector<8x256xf32>
    %254 = arith.mulf %253, %252 : vector<8x256xf32>
    %cst_81 = arith.constant 5.000000e-01 : f32
    %255 = vector.broadcast %cst_81 : f32 to vector<8x256xf32>
    %256 = arith.addf %254, %255 : vector<8x256xf32>
    %257 = arith.select %5, %252, %256 : vector<8x256xi1>, vector<8x256xf32>
    %258 = vector.extract_strided_slice %257 {offsets = [0, 0], sizes = [8, 64], strides = [1, 1]} : vector<8x256xf32> to vector<8x64xf32>
    %259 = vector.extract_strided_slice %257 {offsets = [0, 64], sizes = [8, 64], strides = [1, 1]} : vector<8x256xf32> to vector<8x64xf32>
    %260 = vector.extract_strided_slice %257 {offsets = [0, 128], sizes = [8, 64], strides = [1, 1]} : vector<8x256xf32> to vector<8x64xf32>
    %261 = vector.extract_strided_slice %257 {offsets = [0, 192], sizes = [8, 64], strides = [1, 1]} : vector<8x256xf32> to vector<8x64xf32>
    %262 = arith.mulf %259, %231 : vector<8x64xf32>
    %263 = arith.mulf %258, %260 : vector<8x64xf32>
    %264 = arith.addf %262, %263 : vector<8x64xf32>
    %265 = math.tanh %264 : vector<8x64xf32>
    %266 = arith.mulf %261, %265 : vector<8x64xf32>
    %267 = arith.index_cast %241 : i32 to index
    %c0_82 = arith.constant 0 : index
    %268 = vector.load %arg1[%267, %c0_82] : memref<64x64xf32, #tpu.memory_space<vmem>>, vector<8x64xf32>
    %cst_83 = arith.constant 0.000000e+00 : f32
    %269 = vector.broadcast %cst_83 : f32 to vector<8x64xf32>
    %270 = arith.cmpf one, %268, %269 : vector<8x64xf32>
    %271 = arith.select %270, %266, %230 : vector<8x64xi1>, vector<8x64xf32>
    %272 = arith.select %270, %264, %231 : vector<8x64xi1>, vector<8x64xf32>
    %cst_84 = arith.constant 0.000000e+00 : f32
    %273 = vector.broadcast %cst_84 : f32 to vector<8x64xf32>
    %274 = arith.select %270, %266, %273 : vector<8x64xi1>, vector<8x64xf32>
    %275 = vector.extract_strided_slice %274 {offsets = [0, 0], sizes = [8, 32], strides = [1, 1]} : vector<8x64xf32> to vector<8x32xf32>
    %276 = arith.index_cast %241 : i32 to index
    %c0_85 = arith.constant 0 : index
    %277 = vector.load %arg16[%276, %c0_85] : memref<64x64xf32, #tpu.memory_space<vmem>>, vector<8x32xf32>
    tpu.vector_store %arg16[%276, %c0_85], %275 {strides = array<i32>} : memref<64x64xf32, #tpu.memory_space<vmem>>, vector<8x32xf32>,
    %278 = vector.extract_strided_slice %274 {offsets = [0, 32], sizes = [8, 32], strides = [1, 1]} : vector<8x64xf32> to vector<8x32xf32>
    %279 = arith.index_cast %244 : i32 to index
    %c32_86 = arith.constant 32 : index
    %280 = vector.load %arg16[%279, %c32_86] : memref<64x64xf32, #tpu.memory_space<vmem>>, vector<8x32xf32>
    tpu.vector_store %arg16[%279, %c32_86], %278 {strides = array<i32>} : memref<64x64xf32, #tpu.memory_space<vmem>>, vector<8x32xf32>,
    %c6_i32 = arith.constant 6 : i32
    %c8_i32_87 = arith.constant 8 : i32
    %281 = arith.muli %c6_i32, %c8_i32_87 : i32
    %282 = tpu.assume_multiple %281, 8 : i32
    %c7_i32_88 = arith.constant 7 : i32
    %283 = arith.subi %c7_i32_88, %c6_i32 : i32
    %c8_i32_89 = arith.constant 8 : i32
    %284 = arith.muli %283, %c8_i32_89 : i32
    %285 = tpu.assume_multiple %284, 8 : i32
    %286 = arith.index_cast %282 : i32 to index
    %c0_90 = arith.constant 0 : index
    %287 = vector.load %arg15[%286, %c0_90] : memref<64x256xf32, #tpu.memory_space<vmem>>, vector<8x256xf32>
    %288 = arith.index_cast %285 : i32 to index
    %c0_91 = arith.constant 0 : index
    %289 = vector.load %arg15[%288, %c0_91] : memref<64x256xf32, #tpu.memory_space<vmem>>, vector<8x256xf32>
    %290 = arith.select %25, %287, %289 : vector<8x256xi1>, vector<8x256xf32>
    %cst_92 = arith.constant dense<0.000000e+00> : vector<8x256xf32>
    %291 = tpu.matmul %271, %28, %cst_92 {dimension_numbers = #tpu.dot_dimension_numbers<[1], [0], [0], [1], [0, 0, 1, 1], [], []>} : vector<8x64xf32>, vector<64x256xf32>, vector<8x256xf32> -> vector<8x256xf32>
    %292 = arith.addf %290, %291 : vector<8x256xf32>
    %293 = math.tanh %292 : vector<8x256xf32>
    %cst_93 = arith.constant 5.000000e-01 : f32
    %294 = vector.broadcast %cst_93 : f32 to vector<8x256xf32>
    %295 = arith.mulf %294, %293 : vector<8x256xf32>
    %cst_94 = arith.constant 5.000000e-01 : f32
    %296 = vector.broadcast %cst_94 : f32 to vector<8x256xf32>
    %297 = arith.addf %295, %296 : vector<8x256xf32>
    %298 = arith.select %5, %293, %297 : vector<8x256xi1>, vector<8x256xf32>
    %299 = vector.extract_strided_slice %298 {offsets = [0, 0], sizes = [8, 64], strides = [1, 1]} : vector<8x256xf32> to vector<8x64xf32>
    %300 = vector.extract_strided_slice %298 {offsets = [0, 64], sizes = [8, 64], strides = [1, 1]} : vector<8x256xf32> to vector<8x64xf32>
    %301 = vector.extract_strided_slice %298 {offsets = [0, 128], sizes = [8, 64], strides = [1, 1]} : vector<8x256xf32> to vector<8x64xf32>
    %302 = vector.extract_strided_slice %298 {offsets = [0, 192], sizes = [8, 64], strides = [1, 1]} : vector<8x256xf32> to vector<8x64xf32>
    %303 = arith.mulf %300, %272 : vector<8x64xf32>
    %304 = arith.mulf %299, %301 : vector<8x64xf32>
    %305 = arith.addf %303, %304 : vector<8x64xf32>
    %306 = math.tanh %305 : vector<8x64xf32>
    %307 = arith.mulf %302, %306 : vector<8x64xf32>
    %308 = arith.index_cast %282 : i32 to index
    %c0_95 = arith.constant 0 : index
    %309 = vector.load %arg1[%308, %c0_95] : memref<64x64xf32, #tpu.memory_space<vmem>>, vector<8x64xf32>
    %cst_96 = arith.constant 0.000000e+00 : f32
    %310 = vector.broadcast %cst_96 : f32 to vector<8x64xf32>
    %311 = arith.cmpf one, %309, %310 : vector<8x64xf32>
    %312 = arith.select %311, %307, %271 : vector<8x64xi1>, vector<8x64xf32>
    %313 = arith.select %311, %305, %272 : vector<8x64xi1>, vector<8x64xf32>
    %cst_97 = arith.constant 0.000000e+00 : f32
    %314 = vector.broadcast %cst_97 : f32 to vector<8x64xf32>
    %315 = arith.select %311, %307, %314 : vector<8x64xi1>, vector<8x64xf32>
    %316 = vector.extract_strided_slice %315 {offsets = [0, 0], sizes = [8, 32], strides = [1, 1]} : vector<8x64xf32> to vector<8x32xf32>
    %317 = arith.index_cast %282 : i32 to index
    %c0_98 = arith.constant 0 : index
    %318 = vector.load %arg16[%317, %c0_98] : memref<64x64xf32, #tpu.memory_space<vmem>>, vector<8x32xf32>
    tpu.vector_store %arg16[%317, %c0_98], %316 {strides = array<i32>} : memref<64x64xf32, #tpu.memory_space<vmem>>, vector<8x32xf32>,
    %319 = vector.extract_strided_slice %315 {offsets = [0, 32], sizes = [8, 32], strides = [1, 1]} : vector<8x64xf32> to vector<8x32xf32>
    %320 = arith.index_cast %285 : i32 to index
    %c32_99 = arith.constant 32 : index
    %321 = vector.load %arg16[%320, %c32_99] : memref<64x64xf32, #tpu.memory_space<vmem>>, vector<8x32xf32>
    tpu.vector_store %arg16[%320, %c32_99], %319 {strides = array<i32>} : memref<64x64xf32, #tpu.memory_space<vmem>>, vector<8x32xf32>,
    %c7_i32_100 = arith.constant 7 : i32
    %c8_i32_101 = arith.constant 8 : i32
    %322 = arith.muli %c7_i32_100, %c8_i32_101 : i32
    %323 = tpu.assume_multiple %322, 8 : i32
    %c7_i32_102 = arith.constant 7 : i32
    %324 = arith.subi %c7_i32_102, %c7_i32_100 : i32
    %c8_i32_103 = arith.constant 8 : i32
    %325 = arith.muli %324, %c8_i32_103 : i32
    %326 = tpu.assume_multiple %325, 8 : i32
    %327 = arith.index_cast %323 : i32 to index
    %c0_104 = arith.constant 0 : index
    %328 = vector.load %arg15[%327, %c0_104] : memref<64x256xf32, #tpu.memory_space<vmem>>, vector<8x256xf32>
    %329 = arith.index_cast %326 : i32 to index
    %c0_105 = arith.constant 0 : index
    %330 = vector.load %arg15[%329, %c0_105] : memref<64x256xf32, #tpu.memory_space<vmem>>, vector<8x256xf32>
    %331 = arith.select %25, %328, %330 : vector<8x256xi1>, vector<8x256xf32>
    %cst_106 = arith.constant dense<0.000000e+00> : vector<8x256xf32>
    %332 = tpu.matmul %312, %28, %cst_106 {dimension_numbers = #tpu.dot_dimension_numbers<[1], [0], [0], [1], [0, 0, 1, 1], [], []>} : vector<8x64xf32>, vector<64x256xf32>, vector<8x256xf32> -> vector<8x256xf32>
    %333 = arith.addf %331, %332 : vector<8x256xf32>
    %334 = math.tanh %333 : vector<8x256xf32>
    %cst_107 = arith.constant 5.000000e-01 : f32
    %335 = vector.broadcast %cst_107 : f32 to vector<8x256xf32>
    %336 = arith.mulf %335, %334 : vector<8x256xf32>
    %cst_108 = arith.constant 5.000000e-01 : f32
    %337 = vector.broadcast %cst_108 : f32 to vector<8x256xf32>
    %338 = arith.addf %336, %337 : vector<8x256xf32>
    %339 = arith.select %5, %334, %338 : vector<8x256xi1>, vector<8x256xf32>
    %340 = vector.extract_strided_slice %339 {offsets = [0, 0], sizes = [8, 64], strides = [1, 1]} : vector<8x256xf32> to vector<8x64xf32>
    %341 = vector.extract_strided_slice %339 {offsets = [0, 64], sizes = [8, 64], strides = [1, 1]} : vector<8x256xf32> to vector<8x64xf32>
    %342 = vector.extract_strided_slice %339 {offsets = [0, 128], sizes = [8, 64], strides = [1, 1]} : vector<8x256xf32> to vector<8x64xf32>
    %343 = vector.extract_strided_slice %339 {offsets = [0, 192], sizes = [8, 64], strides = [1, 1]} : vector<8x256xf32> to vector<8x64xf32>
    %344 = arith.mulf %341, %313 : vector<8x64xf32>
    %345 = arith.mulf %340, %342 : vector<8x64xf32>
    %346 = arith.addf %344, %345 : vector<8x64xf32>
    %347 = math.tanh %346 : vector<8x64xf32>
    %348 = arith.mulf %343, %347 : vector<8x64xf32>
    %349 = arith.index_cast %323 : i32 to index
    %c0_109 = arith.constant 0 : index
    %350 = vector.load %arg1[%349, %c0_109] : memref<64x64xf32, #tpu.memory_space<vmem>>, vector<8x64xf32>
    %cst_110 = arith.constant 0.000000e+00 : f32
    %351 = vector.broadcast %cst_110 : f32 to vector<8x64xf32>
    %352 = arith.cmpf one, %350, %351 : vector<8x64xf32>
    %353 = arith.select %352, %348, %312 : vector<8x64xi1>, vector<8x64xf32>
    %354 = arith.select %352, %346, %313 : vector<8x64xi1>, vector<8x64xf32>
    %cst_111 = arith.constant 0.000000e+00 : f32
    %355 = vector.broadcast %cst_111 : f32 to vector<8x64xf32>
    %356 = arith.select %352, %348, %355 : vector<8x64xi1>, vector<8x64xf32>
    %357 = vector.extract_strided_slice %356 {offsets = [0, 0], sizes = [8, 32], strides = [1, 1]} : vector<8x64xf32> to vector<8x32xf32>
    %358 = arith.index_cast %323 : i32 to index
    %c0_112 = arith.constant 0 : index
    %359 = vector.load %arg16[%358, %c0_112] : memref<64x64xf32, #tpu.memory_space<vmem>>, vector<8x32xf32>
    tpu.vector_store %arg16[%358, %c0_112], %357 {strides = array<i32>} : memref<64x64xf32, #tpu.memory_space<vmem>>, vector<8x32xf32>,
    %360 = vector.extract_strided_slice %356 {offsets = [0, 32], sizes = [8, 32], strides = [1, 1]} : vector<8x64xf32> to vector<8x32xf32>
    %361 = arith.index_cast %326 : i32 to index
    %c32_113 = arith.constant 32 : index
    %362 = vector.load %arg16[%361, %c32_113] : memref<64x64xf32, #tpu.memory_space<vmem>>, vector<8x32xf32>
    tpu.vector_store %arg16[%361, %c32_113], %360 {strides = array<i32>} : memref<64x64xf32, #tpu.memory_space<vmem>>, vector<8x32xf32>,
    %c8_i32_114 = arith.constant 8 : i32
    %c0_115 = arith.constant 0 : index
    %c0_116 = arith.constant 0 : index
    %363 = vector.load %arg5[%c0_115, %c0_116] : memref<64x256xf32, #tpu.memory_space<vmem>>, vector<64x256xf32>
    %c0_117 = arith.constant 0 : index
    %c0_118 = arith.constant 0 : index
    %364 = vector.load %arg6[%c0_117, %c0_118] : memref<64x256xf32, #tpu.memory_space<vmem>>, vector<64x256xf32>
    %c0_119 = arith.constant 0 : index
    %c0_120 = arith.constant 0 : index
    %365 = vector.load %arg7[%c0_119, %c0_120] : memref<1x256xf32, #tpu.memory_space<vmem>>, vector<1x256xf32>
    %c0_121 = arith.constant 0 : index
    %c0_122 = arith.constant 0 : index
    %366 = vector.load %arg16[%c0_121, %c0_122] : memref<64x64xf32, #tpu.memory_space<vmem>>, vector<64x64xf32>
    %cst_123 = arith.constant dense<0.000000e+00> : vector<64x256xf32>
    %367 = tpu.matmul %366, %363, %cst_123 {dimension_numbers = #tpu.dot_dimension_numbers<[1], [0], [0], [1], [0, 0, 1, 1], [], []>} : vector<64x64xf32>, vector<64x256xf32>, vector<64x256xf32> -> vector<64x256xf32>
    %368 = vector.broadcast %365 : vector<1x256xf32> to vector<64x256xf32>
    %369 = arith.addf %367, %368 : vector<64x256xf32>
    %c0_124 = arith.constant 0 : index
    %c0_125 = arith.constant 0 : index
    %370 = vector.load %arg15[%c0_124, %c0_125] : memref<64x256xf32, #tpu.memory_space<vmem>>, vector<64x256xf32>
    tpu.vector_store %arg15[%c0_124, %c0_125], %369 {strides = array<i32>} : memref<64x256xf32, #tpu.memory_space<vmem>>, vector<64x256xf32>,
    %c0_i32_126 = arith.constant 0 : i32
    %c8_i32_127 = arith.constant 8 : i32
    %371 = arith.muli %c0_i32_126, %c8_i32_127 : i32
    %372 = tpu.assume_multiple %371, 8 : i32
    %c7_i32_128 = arith.constant 7 : i32
    %373 = arith.subi %c7_i32_128, %c0_i32_126 : i32
    %c8_i32_129 = arith.constant 8 : i32
    %374 = arith.muli %373, %c8_i32_129 : i32
    %375 = tpu.assume_multiple %374, 8 : i32
    %376 = arith.index_cast %372 : i32 to index
    %c0_130 = arith.constant 0 : index
    %377 = vector.load %arg15[%376, %c0_130] : memref<64x256xf32, #tpu.memory_space<vmem>>, vector<8x256xf32>
    %378 = arith.index_cast %375 : i32 to index
    %c0_131 = arith.constant 0 : index
    %379 = vector.load %arg15[%378, %c0_131] : memref<64x256xf32, #tpu.memory_space<vmem>>, vector<8x256xf32>
    %380 = arith.select %25, %377, %379 : vector<8x256xi1>, vector<8x256xf32>
    %cst_132 = arith.constant dense<0.000000e+00> : vector<8x256xf32>
    %381 = tpu.matmul %26, %364, %cst_132 {dimension_numbers = #tpu.dot_dimension_numbers<[1], [0], [0], [1], [0, 0, 1, 1], [], []>} : vector<8x64xf32>, vector<64x256xf32>, vector<8x256xf32> -> vector<8x256xf32>
    %382 = arith.addf %380, %381 : vector<8x256xf32>
    %383 = math.tanh %382 : vector<8x256xf32>
    %cst_133 = arith.constant 5.000000e-01 : f32
    %384 = vector.broadcast %cst_133 : f32 to vector<8x256xf32>
    %385 = arith.mulf %384, %383 : vector<8x256xf32>
    %cst_134 = arith.constant 5.000000e-01 : f32
    %386 = vector.broadcast %cst_134 : f32 to vector<8x256xf32>
    %387 = arith.addf %385, %386 : vector<8x256xf32>
    %388 = arith.select %5, %383, %387 : vector<8x256xi1>, vector<8x256xf32>
    %389 = vector.extract_strided_slice %388 {offsets = [0, 0], sizes = [8, 64], strides = [1, 1]} : vector<8x256xf32> to vector<8x64xf32>
    %390 = vector.extract_strided_slice %388 {offsets = [0, 64], sizes = [8, 64], strides = [1, 1]} : vector<8x256xf32> to vector<8x64xf32>
    %391 = vector.extract_strided_slice %388 {offsets = [0, 128], sizes = [8, 64], strides = [1, 1]} : vector<8x256xf32> to vector<8x64xf32>
    %392 = vector.extract_strided_slice %388 {offsets = [0, 192], sizes = [8, 64], strides = [1, 1]} : vector<8x256xf32> to vector<8x64xf32>
    %393 = arith.mulf %390, %26 : vector<8x64xf32>
    %394 = arith.mulf %389, %391 : vector<8x64xf32>
    %395 = arith.addf %393, %394 : vector<8x64xf32>
    %396 = math.tanh %395 : vector<8x64xf32>
    %397 = arith.mulf %392, %396 : vector<8x64xf32>
    %398 = arith.index_cast %372 : i32 to index
    %c0_135 = arith.constant 0 : index
    %399 = vector.load %arg1[%398, %c0_135] : memref<64x64xf32, #tpu.memory_space<vmem>>, vector<8x64xf32>
    %cst_136 = arith.constant 0.000000e+00 : f32
    %400 = vector.broadcast %cst_136 : f32 to vector<8x64xf32>
    %401 = arith.cmpf one, %399, %400 : vector<8x64xf32>
    %402 = arith.select %401, %397, %26 : vector<8x64xi1>, vector<8x64xf32>
    %403 = arith.select %401, %395, %26 : vector<8x64xi1>, vector<8x64xf32>
    %cst_137 = arith.constant 0.000000e+00 : f32
    %404 = vector.broadcast %cst_137 : f32 to vector<8x64xf32>
    %405 = arith.select %401, %397, %404 : vector<8x64xi1>, vector<8x64xf32>
    %406 = vector.extract_strided_slice %405 {offsets = [0, 0], sizes = [8, 32], strides = [1, 1]} : vector<8x64xf32> to vector<8x32xf32>
    %407 = arith.index_cast %372 : i32 to index
    %c0_138 = arith.constant 0 : index
    %408 = vector.load %arg12[%407, %c0_138] : memref<64x64xf32, #tpu.memory_space<vmem>>, vector<8x32xf32>
    tpu.vector_store %arg12[%407, %c0_138], %406 {strides = array<i32>} : memref<64x64xf32, #tpu.memory_space<vmem>>, vector<8x32xf32>,
    %409 = vector.extract_strided_slice %405 {offsets = [0, 32], sizes = [8, 32], strides = [1, 1]} : vector<8x64xf32> to vector<8x32xf32>
    %410 = arith.index_cast %375 : i32 to index
    %c32_139 = arith.constant 32 : index
    %411 = vector.load %arg12[%410, %c32_139] : memref<64x64xf32, #tpu.memory_space<vmem>>, vector<8x32xf32>
    tpu.vector_store %arg12[%410, %c32_139], %409 {strides = array<i32>} : memref<64x64xf32, #tpu.memory_space<vmem>>, vector<8x32xf32>,
    %c1_i32_140 = arith.constant 1 : i32
    %c8_i32_141 = arith.constant 8 : i32
    %412 = arith.muli %c1_i32_140, %c8_i32_141 : i32
    %413 = tpu.assume_multiple %412, 8 : i32
    %c7_i32_142 = arith.constant 7 : i32
    %414 = arith.subi %c7_i32_142, %c1_i32_140 : i32
    %c8_i32_143 = arith.constant 8 : i32
    %415 = arith.muli %414, %c8_i32_143 : i32
    %416 = tpu.assume_multiple %415, 8 : i32
    %417 = arith.index_cast %413 : i32 to index
    %c0_144 = arith.constant 0 : index
    %418 = vector.load %arg15[%417, %c0_144] : memref<64x256xf32, #tpu.memory_space<vmem>>, vector<8x256xf32>
    %419 = arith.index_cast %416 : i32 to index
    %c0_145 = arith.constant 0 : index
    %420 = vector.load %arg15[%419, %c0_145] : memref<64x256xf32, #tpu.memory_space<vmem>>, vector<8x256xf32>
    %421 = arith.select %25, %418, %420 : vector<8x256xi1>, vector<8x256xf32>
    %cst_146 = arith.constant dense<0.000000e+00> : vector<8x256xf32>
    %422 = tpu.matmul %402, %364, %cst_146 {dimension_numbers = #tpu.dot_dimension_numbers<[1], [0], [0], [1], [0, 0, 1, 1], [], []>} : vector<8x64xf32>, vector<64x256xf32>, vector<8x256xf32> -> vector<8x256xf32>
    %423 = arith.addf %421, %422 : vector<8x256xf32>
    %424 = math.tanh %423 : vector<8x256xf32>
    %cst_147 = arith.constant 5.000000e-01 : f32
    %425 = vector.broadcast %cst_147 : f32 to vector<8x256xf32>
    %426 = arith.mulf %425, %424 : vector<8x256xf32>
    %cst_148 = arith.constant 5.000000e-01 : f32
    %427 = vector.broadcast %cst_148 : f32 to vector<8x256xf32>
    %428 = arith.addf %426, %427 : vector<8x256xf32>
    %429 = arith.select %5, %424, %428 : vector<8x256xi1>, vector<8x256xf32>
    %430 = vector.extract_strided_slice %429 {offsets = [0, 0], sizes = [8, 64], strides = [1, 1]} : vector<8x256xf32> to vector<8x64xf32>
    %431 = vector.extract_strided_slice %429 {offsets = [0, 64], sizes = [8, 64], strides = [1, 1]} : vector<8x256xf32> to vector<8x64xf32>
    %432 = vector.extract_strided_slice %429 {offsets = [0, 128], sizes = [8, 64], strides = [1, 1]} : vector<8x256xf32> to vector<8x64xf32>
    %433 = vector.extract_strided_slice %429 {offsets = [0, 192], sizes = [8, 64], strides = [1, 1]} : vector<8x256xf32> to vector<8x64xf32>
    %434 = arith.mulf %431, %403 : vector<8x64xf32>
    %435 = arith.mulf %430, %432 : vector<8x64xf32>
    %436 = arith.addf %434, %435 : vector<8x64xf32>
    %437 = math.tanh %436 : vector<8x64xf32>
    %438 = arith.mulf %433, %437 : vector<8x64xf32>
    %439 = arith.index_cast %413 : i32 to index
    %c0_149 = arith.constant 0 : index
    %440 = vector.load %arg1[%439, %c0_149] : memref<64x64xf32, #tpu.memory_space<vmem>>, vector<8x64xf32>
    %cst_150 = arith.constant 0.000000e+00 : f32
    %441 = vector.broadcast %cst_150 : f32 to vector<8x64xf32>
    %442 = arith.cmpf one, %440, %441 : vector<8x64xf32>
    %443 = arith.select %442, %438, %402 : vector<8x64xi1>, vector<8x64xf32>
    %444 = arith.select %442, %436, %403 : vector<8x64xi1>, vector<8x64xf32>
    %cst_151 = arith.constant 0.000000e+00 : f32
    %445 = vector.broadcast %cst_151 : f32 to vector<8x64xf32>
    %446 = arith.select %442, %438, %445 : vector<8x64xi1>, vector<8x64xf32>
    %447 = vector.extract_strided_slice %446 {offsets = [0, 0], sizes = [8, 32], strides = [1, 1]} : vector<8x64xf32> to vector<8x32xf32>
    %448 = arith.index_cast %413 : i32 to index
    %c0_152 = arith.constant 0 : index
    %449 = vector.load %arg12[%448, %c0_152] : memref<64x64xf32, #tpu.memory_space<vmem>>, vector<8x32xf32>
    tpu.vector_store %arg12[%448, %c0_152], %447 {strides = array<i32>} : memref<64x64xf32, #tpu.memory_space<vmem>>, vector<8x32xf32>,
    %450 = vector.extract_strided_slice %446 {offsets = [0, 32], sizes = [8, 32], strides = [1, 1]} : vector<8x64xf32> to vector<8x32xf32>
    %451 = arith.index_cast %416 : i32 to index
    %c32_153 = arith.constant 32 : index
    %452 = vector.load %arg12[%451, %c32_153] : memref<64x64xf32, #tpu.memory_space<vmem>>, vector<8x32xf32>
    tpu.vector_store %arg12[%451, %c32_153], %450 {strides = array<i32>} : memref<64x64xf32, #tpu.memory_space<vmem>>, vector<8x32xf32>,
    %c2_i32_154 = arith.constant 2 : i32
    %c8_i32_155 = arith.constant 8 : i32
    %453 = arith.muli %c2_i32_154, %c8_i32_155 : i32
    %454 = tpu.assume_multiple %453, 8 : i32
    %c7_i32_156 = arith.constant 7 : i32
    %455 = arith.subi %c7_i32_156, %c2_i32_154 : i32
    %c8_i32_157 = arith.constant 8 : i32
    %456 = arith.muli %455, %c8_i32_157 : i32
    %457 = tpu.assume_multiple %456, 8 : i32
    %458 = arith.index_cast %454 : i32 to index
    %c0_158 = arith.constant 0 : index
    %459 = vector.load %arg15[%458, %c0_158] : memref<64x256xf32, #tpu.memory_space<vmem>>, vector<8x256xf32>
    %460 = arith.index_cast %457 : i32 to index
    %c0_159 = arith.constant 0 : index
    %461 = vector.load %arg15[%460, %c0_159] : memref<64x256xf32, #tpu.memory_space<vmem>>, vector<8x256xf32>
    %462 = arith.select %25, %459, %461 : vector<8x256xi1>, vector<8x256xf32>
    %cst_160 = arith.constant dense<0.000000e+00> : vector<8x256xf32>
    %463 = tpu.matmul %443, %364, %cst_160 {dimension_numbers = #tpu.dot_dimension_numbers<[1], [0], [0], [1], [0, 0, 1, 1], [], []>} : vector<8x64xf32>, vector<64x256xf32>, vector<8x256xf32> -> vector<8x256xf32>
    %464 = arith.addf %462, %463 : vector<8x256xf32>
    %465 = math.tanh %464 : vector<8x256xf32>
    %cst_161 = arith.constant 5.000000e-01 : f32
    %466 = vector.broadcast %cst_161 : f32 to vector<8x256xf32>
    %467 = arith.mulf %466, %465 : vector<8x256xf32>
    %cst_162 = arith.constant 5.000000e-01 : f32
    %468 = vector.broadcast %cst_162 : f32 to vector<8x256xf32>
    %469 = arith.addf %467, %468 : vector<8x256xf32>
    %470 = arith.select %5, %465, %469 : vector<8x256xi1>, vector<8x256xf32>
    %471 = vector.extract_strided_slice %470 {offsets = [0, 0], sizes = [8, 64], strides = [1, 1]} : vector<8x256xf32> to vector<8x64xf32>
    %472 = vector.extract_strided_slice %470 {offsets = [0, 64], sizes = [8, 64], strides = [1, 1]} : vector<8x256xf32> to vector<8x64xf32>
    %473 = vector.extract_strided_slice %470 {offsets = [0, 128], sizes = [8, 64], strides = [1, 1]} : vector<8x256xf32> to vector<8x64xf32>
    %474 = vector.extract_strided_slice %470 {offsets = [0, 192], sizes = [8, 64], strides = [1, 1]} : vector<8x256xf32> to vector<8x64xf32>
    %475 = arith.mulf %472, %444 : vector<8x64xf32>
    %476 = arith.mulf %471, %473 : vector<8x64xf32>
    %477 = arith.addf %475, %476 : vector<8x64xf32>
    %478 = math.tanh %477 : vector<8x64xf32>
    %479 = arith.mulf %474, %478 : vector<8x64xf32>
    %480 = arith.index_cast %454 : i32 to index
    %c0_163 = arith.constant 0 : index
    %481 = vector.load %arg1[%480, %c0_163] : memref<64x64xf32, #tpu.memory_space<vmem>>, vector<8x64xf32>
    %cst_164 = arith.constant 0.000000e+00 : f32
    %482 = vector.broadcast %cst_164 : f32 to vector<8x64xf32>
    %483 = arith.cmpf one, %481, %482 : vector<8x64xf32>
    %484 = arith.select %483, %479, %443 : vector<8x64xi1>, vector<8x64xf32>
    %485 = arith.select %483, %477, %444 : vector<8x64xi1>, vector<8x64xf32>
    %cst_165 = arith.constant 0.000000e+00 : f32
    %486 = vector.broadcast %cst_165 : f32 to vector<8x64xf32>
    %487 = arith.select %483, %479, %486 : vector<8x64xi1>, vector<8x64xf32>
    %488 = vector.extract_strided_slice %487 {offsets = [0, 0], sizes = [8, 32], strides = [1, 1]} : vector<8x64xf32> to vector<8x32xf32>
    %489 = arith.index_cast %454 : i32 to index
    %c0_166 = arith.constant 0 : index
    %490 = vector.load %arg12[%489, %c0_166] : memref<64x64xf32, #tpu.memory_space<vmem>>, vector<8x32xf32>
    tpu.vector_store %arg12[%489, %c0_166], %488 {strides = array<i32>} : memref<64x64xf32, #tpu.memory_space<vmem>>, vector<8x32xf32>,
    %491 = vector.extract_strided_slice %487 {offsets = [0, 32], sizes = [8, 32], strides = [1, 1]} : vector<8x64xf32> to vector<8x32xf32>
    %492 = arith.index_cast %457 : i32 to index
    %c32_167 = arith.constant 32 : index
    %493 = vector.load %arg12[%492, %c32_167] : memref<64x64xf32, #tpu.memory_space<vmem>>, vector<8x32xf32>
    tpu.vector_store %arg12[%492, %c32_167], %491 {strides = array<i32>} : memref<64x64xf32, #tpu.memory_space<vmem>>, vector<8x32xf32>,
    %c3_i32_168 = arith.constant 3 : i32
    %c8_i32_169 = arith.constant 8 : i32
    %494 = arith.muli %c3_i32_168, %c8_i32_169 : i32
    %495 = tpu.assume_multiple %494, 8 : i32
    %c7_i32_170 = arith.constant 7 : i32
    %496 = arith.subi %c7_i32_170, %c3_i32_168 : i32
    %c8_i32_171 = arith.constant 8 : i32
    %497 = arith.muli %496, %c8_i32_171 : i32
    %498 = tpu.assume_multiple %497, 8 : i32
    %499 = arith.index_cast %495 : i32 to index
    %c0_172 = arith.constant 0 : index
    %500 = vector.load %arg15[%499, %c0_172] : memref<64x256xf32, #tpu.memory_space<vmem>>, vector<8x256xf32>
    %501 = arith.index_cast %498 : i32 to index
    %c0_173 = arith.constant 0 : index
    %502 = vector.load %arg15[%501, %c0_173] : memref<64x256xf32, #tpu.memory_space<vmem>>, vector<8x256xf32>
    %503 = arith.select %25, %500, %502 : vector<8x256xi1>, vector<8x256xf32>
    %cst_174 = arith.constant dense<0.000000e+00> : vector<8x256xf32>
    %504 = tpu.matmul %484, %364, %cst_174 {dimension_numbers = #tpu.dot_dimension_numbers<[1], [0], [0], [1], [0, 0, 1, 1], [], []>} : vector<8x64xf32>, vector<64x256xf32>, vector<8x256xf32> -> vector<8x256xf32>
    %505 = arith.addf %503, %504 : vector<8x256xf32>
    %506 = math.tanh %505 : vector<8x256xf32>
    %cst_175 = arith.constant 5.000000e-01 : f32
    %507 = vector.broadcast %cst_175 : f32 to vector<8x256xf32>
    %508 = arith.mulf %507, %506 : vector<8x256xf32>
    %cst_176 = arith.constant 5.000000e-01 : f32
    %509 = vector.broadcast %cst_176 : f32 to vector<8x256xf32>
    %510 = arith.addf %508, %509 : vector<8x256xf32>
    %511 = arith.select %5, %506, %510 : vector<8x256xi1>, vector<8x256xf32>
    %512 = vector.extract_strided_slice %511 {offsets = [0, 0], sizes = [8, 64], strides = [1, 1]} : vector<8x256xf32> to vector<8x64xf32>
    %513 = vector.extract_strided_slice %511 {offsets = [0, 64], sizes = [8, 64], strides = [1, 1]} : vector<8x256xf32> to vector<8x64xf32>
    %514 = vector.extract_strided_slice %511 {offsets = [0, 128], sizes = [8, 64], strides = [1, 1]} : vector<8x256xf32> to vector<8x64xf32>
    %515 = vector.extract_strided_slice %511 {offsets = [0, 192], sizes = [8, 64], strides = [1, 1]} : vector<8x256xf32> to vector<8x64xf32>
    %516 = arith.mulf %513, %485 : vector<8x64xf32>
    %517 = arith.mulf %512, %514 : vector<8x64xf32>
    %518 = arith.addf %516, %517 : vector<8x64xf32>
    %519 = math.tanh %518 : vector<8x64xf32>
    %520 = arith.mulf %515, %519 : vector<8x64xf32>
    %521 = arith.index_cast %495 : i32 to index
    %c0_177 = arith.constant 0 : index
    %522 = vector.load %arg1[%521, %c0_177] : memref<64x64xf32, #tpu.memory_space<vmem>>, vector<8x64xf32>
    %cst_178 = arith.constant 0.000000e+00 : f32
    %523 = vector.broadcast %cst_178 : f32 to vector<8x64xf32>
    %524 = arith.cmpf one, %522, %523 : vector<8x64xf32>
    %525 = arith.select %524, %520, %484 : vector<8x64xi1>, vector<8x64xf32>
    %526 = arith.select %524, %518, %485 : vector<8x64xi1>, vector<8x64xf32>
    %cst_179 = arith.constant 0.000000e+00 : f32
    %527 = vector.broadcast %cst_179 : f32 to vector<8x64xf32>
    %528 = arith.select %524, %520, %527 : vector<8x64xi1>, vector<8x64xf32>
    %529 = vector.extract_strided_slice %528 {offsets = [0, 0], sizes = [8, 32], strides = [1, 1]} : vector<8x64xf32> to vector<8x32xf32>
    %530 = arith.index_cast %495 : i32 to index
    %c0_180 = arith.constant 0 : index
    %531 = vector.load %arg12[%530, %c0_180] : memref<64x64xf32, #tpu.memory_space<vmem>>, vector<8x32xf32>
    tpu.vector_store %arg12[%530, %c0_180], %529 {strides = array<i32>} : memref<64x64xf32, #tpu.memory_space<vmem>>, vector<8x32xf32>,
    %532 = vector.extract_strided_slice %528 {offsets = [0, 32], sizes = [8, 32], strides = [1, 1]} : vector<8x64xf32> to vector<8x32xf32>
    %533 = arith.index_cast %498 : i32 to index
    %c32_181 = arith.constant 32 : index
    %534 = vector.load %arg12[%533, %c32_181] : memref<64x64xf32, #tpu.memory_space<vmem>>, vector<8x32xf32>
    tpu.vector_store %arg12[%533, %c32_181], %532 {strides = array<i32>} : memref<64x64xf32, #tpu.memory_space<vmem>>, vector<8x32xf32>,
    %c4_i32_182 = arith.constant 4 : i32
    %c8_i32_183 = arith.constant 8 : i32
    %535 = arith.muli %c4_i32_182, %c8_i32_183 : i32
    %536 = tpu.assume_multiple %535, 8 : i32
    %c7_i32_184 = arith.constant 7 : i32
    %537 = arith.subi %c7_i32_184, %c4_i32_182 : i32
    %c8_i32_185 = arith.constant 8 : i32
    %538 = arith.muli %537, %c8_i32_185 : i32
    %539 = tpu.assume_multiple %538, 8 : i32
    %540 = arith.index_cast %536 : i32 to index
    %c0_186 = arith.constant 0 : index
    %541 = vector.load %arg15[%540, %c0_186] : memref<64x256xf32, #tpu.memory_space<vmem>>, vector<8x256xf32>
    %542 = arith.index_cast %539 : i32 to index
    %c0_187 = arith.constant 0 : index
    %543 = vector.load %arg15[%542, %c0_187] : memref<64x256xf32, #tpu.memory_space<vmem>>, vector<8x256xf32>
    %544 = arith.select %25, %541, %543 : vector<8x256xi1>, vector<8x256xf32>
    %cst_188 = arith.constant dense<0.000000e+00> : vector<8x256xf32>
    %545 = tpu.matmul %525, %364, %cst_188 {dimension_numbers = #tpu.dot_dimension_numbers<[1], [0], [0], [1], [0, 0, 1, 1], [], []>} : vector<8x64xf32>, vector<64x256xf32>, vector<8x256xf32> -> vector<8x256xf32>
    %546 = arith.addf %544, %545 : vector<8x256xf32>
    %547 = math.tanh %546 : vector<8x256xf32>
    %cst_189 = arith.constant 5.000000e-01 : f32
    %548 = vector.broadcast %cst_189 : f32 to vector<8x256xf32>
    %549 = arith.mulf %548, %547 : vector<8x256xf32>
    %cst_190 = arith.constant 5.000000e-01 : f32
    %550 = vector.broadcast %cst_190 : f32 to vector<8x256xf32>
    %551 = arith.addf %549, %550 : vector<8x256xf32>
    %552 = arith.select %5, %547, %551 : vector<8x256xi1>, vector<8x256xf32>
    %553 = vector.extract_strided_slice %552 {offsets = [0, 0], sizes = [8, 64], strides = [1, 1]} : vector<8x256xf32> to vector<8x64xf32>
    %554 = vector.extract_strided_slice %552 {offsets = [0, 64], sizes = [8, 64], strides = [1, 1]} : vector<8x256xf32> to vector<8x64xf32>
    %555 = vector.extract_strided_slice %552 {offsets = [0, 128], sizes = [8, 64], strides = [1, 1]} : vector<8x256xf32> to vector<8x64xf32>
    %556 = vector.extract_strided_slice %552 {offsets = [0, 192], sizes = [8, 64], strides = [1, 1]} : vector<8x256xf32> to vector<8x64xf32>
    %557 = arith.mulf %554, %526 : vector<8x64xf32>
    %558 = arith.mulf %553, %555 : vector<8x64xf32>
    %559 = arith.addf %557, %558 : vector<8x64xf32>
    %560 = math.tanh %559 : vector<8x64xf32>
    %561 = arith.mulf %556, %560 : vector<8x64xf32>
    %562 = arith.index_cast %536 : i32 to index
    %c0_191 = arith.constant 0 : index
    %563 = vector.load %arg1[%562, %c0_191] : memref<64x64xf32, #tpu.memory_space<vmem>>, vector<8x64xf32>
    %cst_192 = arith.constant 0.000000e+00 : f32
    %564 = vector.broadcast %cst_192 : f32 to vector<8x64xf32>
    %565 = arith.cmpf one, %563, %564 : vector<8x64xf32>
    %566 = arith.select %565, %561, %525 : vector<8x64xi1>, vector<8x64xf32>
    %567 = arith.select %565, %559, %526 : vector<8x64xi1>, vector<8x64xf32>
    %cst_193 = arith.constant 0.000000e+00 : f32
    %568 = vector.broadcast %cst_193 : f32 to vector<8x64xf32>
    %569 = arith.select %565, %561, %568 : vector<8x64xi1>, vector<8x64xf32>
    %570 = vector.extract_strided_slice %569 {offsets = [0, 0], sizes = [8, 32], strides = [1, 1]} : vector<8x64xf32> to vector<8x32xf32>
    %571 = arith.index_cast %536 : i32 to index
    %c0_194 = arith.constant 0 : index
    %572 = vector.load %arg12[%571, %c0_194] : memref<64x64xf32, #tpu.memory_space<vmem>>, vector<8x32xf32>
    tpu.vector_store %arg12[%571, %c0_194], %570 {strides = array<i32>} : memref<64x64xf32, #tpu.memory_space<vmem>>, vector<8x32xf32>,
    %573 = vector.extract_strided_slice %569 {offsets = [0, 32], sizes = [8, 32], strides = [1, 1]} : vector<8x64xf32> to vector<8x32xf32>
    %574 = arith.index_cast %539 : i32 to index
    %c32_195 = arith.constant 32 : index
    %575 = vector.load %arg12[%574, %c32_195] : memref<64x64xf32, #tpu.memory_space<vmem>>, vector<8x32xf32>
    tpu.vector_store %arg12[%574, %c32_195], %573 {strides = array<i32>} : memref<64x64xf32, #tpu.memory_space<vmem>>, vector<8x32xf32>,
    %c5_i32_196 = arith.constant 5 : i32
    %c8_i32_197 = arith.constant 8 : i32
    %576 = arith.muli %c5_i32_196, %c8_i32_197 : i32
    %577 = tpu.assume_multiple %576, 8 : i32
    %c7_i32_198 = arith.constant 7 : i32
    %578 = arith.subi %c7_i32_198, %c5_i32_196 : i32
    %c8_i32_199 = arith.constant 8 : i32
    %579 = arith.muli %578, %c8_i32_199 : i32
    %580 = tpu.assume_multiple %579, 8 : i32
    %581 = arith.index_cast %577 : i32 to index
    %c0_200 = arith.constant 0 : index
    %582 = vector.load %arg15[%581, %c0_200] : memref<64x256xf32, #tpu.memory_space<vmem>>, vector<8x256xf32>
    %583 = arith.index_cast %580 : i32 to index
    %c0_201 = arith.constant 0 : index
    %584 = vector.load %arg15[%583, %c0_201] : memref<64x256xf32, #tpu.memory_space<vmem>>, vector<8x256xf32>
    %585 = arith.select %25, %582, %584 : vector<8x256xi1>, vector<8x256xf32>
    %cst_202 = arith.constant dense<0.000000e+00> : vector<8x256xf32>
    %586 = tpu.matmul %566, %364, %cst_202 {dimension_numbers = #tpu.dot_dimension_numbers<[1], [0], [0], [1], [0, 0, 1, 1], [], []>} : vector<8x64xf32>, vector<64x256xf32>, vector<8x256xf32> -> vector<8x256xf32>
    %587 = arith.addf %585, %586 : vector<8x256xf32>
    %588 = math.tanh %587 : vector<8x256xf32>
    %cst_203 = arith.constant 5.000000e-01 : f32
    %589 = vector.broadcast %cst_203 : f32 to vector<8x256xf32>
    %590 = arith.mulf %589, %588 : vector<8x256xf32>
    %cst_204 = arith.constant 5.000000e-01 : f32
    %591 = vector.broadcast %cst_204 : f32 to vector<8x256xf32>
    %592 = arith.addf %590, %591 : vector<8x256xf32>
    %593 = arith.select %5, %588, %592 : vector<8x256xi1>, vector<8x256xf32>
    %594 = vector.extract_strided_slice %593 {offsets = [0, 0], sizes = [8, 64], strides = [1, 1]} : vector<8x256xf32> to vector<8x64xf32>
    %595 = vector.extract_strided_slice %593 {offsets = [0, 64], sizes = [8, 64], strides = [1, 1]} : vector<8x256xf32> to vector<8x64xf32>
    %596 = vector.extract_strided_slice %593 {offsets = [0, 128], sizes = [8, 64], strides = [1, 1]} : vector<8x256xf32> to vector<8x64xf32>
    %597 = vector.extract_strided_slice %593 {offsets = [0, 192], sizes = [8, 64], strides = [1, 1]} : vector<8x256xf32> to vector<8x64xf32>
    %598 = arith.mulf %595, %567 : vector<8x64xf32>
    %599 = arith.mulf %594, %596 : vector<8x64xf32>
    %600 = arith.addf %598, %599 : vector<8x64xf32>
    %601 = math.tanh %600 : vector<8x64xf32>
    %602 = arith.mulf %597, %601 : vector<8x64xf32>
    %603 = arith.index_cast %577 : i32 to index
    %c0_205 = arith.constant 0 : index
    %604 = vector.load %arg1[%603, %c0_205] : memref<64x64xf32, #tpu.memory_space<vmem>>, vector<8x64xf32>
    %cst_206 = arith.constant 0.000000e+00 : f32
    %605 = vector.broadcast %cst_206 : f32 to vector<8x64xf32>
    %606 = arith.cmpf one, %604, %605 : vector<8x64xf32>
    %607 = arith.select %606, %602, %566 : vector<8x64xi1>, vector<8x64xf32>
    %608 = arith.select %606, %600, %567 : vector<8x64xi1>, vector<8x64xf32>
    %cst_207 = arith.constant 0.000000e+00 : f32
    %609 = vector.broadcast %cst_207 : f32 to vector<8x64xf32>
    %610 = arith.select %606, %602, %609 : vector<8x64xi1>, vector<8x64xf32>
    %611 = vector.extract_strided_slice %610 {offsets = [0, 0], sizes = [8, 32], strides = [1, 1]} : vector<8x64xf32> to vector<8x32xf32>
    %612 = arith.index_cast %577 : i32 to index
    %c0_208 = arith.constant 0 : index
    %613 = vector.load %arg12[%612, %c0_208] : memref<64x64xf32, #tpu.memory_space<vmem>>, vector<8x32xf32>
    tpu.vector_store %arg12[%612, %c0_208], %611 {strides = array<i32>} : memref<64x64xf32, #tpu.memory_space<vmem>>, vector<8x32xf32>,
    %614 = vector.extract_strided_slice %610 {offsets = [0, 32], sizes = [8, 32], strides = [1, 1]} : vector<8x64xf32> to vector<8x32xf32>
    %615 = arith.index_cast %580 : i32 to index
    %c32_209 = arith.constant 32 : index
    %616 = vector.load %arg12[%615, %c32_209] : memref<64x64xf32, #tpu.memory_space<vmem>>, vector<8x32xf32>
    tpu.vector_store %arg12[%615, %c32_209], %614 {strides = array<i32>} : memref<64x64xf32, #tpu.memory_space<vmem>>, vector<8x32xf32>,
    %c6_i32_210 = arith.constant 6 : i32
    %c8_i32_211 = arith.constant 8 : i32
    %617 = arith.muli %c6_i32_210, %c8_i32_211 : i32
    %618 = tpu.assume_multiple %617, 8 : i32
    %c7_i32_212 = arith.constant 7 : i32
    %619 = arith.subi %c7_i32_212, %c6_i32_210 : i32
    %c8_i32_213 = arith.constant 8 : i32
    %620 = arith.muli %619, %c8_i32_213 : i32
    %621 = tpu.assume_multiple %620, 8 : i32
    %622 = arith.index_cast %618 : i32 to index
    %c0_214 = arith.constant 0 : index
    %623 = vector.load %arg15[%622, %c0_214] : memref<64x256xf32, #tpu.memory_space<vmem>>, vector<8x256xf32>
    %624 = arith.index_cast %621 : i32 to index
    %c0_215 = arith.constant 0 : index
    %625 = vector.load %arg15[%624, %c0_215] : memref<64x256xf32, #tpu.memory_space<vmem>>, vector<8x256xf32>
    %626 = arith.select %25, %623, %625 : vector<8x256xi1>, vector<8x256xf32>
    %cst_216 = arith.constant dense<0.000000e+00> : vector<8x256xf32>
    %627 = tpu.matmul %607, %364, %cst_216 {dimension_numbers = #tpu.dot_dimension_numbers<[1], [0], [0], [1], [0, 0, 1, 1], [], []>} : vector<8x64xf32>, vector<64x256xf32>, vector<8x256xf32> -> vector<8x256xf32>
    %628 = arith.addf %626, %627 : vector<8x256xf32>
    %629 = math.tanh %628 : vector<8x256xf32>
    %cst_217 = arith.constant 5.000000e-01 : f32
    %630 = vector.broadcast %cst_217 : f32 to vector<8x256xf32>
    %631 = arith.mulf %630, %629 : vector<8x256xf32>
    %cst_218 = arith.constant 5.000000e-01 : f32
    %632 = vector.broadcast %cst_218 : f32 to vector<8x256xf32>
    %633 = arith.addf %631, %632 : vector<8x256xf32>
    %634 = arith.select %5, %629, %633 : vector<8x256xi1>, vector<8x256xf32>
    %635 = vector.extract_strided_slice %634 {offsets = [0, 0], sizes = [8, 64], strides = [1, 1]} : vector<8x256xf32> to vector<8x64xf32>
    %636 = vector.extract_strided_slice %634 {offsets = [0, 64], sizes = [8, 64], strides = [1, 1]} : vector<8x256xf32> to vector<8x64xf32>
    %637 = vector.extract_strided_slice %634 {offsets = [0, 128], sizes = [8, 64], strides = [1, 1]} : vector<8x256xf32> to vector<8x64xf32>
    %638 = vector.extract_strided_slice %634 {offsets = [0, 192], sizes = [8, 64], strides = [1, 1]} : vector<8x256xf32> to vector<8x64xf32>
    %639 = arith.mulf %636, %608 : vector<8x64xf32>
    %640 = arith.mulf %635, %637 : vector<8x64xf32>
    %641 = arith.addf %639, %640 : vector<8x64xf32>
    %642 = math.tanh %641 : vector<8x64xf32>
    %643 = arith.mulf %638, %642 : vector<8x64xf32>
    %644 = arith.index_cast %618 : i32 to index
    %c0_219 = arith.constant 0 : index
    %645 = vector.load %arg1[%644, %c0_219] : memref<64x64xf32, #tpu.memory_space<vmem>>, vector<8x64xf32>
    %cst_220 = arith.constant 0.000000e+00 : f32
    %646 = vector.broadcast %cst_220 : f32 to vector<8x64xf32>
    %647 = arith.cmpf one, %645, %646 : vector<8x64xf32>
    %648 = arith.select %647, %643, %607 : vector<8x64xi1>, vector<8x64xf32>
    %649 = arith.select %647, %641, %608 : vector<8x64xi1>, vector<8x64xf32>
    %cst_221 = arith.constant 0.000000e+00 : f32
    %650 = vector.broadcast %cst_221 : f32 to vector<8x64xf32>
    %651 = arith.select %647, %643, %650 : vector<8x64xi1>, vector<8x64xf32>
    %652 = vector.extract_strided_slice %651 {offsets = [0, 0], sizes = [8, 32], strides = [1, 1]} : vector<8x64xf32> to vector<8x32xf32>
    %653 = arith.index_cast %618 : i32 to index
    %c0_222 = arith.constant 0 : index
    %654 = vector.load %arg12[%653, %c0_222] : memref<64x64xf32, #tpu.memory_space<vmem>>, vector<8x32xf32>
    tpu.vector_store %arg12[%653, %c0_222], %652 {strides = array<i32>} : memref<64x64xf32, #tpu.memory_space<vmem>>, vector<8x32xf32>,
    %655 = vector.extract_strided_slice %651 {offsets = [0, 32], sizes = [8, 32], strides = [1, 1]} : vector<8x64xf32> to vector<8x32xf32>
    %656 = arith.index_cast %621 : i32 to index
    %c32_223 = arith.constant 32 : index
    %657 = vector.load %arg12[%656, %c32_223] : memref<64x64xf32, #tpu.memory_space<vmem>>, vector<8x32xf32>
    tpu.vector_store %arg12[%656, %c32_223], %655 {strides = array<i32>} : memref<64x64xf32, #tpu.memory_space<vmem>>, vector<8x32xf32>,
    %c7_i32_224 = arith.constant 7 : i32
    %c8_i32_225 = arith.constant 8 : i32
    %658 = arith.muli %c7_i32_224, %c8_i32_225 : i32
    %659 = tpu.assume_multiple %658, 8 : i32
    %c7_i32_226 = arith.constant 7 : i32
    %660 = arith.subi %c7_i32_226, %c7_i32_224 : i32
    %c8_i32_227 = arith.constant 8 : i32
    %661 = arith.muli %660, %c8_i32_227 : i32
    %662 = tpu.assume_multiple %661, 8 : i32
    %663 = arith.index_cast %659 : i32 to index
    %c0_228 = arith.constant 0 : index
    %664 = vector.load %arg15[%663, %c0_228] : memref<64x256xf32, #tpu.memory_space<vmem>>, vector<8x256xf32>
    %665 = arith.index_cast %662 : i32 to index
    %c0_229 = arith.constant 0 : index
    %666 = vector.load %arg15[%665, %c0_229] : memref<64x256xf32, #tpu.memory_space<vmem>>, vector<8x256xf32>
    %667 = arith.select %25, %664, %666 : vector<8x256xi1>, vector<8x256xf32>
    %cst_230 = arith.constant dense<0.000000e+00> : vector<8x256xf32>
    %668 = tpu.matmul %648, %364, %cst_230 {dimension_numbers = #tpu.dot_dimension_numbers<[1], [0], [0], [1], [0, 0, 1, 1], [], []>} : vector<8x64xf32>, vector<64x256xf32>, vector<8x256xf32> -> vector<8x256xf32>
    %669 = arith.addf %667, %668 : vector<8x256xf32>
    %670 = math.tanh %669 : vector<8x256xf32>
    %cst_231 = arith.constant 5.000000e-01 : f32
    %671 = vector.broadcast %cst_231 : f32 to vector<8x256xf32>
    %672 = arith.mulf %671, %670 : vector<8x256xf32>
    %cst_232 = arith.constant 5.000000e-01 : f32
    %673 = vector.broadcast %cst_232 : f32 to vector<8x256xf32>
    %674 = arith.addf %672, %673 : vector<8x256xf32>
    %675 = arith.select %5, %670, %674 : vector<8x256xi1>, vector<8x256xf32>
    %676 = vector.extract_strided_slice %675 {offsets = [0, 0], sizes = [8, 64], strides = [1, 1]} : vector<8x256xf32> to vector<8x64xf32>
    %677 = vector.extract_strided_slice %675 {offsets = [0, 64], sizes = [8, 64], strides = [1, 1]} : vector<8x256xf32> to vector<8x64xf32>
    %678 = vector.extract_strided_slice %675 {offsets = [0, 128], sizes = [8, 64], strides = [1, 1]} : vector<8x256xf32> to vector<8x64xf32>
    %679 = vector.extract_strided_slice %675 {offsets = [0, 192], sizes = [8, 64], strides = [1, 1]} : vector<8x256xf32> to vector<8x64xf32>
    %680 = arith.mulf %677, %649 : vector<8x64xf32>
    %681 = arith.mulf %676, %678 : vector<8x64xf32>
    %682 = arith.addf %680, %681 : vector<8x64xf32>
    %683 = math.tanh %682 : vector<8x64xf32>
    %684 = arith.mulf %679, %683 : vector<8x64xf32>
    %685 = arith.index_cast %659 : i32 to index
    %c0_233 = arith.constant 0 : index
    %686 = vector.load %arg1[%685, %c0_233] : memref<64x64xf32, #tpu.memory_space<vmem>>, vector<8x64xf32>
    %cst_234 = arith.constant 0.000000e+00 : f32
    %687 = vector.broadcast %cst_234 : f32 to vector<8x64xf32>
    %688 = arith.cmpf one, %686, %687 : vector<8x64xf32>
    %689 = arith.select %688, %684, %648 : vector<8x64xi1>, vector<8x64xf32>
    %690 = arith.select %688, %682, %649 : vector<8x64xi1>, vector<8x64xf32>
    %cst_235 = arith.constant 0.000000e+00 : f32
    %691 = vector.broadcast %cst_235 : f32 to vector<8x64xf32>
    %692 = arith.select %688, %684, %691 : vector<8x64xi1>, vector<8x64xf32>
    %693 = vector.extract_strided_slice %692 {offsets = [0, 0], sizes = [8, 32], strides = [1, 1]} : vector<8x64xf32> to vector<8x32xf32>
    %694 = arith.index_cast %659 : i32 to index
    %c0_236 = arith.constant 0 : index
    %695 = vector.load %arg12[%694, %c0_236] : memref<64x64xf32, #tpu.memory_space<vmem>>, vector<8x32xf32>
    tpu.vector_store %arg12[%694, %c0_236], %693 {strides = array<i32>} : memref<64x64xf32, #tpu.memory_space<vmem>>, vector<8x32xf32>,
    %696 = vector.extract_strided_slice %692 {offsets = [0, 32], sizes = [8, 32], strides = [1, 1]} : vector<8x64xf32> to vector<8x32xf32>
    %697 = arith.index_cast %662 : i32 to index
    %c32_237 = arith.constant 32 : index
    %698 = vector.load %arg12[%697, %c32_237] : memref<64x64xf32, #tpu.memory_space<vmem>>, vector<8x32xf32>
    tpu.vector_store %arg12[%697, %c32_237], %696 {strides = array<i32>} : memref<64x64xf32, #tpu.memory_space<vmem>>, vector<8x32xf32>,
    %c8_i32_238 = arith.constant 8 : i32
    %699 = tpu.concatenate %353, %689 in 1 : vector<8x64xf32>, vector<8x64xf32> -> vector<8x128xf32>
    %700 = tpu.concatenate %354, %690 in 1 : vector<8x64xf32>, vector<8x64xf32> -> vector<8x128xf32>
    %c0_239 = arith.constant 0 : index
    %c0_240 = arith.constant 0 : index
    %701 = vector.load %arg8[%c0_239, %c0_240] : memref<128x32xf32, #tpu.memory_space<vmem>>, vector<128x32xf32>
    %cst_241 = arith.constant dense<0.000000e+00> : vector<8x32xf32>
    %702 = tpu.matmul %699, %701, %cst_241 {dimension_numbers = #tpu.dot_dimension_numbers<[1], [0], [0], [1], [0, 0, 1, 1], [], []>} : vector<8x128xf32>, vector<128x32xf32>, vector<8x32xf32> -> vector<8x32xf32>
    %c0_242 = arith.constant 0 : index
    %c0_243 = arith.constant 0 : index
    %703 = vector.load %arg9[%c0_242, %c0_243] : memref<1x32xf32, #tpu.memory_space<vmem>>, vector<1x32xf32>
    %704 = vector.broadcast %703 : vector<1x32xf32> to vector<8x32xf32>
    %705 = arith.addf %702, %704 : vector<8x32xf32>
    %c0_244 = arith.constant 0 : index
    %c0_245 = arith.constant 0 : index
    %706 = vector.load %arg13[%c0_244, %c0_245] : memref<8x32xf32, #tpu.memory_space<vmem>>, vector<8x32xf32>
    tpu.vector_store %arg13[%c0_244, %c0_245], %705 {strides = array<i32>} : memref<8x32xf32, #tpu.memory_space<vmem>>, vector<8x32xf32>,
    %c0_246 = arith.constant 0 : index
    %c0_247 = arith.constant 0 : index
    %707 = vector.load %arg10[%c0_246, %c0_247] : memref<128x32xf32, #tpu.memory_space<vmem>>, vector<128x32xf32>
    %cst_248 = arith.constant dense<0.000000e+00> : vector<8x32xf32>
    %708 = tpu.matmul %700, %707, %cst_248 {dimension_numbers = #tpu.dot_dimension_numbers<[1], [0], [0], [1], [0, 0, 1, 1], [], []>} : vector<8x128xf32>, vector<128x32xf32>, vector<8x32xf32> -> vector<8x32xf32>
    %c0_249 = arith.constant 0 : index
    %c0_250 = arith.constant 0 : index
    %709 = vector.load %arg11[%c0_249, %c0_250] : memref<1x32xf32, #tpu.memory_space<vmem>>, vector<1x32xf32>
    %710 = vector.broadcast %709 : vector<1x32xf32> to vector<8x32xf32>
    %711 = arith.addf %708, %710 : vector<8x32xf32>
    %c0_251 = arith.constant 0 : index
    %c0_252 = arith.constant 0 : index
    %712 = vector.load %arg14[%c0_251, %c0_252] : memref<8x32xf32, #tpu.memory_space<vmem>>, vector<8x32xf32>
    tpu.vector_store %arg14[%c0_251, %c0_252], %711 {strides = array<i32>} : memref<8x32xf32, #tpu.memory_space<vmem>>, vector<8x32xf32>,
    return
  }
}

</mosaic_0001>

<bundles_post_ra>
// kernel: tpu_custom_call.1
= control target key start
LH: loop header
LB: loop body
LE: loop exit
PB: predicated region body
PF: predicated region fallthrough
CT: control target
= control target key end

     0   :  { %20 = vsyncpa [#allocation5], 0  ;;  %s4652_s0 = inlined_call_operand.vmem [shape: f32[64,16], index: 0, kind: input, shape index: {}]   ;;  %s4653_s1 = inlined_call_operand.hbm [shape: f32[64,64], index: 1, kind: input, shape index: {}]   ;;  %s4654_s2 = inlined_call_operand.hbm [shape: f32[16,256], index: 2, kind: input, shape index: {}]   ;;  %s4655_s3 = inlined_call_operand.vmem [shape: f32[64,256], index: 3, kind: input, shape index: {}]   ;;  %s4656_s4 = inlined_call_operand.vmem [shape: f32[1,256], index: 4, kind: input, shape index: {}]   ;;  %s4657_s5 = inlined_call_operand.vmem [shape: f32[64,256], index: 5, kind: input, shape index: {}]   ;;  %s4658_s6 = inlined_call_operand.vmem [shape: f32[64,256], index: 6, kind: input, shape index: {}]   ;;  %s4659_s7 = inlined_call_operand.vmem [shape: f32[1,256], index: 7, kind: input, shape index: {}]   ;;  %s4660_s8 = inlined_call_operand.vmem [shape: f32[128,32], index: 8, kind: input, shape index: {}]   ;;  %s4661_s9 = inlined_call_operand.vmem [shape: f32[1,32], index: 9, kind: input, shape index: {}]   ;;  %s4662_s10 = inlined_call_operand.vmem [shape: f32[128,32], index: 10, kind: input, shape index: {}]   ;;  %s4663_s11 = inlined_call_operand.vmem [shape: f32[1,32], index: 11, kind: input, shape index: {}]   ;;  %s4664_s12 = inlined_call_operand.hbm [shape: f32[64,64], index: 12, kind: output, shape index: {0}]   ;;  %s4665_s13 = inlined_call_operand.hbm [shape: f32[8,32], index: 13, kind: output, shape index: {1}]   ;;  %s4666_s14 = inlined_call_operand.hbm [shape: f32[8,32], index: 14, kind: output, shape index: {2}]  }
   0x1   :  { %21 = vsyncpa [#allocation8], 0 }
   0x2   :  { %22 = vsyncpa [#allocation6], 0 }
   0x3   :  { %23 = vsyncpa [#allocation11], 0  ;;  %s3371_s29 = smov [#allocation4]   ;;  %s3253_s17 = scalar_lea.hbm %s4653_s1, 1024 }
   0x4   :  { %s31_s30 = sshll.u32 %s3371_s29, 4  ;;  %p3254_p0 = scmp.ne.s32.totalorder %s4653_s1, %s3253_s17  ;;  %s32_s30 = int_to_ptr.vmem [resolvable:$true] %s31_s30 }
   0x5   :  { %p3257_p1 = scmp.lt.u32.totalorder %s3253_s17, %s4653_s1 }
   0x7   :  { %p3259_p2 = pnand %p3257_p1, %p3254_p0 }
   0x9   :  { %3262 = shalt.err (!%p3259_p2)
}
   0xa   :  { %s3263_s22 = scalar_lea.vmem %s32_s30, 1024  ;;  %p3268_p4 = scmp.lt.s32.totalorder %s32_s30, %s32_s30 }
   0xb   :  { %p3264_p3 = scmp.ne.s32.totalorder %s32_s30, %s3263_s22  ;;  %p3269_p5 = scmp.lt.s32.totalorder %s3263_s22, %s3263_s22 }
   0xd   :  { %p3270_p6 = por %p3269_p5, %p3268_p4 }
   0xf   :  { %p3271_p7 = pnand %p3270_p6, %p3264_p3 }
  0x11   :  { %3274 = shalt.err (!%p3271_p7)
}
  0x12   :  { %s3372_s23 = smov 128   ;;  %s3373_s24 = smov 8  }
  0x13   :  { %37 = dma.hbm_to_vmem [thread:$0]  %s4653_s1, 1024, %s32_s30, [#allocation5], %s3372_s23, %s3372_s23, %s3373_s24  }
  0x14   :  { %s3374_s27 = smov [#allocation7]   ;;  %s3275_s16 = scalar_lea.hbm %s4654_s2, 512 }
  0x15   :  { %s43_s28 = sshll.u32 %s3374_s27, 4  ;;  %p3276_p8 = scmp.ne.s32.totalorder %s4654_s2, %s3275_s16  ;;  %s44_s28 = int_to_ptr.vmem [resolvable:$true] %s43_s28 }
  0x16   :  { %p3279_p9 = scmp.lt.u32.totalorder %s3275_s16, %s4654_s2 }
  0x18   :  { %p3281_p10 = pnand %p3279_p9, %p3276_p8 }
  0x1a   :  { %3284 = shalt.err (!%p3281_p10)
}
  0x1b   :  { %s3285_s21 = scalar_lea.vmem %s44_s28, 512  ;;  %p3290_p12 = scmp.lt.s32.totalorder %s44_s28, %s44_s28 }
  0x1c   :  { %p3286_p11 = scmp.ne.s32.totalorder %s44_s28, %s3285_s21  ;;  %p3291_p13 = scmp.lt.s32.totalorder %s3285_s21, %s3285_s21 }
  0x1e   :  { %p3292_p0 = por %p3291_p13, %p3290_p12 }
  0x20   :  { %p3293_p1 = pnand %p3292_p0, %p3286_p11 }
  0x22   :  { %3296 = shalt.err (!%p3293_p1)
}
  0x23   :  { %s3375_s1 = smov 256   ;;  %s3376_s30 = smov 16  }
  0x24   :  { %49 = dma.hbm_to_vmem [thread:$0]  %s4654_s2, 512, %s44_s28, [#allocation8], %s3375_s1, %s3375_s1, %s3376_s30  }
  0x25   :  { %3363 = dma.done.wait [#allocation5], 1024  }
  0x26   :  { %3364 = vsyncadd [#allocation5], 4294966272 }
  0x27   :  { %3365 = dma.done.wait [#allocation8], 512  }
  0x28   :  { %3366 = vsyncadd [#allocation8], 4294966784  ;;  %v3377_v0 = vmov 0.0   ;;  %v108_v1 = vld [vmem:[#allocation7 + $0x8] sm:$0xff]  ;;  %v110_v2 = vld [vmem:[#allocation7 + $0x18] sm:$0xff]  ;;  %vm147_vm0 = vcmask 130048   ;;  %v74_v39 = vlaneseq }
  0x29   :  { %236 = vmatprep.mubr.f32.mxu0 %v3377_v0  ;;  %381 = vmatprep.mubr.f32.mxu1 %v3377_v0  ;;  %v107_v3 = vld [vmem:[#allocation7] sm:$0xff]  ;;  %v2815_v4 = vpack.c.bf16 %v110_v2, %v108_v1  ;;  %v109_v5 = vld [vmem:[#allocation7 + $0x10] sm:$0xff]  ;;  %v112_v7 = vld [vmem:[%s4655_s3 + $0x8] sm:$0xff]  ;;  %vm419_vm13 = vcmask 261120   ;;  %vm422_vm14 = vcmask 523520   ;;  %vm313_vm15 = vcmask 523264  }
  0x2a   :  { %v2817_v6 = vpack.c.bf16 %v109_v5, %v107_v3  ;;  %v114_v8 = vld [vmem:[%s4655_s3 + $0x18] sm:$0xff]  ;;  %v111_v9 = vld [vmem:[%s4655_s3] sm:$0xff]  ;;  %v113_v10 = vld [vmem:[%s4655_s3 + $0x10] sm:$0xff]  ;;  %v3620_v40 = vshrl.u32 %v74_v39, 7  ;;  %v75_v46 = vand.u32 127, %v74_v39 }
  0x2b   :  { %2816 = vmatprep.subr.bf16.mxu0 %v2815_v4  ;;  %v128_v11 = vld [vmem:[%s4652_s0] sm:$0xff]  ;;  %v3503_v12 = vpack.c.bf16 %v114_v8, %v112_v7  ;;  %v3505_v13 = vpack.c.bf16 %v113_v10, %v111_v9  ;;  %v116_v14 = vld [vmem:[%s4655_s3 + $0x28] sm:$0xff]  ;;  %v118_v15 = vld [vmem:[%s4655_s3 + $0x38] sm:$0xff] }
  0x2c   :  { %2818 = vmatpush1.bf16.msra.mxu0 %v2817_v6  ;;  %v3513_v16 = vpack.c.bf16 %v118_v15, %v116_v14  ;;  %v115_v17 = vld [vmem:[%s4655_s3 + $0x20] sm:$0xff]  ;;  %v117_v18 = vld [vmem:[%s4655_s3 + $0x30] sm:$0xff]  ;;  %v120_v19 = vld [vmem:[%s4655_s3 + $0x48] sm:$0xff]  ;;  %v139_v41 = vsub.s32 0, %v3620_v40  ;;  %v143_v44 = vsub.s32 1, %v3620_v40  ;;  %v3635_v53 = vadd.s32 128, %v75_v46 }
  0x2d   :  { %2820 = vmatprep.subr.bf16.mxu1 %v3503_v12  ;;  %v122_v20 = vld [vmem:[%s4655_s3 + $0x58] sm:$0xff]  ;;  %2852 = vmatprep.subr.bf16.mxu0 %v3503_v12  ;;  %v3531_v21 = vpack.c.bf16 %v117_v18, %v115_v17  ;;  %v129_v22 = vld [vmem:[%s4652_s0 + $0x8] sm:$0xff]  ;;  %v119_v24 = vld [vmem:[%s4655_s3 + $0x40] sm:$0xff]  ;;  %vm85_vm1 = vcmp.ge.s32.totalorder %v75_v46, 64  ;;  %vm87_vm2 = vcmp.lt.s32.totalorder %v75_v46, 96  ;;  %vm83_vm5 = vcmp.lt.s32.totalorder %v75_v46, 32 }
  0x2e   :  { %2822 = vmatpush1.bf16.msra.mxu1 %v3505_v13  ;;  %v3538_v23 = vpack.c.bf16 %v122_v20, %v120_v19  ;;  %v121_v25 = vld [vmem:[%s4655_s3 + $0x50] sm:$0xff]  ;;  %v124_v26 = vld [vmem:[%s4655_s3 + $0x68] sm:$0xff]  ;;  %v126_v27 = vld [vmem:[%s4655_s3 + $0x78] sm:$0xff]  ;;  %vm100_vm3 = vcmp.ge.s32.totalorder %v3635_v53, 192  ;;  %vm102_vm4 = vcmp.lt.s32.totalorder %v3635_v53, 224  ;;  %vm94_vm7 = vcmp.lt.s32.totalorder %v3635_v53, 160 }
  0x2f   :  { %2679 = vmatmul.mubr.msk.f32.vlgmr.msra.gmra.mrb[0].mxu0 %vm147_vm0, %v128_v11  ;;  %2824 = vmatprep.subr.bf16.mxu1 %v3513_v16  ;;  %v3556_v28 = vpack.c.bf16 %v121_v25, %v119_v24  ;;  %v130_v29 = vld [vmem:[%s4652_s0 + $0x10] sm:$0xff]  ;;  %v3563_v30 = vpack.c.bf16 %v126_v27, %v124_v26  ;;  %v123_v31 = vld [vmem:[%s4655_s3 + $0x60] sm:$0xff]  ;;  %v131_v34 = vld [vmem:[%s4652_s0 + $0x18] sm:$0xff]  ;;  %vm80_vm11 = vcmp.lt.s32.totalorder %v3635_v53, 192 }
  0x30   :  { %242 = vmatprep.mubr.f32.mxu0 %v3377_v0  ;;  %2854 = vmatpush1.bf16.msra.mxu0 %v3505_v13  ;;  %v125_v32 = vld [vmem:[%s4655_s3 + $0x70] sm:$0xff]  ;;  %v132_v35 = vld [vmem:[%s4652_s0 + $0x20] sm:$0xff]  ;;  %v133_v36 = vld [vmem:[%s4652_s0 + $0x28] sm:$0xff] }
  0x31   :  { %2856 = vmatprep.subr.bf16.mxu0 %v3513_v16  ;;  %v3575_v33 = vpack.c.bf16 %v125_v32, %v123_v31  ;;  %v134_v37 = vld [vmem:[%s4652_s0 + $0x30] sm:$0xff]  ;;  %v135_v38 = vld [vmem:[%s4652_s0 + $0x38] sm:$0xff]  ;;  %v127_v42 = vld [vmem:[%s4656_s4] sm:$0x3]  ;;  %s3378_s0 = smov 64  }
  0x32   :  { %2826 = vmatpush1.bf16.msra.mxu1 %v3531_v21  ;;  %v140_v47 = vrot.slane %v127_v42, %v139_v41  ;;  %v144_v48 = vrot.slane %v127_v42, %v143_v44  ;;  %vm89_vm6 = vmand %vm85_vm1, %vm87_vm2  ;;  %v2533_v53 = vld [vmem:[%s4662_s10] sm:$0xff] }
  0x33   :  { %2680 = vmatmul.mubr.msk.f32.gmra.mrb[2].mxu0 %vm147_vm0, %v129_v22  ;;  %2828 = vmatprep.subr.bf16.mxu1 %v3538_v23  ;;  %vm104_vm8 = vmand %vm100_vm3, %vm102_vm4 }
  0x34   :  { %248 = vmatprep.mubr.f32.mxu0 %v3377_v0  ;;  %2858 = vmatpush1.bf16.msra.mxu0 %v3531_v21  ;;  %vm3648_vm9 = vmor %vm83_vm5, %vm89_vm6 }
  0x35   :  { %2860 = vmatprep.subr.bf16.mxu0 %v3538_v23  ;;  %vm3652_vm10 = vmor %vm94_vm7, %vm104_vm8  ;;  %vm3380_vm7 = vmmov 0  }
  0x36   :  { %2830 = vmatpush1.bf16.msra.mxu1 %v3556_v28 }
  0x37   :  { %2681 = vmatmul.mubr.msk.f32.gmra.mrb[4].mxu0 %vm147_vm0, %v130_v29  ;;  %2832 = vmatprep.subr.bf16.mxu1 %v3563_v30 }
  0x38   :  { %254 = vmatprep.mubr.f32.mxu0 %v3377_v0  ;;  %2862 = vmatpush1.bf16.msra.mxu0 %v3556_v28 }
  0x39   :  { %2864 = vmatprep.subr.bf16.mxu0 %v3563_v30 }
  0x3a   :  { %2834 = vmatpush1.bf16.msra.mxu1 %v3575_v33 }
  0x3b   :  { %2682 = vmatmul.mubr.msk.f32.gmra.mrb[6].mxu0 %vm147_vm0, %v131_v34  ;;  %2836 = vmatprep.subr.bf16.mxu1 %v3503_v12 }
  0x3c   :  { %260 = vmatprep.mubr.f32.mxu0 %v3377_v0  ;;  %2866 = vmatpush1.bf16.msra.mxu0 %v3575_v33 }
  0x3d   :  { %382 = vmatmul.mubr.f32.vlgmr.msra.gmra.mrb[0].mxu1 %v3377_v0  ;;  %2884 = vmatprep.subr.bf16.mxu0 %v3503_v12 }
  0x3e   :  { %2838 = vmatpush1.bf16.msra.mxu1 %v3505_v13  ;;  %503 = vmatprep.mubr.f32.mxu1 %v3377_v0 }
  0x3f   :  { %2683 = vmatmul.mubr.msk.f32.gmra.mrb[8].mxu0 %vm147_vm0, %v132_v35  ;;  %2840 = vmatprep.subr.bf16.mxu1 %v3513_v16 }
  0x40   :  { %266 = vmatprep.mubr.f32.mxu0 %v3377_v0 }
  0x42   :  { %2842 = vmatpush1.bf16.msra.mxu1 %v3531_v21 }
  0x43   :  { %2684 = vmatmul.mubr.msk.f32.gmra.mrb[10].mxu0 %vm147_vm0, %v133_v36  ;;  %2844 = vmatprep.subr.bf16.mxu1 %v3538_v23 }
  0x44   :  { %272 = vmatprep.mubr.f32.mxu0 %v3377_v0 }
  0x46   :  { %2846 = vmatpush1.bf16.msra.mxu1 %v3556_v28 }
  0x47   :  { %2685 = vmatmul.mubr.msk.f32.gmra.mrb[12].mxu0 %vm147_vm0, %v134_v37  ;;  %2848 = vmatprep.subr.bf16.mxu1 %v3563_v30 }
  0x48   :  { %278 = vmatprep.mubr.f32.mxu0 %v3377_v0 }
  0x4a   :  { %2850 = vmatpush1.bf16.msra.mxu1 %v3575_v33 }
  0x4b   :  { %2686 = vmatmul.mubr.msk.f32.gmra.mrb[14].mxu0 %vm147_vm0, %v135_v38  ;;  %2868 = vmatprep.subr.bf16.mxu1 %v3503_v12 }
  0x4c   :  { %630 = vmatprep.mubr.f32.mxu0 %v3377_v0 }
 0x102   :  { %v238_v43 = vpop.f32.mrb[0].mxu0 }
 0x103   :  { %v240_v45 = vpop.f32.mrb[1].mxu0  ;;  %v3716_v36 = vadd.f32 %v238_v43, %v140_v47 }
 0x104   :  { %v3720_v39 = vadd.f32 %v240_v45, %v144_v48 }
 0x106   :  { %v244_v49 = vpop.f32.mrb[2].mxu0 }
 0x107   :  { %v3631_v50 = vadd.f32 %v244_v49, %v140_v47  ;;  %v246_v51 = vpop.f32.mrb[3].mxu0 }
 0x108   :  { %v3633_v52 = vadd.f32 %v246_v51, %v144_v48 }
 0x10a   :  { %v250_v54 = vpop.f32.mrb[4].mxu0 }
 0x10b   :  { %v3637_v55 = vadd.f32 %v250_v54, %v140_v47  ;;  %v252_v56 = vpop.f32.mrb[5].mxu0 }
 0x10c   :  { %v3639_v57 = vadd.f32 %v252_v56, %v144_v48 }
 0x10e   :  { %v256_v58 = vpop.f32.mrb[6].mxu0 }
 0x10f   :  { %v3643_v59 = vadd.f32 %v256_v58, %v140_v47  ;;  %v258_v60 = vpop.f32.mrb[7].mxu0 }
 0x110   :  { %v3646_v61 = vadd.f32 %v258_v60, %v144_v48  ;;  %v383_v62 = vpop.f32.mrb[0].mxu1 }
 0x111   :  { %v385_v2 = vpop.f32.mrb[1].mxu1 }
 0x112   :  { %v262_v1 = vpop.f32.mrb[8].mxu0 }
 0x113   :  { %v3656_v4 = vadd.f32 %v262_v1, %v140_v47  ;;  %v264_v5 = vpop.f32.mrb[9].mxu0 }
 0x114   :  { %v3658_v6 = vadd.f32 %v264_v5, %v144_v48 }
 0x115   :  { %v688_v7 = vsel %vm3648_vm9, %v3643_v59, %v3656_v4  ;;  %v809_v8 = vsel %vm3648_vm9, %v3656_v4, %v3643_v59 }
 0x116   :  { %v268_v9 = vpop.f32.mrb[10].mxu0  ;;  %v689_v10 = vsel %vm3652_vm10, %v3646_v61, %v3658_v6  ;;  %v810_v11 = vsel %vm3652_vm10, %v3658_v6, %v3646_v61 }
 0x117   :  { %v3676_v14 = vadd.f32 %v268_v9, %v140_v47  ;;  %v270_v15 = vpop.f32.mrb[11].mxu0 }
 0x118   :  { %v3678_v17 = vadd.f32 %v270_v15, %v144_v48 }
 0x119   :  { %v561_v18 = vsel %vm3648_vm9, %v3637_v55, %v3676_v14  ;;  %v928_v19 = vsel %vm3648_vm9, %v3676_v14, %v3637_v55 }
 0x11a   :  { %v274_v20 = vpop.f32.mrb[12].mxu0  ;;  %v562_v22 = vsel %vm3652_vm10, %v3639_v57, %v3678_v17  ;;  %v929_v24 = vsel %vm3652_vm10, %v3678_v17, %v3639_v57 }
 0x11b   :  { %v3696_v25 = vadd.f32 %v274_v20, %v140_v47  ;;  %v276_v26 = vpop.f32.mrb[13].mxu0 }
 0x11c   :  { %v3698_v27 = vadd.f32 %v276_v26, %v144_v48 }
 0x11d   :  { %v434_v29 = vsel %vm3648_vm9, %v3631_v50, %v3696_v25  ;;  %v1047_v31 = vsel %vm3648_vm9, %v3696_v25, %v3631_v50 }
 0x11e   :  { %v280_v32 = vpop.f32.mrb[14].mxu0  ;;  %v435_v34 = vsel %vm3652_vm10, %v3633_v52, %v3698_v27  ;;  %v1048_v35 = vsel %vm3652_vm10, %v3698_v27, %v3633_v52 }
 0x11f   :  { %v3718_v37 = vadd.f32 %v280_v32, %v140_v47  ;;  %v282_v38 = vpop.f32.mrb[15].mxu0  ;;  %v3746_v32 = vld [vmem:[#allocation4] sm:$0xff] }
 0x120   :  { %v3722_v42 = vadd.f32 %v282_v38, %v144_v48  ;;  %vm408_vm12 = vcmp.ne.f32.partialorder %v3746_v32, 0.0 }
 0x121   :  { %v311_v46 = vsel %vm3648_vm9, %v3716_v36, %v3718_v37  ;;  %v1166_v49 = vsel %vm3648_vm9, %v3718_v37, %v3716_v36  ;;  %v1282_v37 = vld [vmem:[%s4657_s5 + $0x8] sm:$0xff] }
 0x122   :  { %v388_v51 = vadd.f32 %v383_v62, %v311_v46  ;;  %v312_v43 = vsel %vm3652_vm10, %v3720_v39, %v3722_v42  ;;  %v1167_v45 = vsel %vm3652_vm10, %v3722_v42, %v3720_v39  ;;  %v1284_v39 = vld [vmem:[%s4657_s5 + $0x18] sm:$0xff]  ;;  %v1281_v42 = vld [vmem:[%s4657_s5] sm:$0xff] }
 0x123   :  { %v389_v47 = vadd.f32 %v385_v2, %v312_v43 }
 0x124   :  { %3157 = vtanh.f32 %v388_v51 }
 0x125   :  { %3159 = vtanh.f32 %v389_v47 }
 0x12e   :  { %v3158_v48 = vpop.eup %3157 }
 0x12f   :  { %v3160_v54 = vpop.eup %3159  ;;  %v392_v56 = vmul.f32 0.5, %v3158_v48 }
 0x130   :  { %v393_v58 = vmul.f32 0.5, %v3160_v54 }
 0x131   :  { %v394_v62 = vadd.f32 0.5, %v392_v56 }
 0x132   :  { %v395_v60 = vadd.f32 0.5, %v393_v58 }
 0x133   :  { %v398_v9 = vmul.f32 0.0, %v394_v62 }
 0x134   :  { %v397_v1 = vsel %vm80_vm11, %v3160_v54, %v395_v60 }
 0x135   :  { %v399_v5 = vmul.f32 %v397_v1, %v394_v62 }
 0x137   :  { %401 = vrot.lane.b32.xlu0 %v399_v5, %s3378_s0 }
 0x1a9   :  { %v402_v15 = vpop.permute.xlu0 %401 }
 0x1aa   :  { %v404_v2 = vadd.f32 %v402_v15, %v398_v9 }
 0x1ac   :  { %3161 = vtanh.f32 %v404_v2  ;;  %415 = vrot.lane.b32.xlu1 %v404_v2, %s3378_s0 }
 0x1b6   :  { %v3162_v20 = vpop.eup %3161 }
 0x1b7   :  { %v406_v26 = vmul.f32 %v3162_v20, %v397_v1 }
 0x1b9   :  { %410 = vrot.lane.b32.xlu0 %v406_v26, %s3378_s0 }
 0x21e   :  { %v416_v38 = vpop.permute.xlu1 %415 }
 0x21f   :  { %v418_v46 = vsel %vm408_vm12, %v416_v38, 0.0 }
 0x220   :  { %521 = vrot.lane.b32.xlu1 %v418_v46, %s3378_s0 }
 0x22b   :  { %v411_v51 = vpop.permute.xlu0 %410 }
 0x22c   :  { %v413_v43 = vsel %vm408_vm12, %v411_v51, 0.0 }
 0x22d   :  { %420 = vst.msk [vmem:[#allocation3] sm:$0xff] %vm419_vm13, %v413_v43  ;;  %2687 = vmatmul.mubr.msk.f32.vlgmr.msra.gmra.mrb[2].mxu1 %vm313_vm15, %v413_v43 }
 0x22e   :  { %423 = vst.msk [vmem:[#allocation3 + $0x38] sm:$0xff] %vm422_vm14, %v413_v43  ;;  %2870 = vmatpush1.bf16.msra.mxu1 %v3505_v13  ;;  %757 = vmatprep.mubr.f32.mxu1 %v3377_v0 }
 0x22f   :  { %2872 = vmatprep.subr.bf16.mxu1 %v3513_v16 }
 0x232   :  { %2874 = vmatpush1.bf16.msra.mxu1 %v3531_v21 }
 0x233   :  { %2876 = vmatprep.subr.bf16.mxu1 %v3538_v23 }
 0x236   :  { %2878 = vmatpush1.bf16.msra.mxu1 %v3556_v28 }
 0x237   :  { %2880 = vmatprep.subr.bf16.mxu1 %v3563_v30 }
 0x23a   :  { %2882 = vmatpush1.bf16.msra.mxu1 %v3575_v33 }
 0x23b   :  { %2900 = vmatprep.subr.bf16.mxu1 %v3503_v12 }
 0x292   :  { %v522_v20 = vpop.permute.xlu1 %521 }
 0x300   :  { %v505_v47 = vpop.f32.mrb[2].mxu1 }
 0x301   :  { %v510_v48 = vadd.f32 %v505_v47, %v434_v29  ;;  %v507_v54 = vpop.f32.mrb[3].mxu1  ;;  %v3771_v47 = vld [vmem:[#allocation4 + $0x8] sm:$0xff] }
 0x302   :  { %v511_v56 = vadd.f32 %v507_v54, %v435_v34  ;;  %vm535_vm0 = vcmp.ne.f32.partialorder %v3771_v47, 0.0 }
 0x303   :  { %3163 = vtanh.f32 %v510_v48 }
 0x304   :  { %3165 = vtanh.f32 %v511_v56 }
 0x30d   :  { %v3164_v58 = vpop.eup %3163 }
 0x30e   :  { %v3166_v60 = vpop.eup %3165  ;;  %v514_v62 = vmul.f32 0.5, %v3164_v58 }
 0x30f   :  { %v515_v1 = vmul.f32 0.5, %v3166_v60 }
 0x310   :  { %v516_v9 = vadd.f32 0.5, %v514_v62 }
 0x311   :  { %v517_v5 = vadd.f32 0.5, %v515_v1 }
 0x312   :  { %v524_v26 = vmul.f32 %v522_v20, %v516_v9 }
 0x313   :  { %v519_v15 = vsel %vm80_vm11, %v3166_v60, %v517_v5 }
 0x314   :  { %v525_v2 = vmul.f32 %v519_v15, %v516_v9 }
 0x316   :  { %527 = vrot.lane.b32.xlu0 %v525_v2, %s3378_s0 }
 0x388   :  { %v528_v38 = vpop.permute.xlu0 %527 }
 0x389   :  { %v530_v29 = vadd.f32 %v528_v38, %v524_v26 }
 0x38b   :  { %3167 = vtanh.f32 %v530_v29  ;;  %542 = vrot.lane.b32.xlu0 %v530_v29, %s3378_s0 }
 0x395   :  { %v3168_v34 = vpop.eup %3167 }
 0x396   :  { %v532_v51 = vmul.f32 %v3168_v34, %v519_v15 }
 0x398   :  { %537 = vrot.lane.b32.xlu1 %v532_v51, %s3378_s0 }
 0x3fd   :  { %v543_v48 = vpop.permute.xlu0 %542 }
 0x3fe   :  { %v545_v54 = vsel %vm535_vm0, %v543_v48, %v418_v46 }
 0x3ff   :  { %648 = vrot.lane.b32.xlu1 %v545_v54, %s3378_s0 }
 0x40a   :  { %v538_v56 = vpop.permute.xlu1 %537 }
 0x40b   :  { %v540_v58 = vsel %vm535_vm0, %v538_v56, %v413_v43  ;;  %v546_v60 = vsel %vm535_vm0, %v538_v56, 0.0 }
 0x40c   :  { %548 = vst.msk [vmem:[#allocation3 + $0x8] sm:$0xff] %vm419_vm13, %v546_v60  ;;  %2688 = vmatmul.mubr.msk.f32.vlgmr.msra.gmra.mrb[16].mxu0 %vm313_vm15, %v540_v58 }
 0x40d   :  { %550 = vst.msk [vmem:[#allocation3 + $0x30] sm:$0xff] %vm422_vm14, %v546_v60  ;;  %2886 = vmatpush1.bf16.msra.mxu0 %v3505_v13  ;;  %878 = vmatprep.mubr.f32.mxu0 %v3377_v0  ;;  %v3808_v60 = vld [vmem:[#allocation4 + $0x10] sm:$0xff] }
 0x40e   :  { %2888 = vmatprep.subr.bf16.mxu0 %v3513_v16  ;;  %vm662_vm1 = vcmp.ne.f32.partialorder %v3808_v60, 0.0 }
 0x411   :  { %2890 = vmatpush1.bf16.msra.mxu0 %v3531_v21 }
 0x412   :  { %2892 = vmatprep.subr.bf16.mxu0 %v3538_v23 }
 0x415   :  { %2894 = vmatpush1.bf16.msra.mxu0 %v3556_v28 }
 0x416   :  { %2896 = vmatprep.subr.bf16.mxu0 %v3563_v30 }
 0x419   :  { %2898 = vmatpush1.bf16.msra.mxu0 %v3575_v33 }
 0x41a   :  { %2916 = vmatprep.subr.bf16.mxu0 %v3503_v12 }
 0x4df   :  { %v632_v46 = vpop.f32.mrb[16].mxu0 }
 0x4e0   :  { %v637_v43 = vadd.f32 %v632_v46, %v561_v18  ;;  %v634_v62 = vpop.f32.mrb[17].mxu0  ;;  %v649_v18 = vpop.permute.xlu1 %648 }
 0x4e1   :  { %v638_v1 = vadd.f32 %v634_v62, %v562_v22 }
 0x4e2   :  { %3169 = vtanh.f32 %v637_v43 }
 0x4e3   :  { %3171 = vtanh.f32 %v638_v1 }
 0x4ec   :  { %v3170_v5 = vpop.eup %3169 }
 0x4ed   :  { %v3172_v9 = vpop.eup %3171  ;;  %v641_v15 = vmul.f32 0.5, %v3170_v5 }
 0x4ee   :  { %v642_v2 = vmul.f32 0.5, %v3172_v9 }
 0x4ef   :  { %v643_v26 = vadd.f32 0.5, %v641_v15 }
 0x4f0   :  { %v644_v20 = vadd.f32 0.5, %v642_v2 }
 0x4f1   :  { %v651_v34 = vmul.f32 %v649_v18, %v643_v26 }
 0x4f2   :  { %v646_v38 = vsel %vm80_vm11, %v3172_v9, %v644_v20 }
 0x4f3   :  { %v652_v29 = vmul.f32 %v646_v38, %v643_v26 }
 0x4f5   :  { %654 = vrot.lane.b32.xlu0 %v652_v29, %s3378_s0 }
 0x567   :  { %v655_v51 = vpop.permute.xlu0 %654 }
 0x568   :  { %v657_v48 = vadd.f32 %v655_v51, %v651_v34 }
 0x56a   :  { %3173 = vtanh.f32 %v657_v48  ;;  %669 = vrot.lane.b32.xlu0 %v657_v48, %s3378_s0 }
 0x574   :  { %v3174_v22 = vpop.eup %3173 }
 0x575   :  { %v659_v56 = vmul.f32 %v3174_v22, %v646_v38 }
 0x577   :  { %664 = vrot.lane.b32.xlu1 %v659_v56, %s3378_s0 }
 0x5dc   :  { %v670_v46 = vpop.permute.xlu0 %669 }
 0x5dd   :  { %v672_v43 = vsel %vm662_vm1, %v670_v46, %v545_v54  ;;  %v3845_v46 = vld [vmem:[#allocation4 + $0x18] sm:$0xff] }
 0x5de   :  { %775 = vrot.lane.b32.xlu1 %v672_v43, %s3378_s0  ;;  %vm789_vm2 = vcmp.ne.f32.partialorder %v3845_v46, 0.0 }
 0x5e9   :  { %v665_v62 = vpop.permute.xlu1 %664 }
 0x5ea   :  { %v667_v1 = vsel %vm662_vm1, %v665_v62, %v540_v58  ;;  %v673_v5 = vsel %vm662_vm1, %v665_v62, 0.0 }
 0x5eb   :  { %675 = vst.msk [vmem:[#allocation3 + $0x10] sm:$0xff] %vm419_vm13, %v673_v5  ;;  %2689 = vmatmul.mubr.msk.f32.vlgmr.msra.gmra.mrb[4].mxu1 %vm313_vm15, %v667_v1 }
 0x5ec   :  { %677 = vst.msk [vmem:[#allocation3 + $0x28] sm:$0xff] %vm422_vm14, %v673_v5  ;;  %2902 = vmatpush1.bf16.msra.mxu1 %v3505_v13  ;;  %997 = vmatprep.mubr.f32.mxu1 %v3377_v0 }
 0x5ed   :  { %2904 = vmatprep.subr.bf16.mxu1 %v3513_v16 }
 0x5f0   :  { %2906 = vmatpush1.bf16.msra.mxu1 %v3531_v21 }
 0x5f1   :  { %2908 = vmatprep.subr.bf16.mxu1 %v3538_v23 }
 0x5f4   :  { %2910 = vmatpush1.bf16.msra.mxu1 %v3556_v28 }
 0x5f5   :  { %2912 = vmatprep.subr.bf16.mxu1 %v3563_v30 }
 0x5f8   :  { %2914 = vmatpush1.bf16.msra.mxu1 %v3575_v33 }
 0x5f9   :  { %2932 = vmatprep.subr.bf16.mxu1 %v3503_v12 }
 0x6be   :  { %v759_v54 = vpop.f32.mrb[4].mxu1 }
 0x6bf   :  { %v764_v58 = vadd.f32 %v759_v54, %v688_v7  ;;  %v761_v9 = vpop.f32.mrb[5].mxu1  ;;  %v776_v7 = vpop.permute.xlu1 %775 }
 0x6c0   :  { %v765_v15 = vadd.f32 %v761_v9, %v689_v10 }
 0x6c1   :  { %3175 = vtanh.f32 %v764_v58 }
 0x6c2   :  { %3177 = vtanh.f32 %v765_v15 }
 0x6cb   :  { %v3176_v2 = vpop.eup %3175 }
 0x6cc   :  { %v3178_v20 = vpop.eup %3177  ;;  %v768_v26 = vmul.f32 0.5, %v3176_v2 }
 0x6cd   :  { %v769_v12 = vmul.f32 0.5, %v3178_v20 }
 0x6ce   :  { %v770_v29 = vadd.f32 0.5, %v768_v26 }
 0x6cf   :  { %v771_v38 = vadd.f32 0.5, %v769_v12 }
 0x6d0   :  { %v778_v51 = vmul.f32 %v776_v7, %v770_v29 }
 0x6d1   :  { %v773_v18 = vsel %vm80_vm11, %v3178_v20, %v771_v38 }
 0x6d2   :  { %v779_v34 = vmul.f32 %v773_v18, %v770_v29 }
 0x6d4   :  { %781 = vrot.lane.b32.xlu0 %v779_v34, %s3378_s0 }
 0x746   :  { %v782_v48 = vpop.permute.xlu0 %781 }
 0x747   :  { %v784_v22 = vadd.f32 %v782_v48, %v778_v51 }
 0x749   :  { %3179 = vtanh.f32 %v784_v22  ;;  %796 = vrot.lane.b32.xlu0 %v784_v22, %s3378_s0 }
 0x753   :  { %v3180_v10 = vpop.eup %3179 }
 0x754   :  { %v786_v56 = vmul.f32 %v3180_v10, %v773_v18 }
 0x756   :  { %791 = vrot.lane.b32.xlu1 %v786_v56, %s3378_s0 }
 0x7bb   :  { %v797_v62 = vpop.permute.xlu0 %796 }
 0x7bc   :  { %v799_v5 = vsel %vm789_vm2, %v797_v62, %v672_v43 }
 0x7bd   :  { %896 = vrot.lane.b32.xlu1 %v799_v5, %s3378_s0 }
 0x7c8   :  { %v792_v54 = vpop.permute.xlu1 %791 }
 0x7c9   :  { %v794_v58 = vsel %vm789_vm2, %v792_v54, %v667_v1  ;;  %v800_v9 = vsel %vm789_vm2, %v792_v54, 0.0 }
 0x7ca   :  { %802 = vst.msk [vmem:[#allocation3 + $0x18] sm:$0xff] %vm419_vm13, %v800_v9  ;;  %2690 = vmatmul.mubr.msk.f32.vlgmr.msra.gmra.mrb[18].mxu0 %vm313_vm15, %v794_v58 }
 0x7cb   :  { %804 = vst.msk [vmem:[#allocation3 + $0x20] sm:$0xff] %vm422_vm14, %v800_v9  ;;  %2918 = vmatpush1.bf16.msra.mxu0 %v3505_v13  ;;  %1116 = vmatprep.mubr.f32.mxu0 %v3377_v0 }
 0x7cc   :  { %2920 = vmatprep.subr.bf16.mxu0 %v3513_v16 }
 0x7cf   :  { %2922 = vmatpush1.bf16.msra.mxu0 %v3531_v21 }
 0x7d0   :  { %2924 = vmatprep.subr.bf16.mxu0 %v3538_v23 }
 0x7d3   :  { %2926 = vmatpush1.bf16.msra.mxu0 %v3556_v28 }
 0x7d4   :  { %2928 = vmatprep.subr.bf16.mxu0 %v3563_v30 }
 0x7d7   :  { %2930 = vmatpush1.bf16.msra.mxu0 %v3575_v33 }
 0x82f   :  { %v897_v4 = vpop.permute.xlu1 %896 }
 0x89d   :  { %v880_v43 = vpop.f32.mrb[18].mxu0 }
 0x89e   :  { %v885_v1 = vadd.f32 %v880_v43, %v809_v8  ;;  %v882_v15 = vpop.f32.mrb[19].mxu0 }
 0x89f   :  { %v886_v2 = vadd.f32 %v882_v15, %v810_v11  ;;  %v3881_v11 = vld [vmem:[#allocation4 + $0x20] sm:$0xff] }
 0x8a0   :  { %3181 = vtanh.f32 %v885_v1  ;;  %vm910_vm3 = vcmp.ne.f32.partialorder %v3881_v11, 0.0 }
 0x8a1   :  { %3183 = vtanh.f32 %v886_v2 }
 0x8aa   :  { %v3182_v20 = vpop.eup %3181 }
 0x8ab   :  { %v3184_v26 = vpop.eup %3183  ;;  %v889_v12 = vmul.f32 0.5, %v3182_v20 }
 0x8ac   :  { %v890_v38 = vmul.f32 0.5, %v3184_v26 }
 0x8ad   :  { %v891_v18 = vadd.f32 0.5, %v889_v12 }
 0x8ae   :  { %v892_v29 = vadd.f32 0.5, %v890_v38 }
 0x8af   :  { %v899_v8 = vmul.f32 %v897_v4, %v891_v18 }
 0x8b0   :  { %v894_v34 = vsel %vm80_vm11, %v3184_v26, %v892_v29 }
 0x8b1   :  { %v900_v59 = vmul.f32 %v894_v34, %v891_v18 }
 0x8b3   :  { %902 = vrot.lane.b32.xlu0 %v900_v59, %s3378_s0 }
 0x925   :  { %v903_v7 = vpop.permute.xlu0 %902 }
 0x926   :  { %v905_v51 = vadd.f32 %v903_v7, %v899_v8 }
 0x928   :  { %3185 = vtanh.f32 %v905_v51  ;;  %917 = vrot.lane.b32.xlu0 %v905_v51, %s3378_s0 }
 0x932   :  { %v3186_v61 = vpop.eup %3185 }
 0x933   :  { %v907_v6 = vmul.f32 %v3186_v61, %v894_v34 }
 0x935   :  { %912 = vrot.lane.b32.xlu1 %v907_v6, %s3378_s0 }
 0x99a   :  { %v918_v48 = vpop.permute.xlu0 %917 }
 0x99b   :  { %v920_v22 = vsel %vm910_vm3, %v918_v48, %v799_v5 }
 0x99c   :  { %1015 = vrot.lane.b32.xlu1 %v920_v22, %s3378_s0 }
 0x9a7   :  { %v913_v10 = vpop.permute.xlu1 %912 }
 0x9a8   :  { %v915_v56 = vsel %vm910_vm3, %v913_v10, %v794_v58  ;;  %v921_v62 = vsel %vm910_vm3, %v913_v10, 0.0 }
 0x9a9   :  { %922 = vst.msk [vmem:[#allocation3 + $0x20] sm:$0xff] %vm419_vm13, %v921_v62  ;;  %2691 = vmatmul.mubr.msk.f32.vlgmr.msra.gmra.mrb[6].mxu1 %vm313_vm15, %v915_v56 }
 0x9aa   :  { %923 = vst.msk [vmem:[#allocation3 + $0x18] sm:$0xff] %vm422_vm14, %v921_v62  ;;  %2934 = vmatpush1.bf16.msra.mxu1 %v3505_v13  ;;  %1235 = vmatprep.mubr.f32.mxu1 %v3377_v0 }
 0x9ab   :  { %2936 = vmatprep.subr.bf16.mxu1 %v3513_v16 }
 0x9ae   :  { %2938 = vmatpush1.bf16.msra.mxu1 %v3531_v21 }
 0x9af   :  { %2940 = vmatprep.subr.bf16.mxu1 %v3538_v23 }
 0x9b2   :  { %2942 = vmatpush1.bf16.msra.mxu1 %v3556_v28 }
 0x9b3   :  { %2944 = vmatprep.subr.bf16.mxu1 %v3563_v30 }
 0x9b6   :  { %2946 = vmatpush1.bf16.msra.mxu1 %v3575_v33 }
 0xa0e   :  { %v1016_v14 = vpop.permute.xlu1 %1015 }
 0xa7c   :  { %v999_v5 = vpop.f32.mrb[6].mxu1 }
 0xa7d   :  { %v1004_v13 = vadd.f32 %v999_v5, %v928_v19  ;;  %v1001_v54 = vpop.f32.mrb[7].mxu1 }
 0xa7e   :  { %v1005_v16 = vadd.f32 %v1001_v54, %v929_v24  ;;  %v3917_v24 = vld [vmem:[#allocation4 + $0x28] sm:$0xff] }
 0xa7f   :  { %3187 = vtanh.f32 %v1004_v13  ;;  %vm1029_vm4 = vcmp.ne.f32.partialorder %v3917_v24, 0.0 }
 0xa80   :  { %3189 = vtanh.f32 %v1005_v16 }
 0xa89   :  { %v3188_v21 = vpop.eup %3187 }
 0xa8a   :  { %v3190_v23 = vpop.eup %3189  ;;  %v1008_v28 = vmul.f32 0.5, %v3188_v21 }
 0xa8b   :  { %v1009_v30 = vmul.f32 0.5, %v3190_v23 }
 0xa8c   :  { %v1010_v58 = vadd.f32 0.5, %v1008_v28 }
 0xa8d   :  { %v1011_v33 = vadd.f32 0.5, %v1009_v30 }
 0xa8e   :  { %v1018_v19 = vmul.f32 %v1016_v14, %v1010_v58 }
 0xa8f   :  { %v1013_v9 = vsel %vm80_vm11, %v3190_v23, %v1011_v33 }
 0xa90   :  { %v1019_v55 = vmul.f32 %v1013_v9, %v1010_v58 }
 0xa92   :  { %1021 = vrot.lane.b32.xlu0 %v1019_v55, %s3378_s0 }
 0xb04   :  { %v1022_v43 = vpop.permute.xlu0 %1021 }
 0xb05   :  { %v1024_v1 = vadd.f32 %v1022_v43, %v1018_v19  ;;  %v1286_v19 = vld [vmem:[%s4657_s5 + $0x28] sm:$0xff]  ;;  %v1288_v43 = vld [vmem:[%s4657_s5 + $0x38] sm:$0xff] }
 0xb07   :  { %3191 = vtanh.f32 %v1024_v1  ;;  %1036 = vrot.lane.b32.xlu0 %v1024_v1, %s3378_s0 }
 0xb11   :  { %v3192_v57 = vpop.eup %3191 }
 0xb12   :  { %v1026_v17 = vmul.f32 %v3192_v57, %v1013_v9  ;;  %v2951_v57 = vpack.c.bf16 %v1288_v43, %v1286_v19  ;;  %v4115_v43 = vld [vmem:[#allocation4 + $0x38] sm:$0xff] }
 0xb13   :  { %vm1267_vm6 = vcmp.ne.f32.partialorder %v4115_v43, 0.0 }
 0xb14   :  { %1031 = vrot.lane.b32.xlu1 %v1026_v17, %s3378_s0  ;;  %v1285_v17 = vld [vmem:[%s4657_s5 + $0x20] sm:$0xff] }
 0xb79   :  { %v1037_v15 = vpop.permute.xlu0 %1036 }
 0xb7a   :  { %v1039_v2 = vsel %vm1029_vm4, %v1037_v15, %v920_v22  ;;  %v1287_v15 = vld [vmem:[%s4657_s5 + $0x30] sm:$0xff] }
 0xb7b   :  { %1134 = vrot.lane.b32.xlu1 %v1039_v2, %s3378_s0 }
 0xb86   :  { %v1032_v20 = vpop.permute.xlu1 %1031 }
 0xb87   :  { %v1034_v26 = vsel %vm1029_vm4, %v1032_v20, %v915_v56  ;;  %v1040_v12 = vsel %vm1029_vm4, %v1032_v20, 0.0 }
 0xb88   :  { %1041 = vst.msk [vmem:[#allocation3 + $0x28] sm:$0xff] %vm419_vm13, %v1040_v12  ;;  %2692 = vmatmul.mubr.msk.f32.vlgmr.msra.gmra.mrb[20].mxu0 %vm313_vm15, %v1034_v26 }
 0xb89   :  { %1042 = vst.msk [vmem:[#allocation3 + $0x10] sm:$0xff] %vm422_vm14, %v1040_v12  ;;  %1421 = vmatprep.mubr.f32.mxu0 %v3377_v0 }
 0xbed   :  { %v1135_v25 = vpop.permute.xlu1 %1134 }
 0xc5b   :  { %v1118_v38 = vpop.f32.mrb[20].mxu0 }
 0xc5c   :  { %v1123_v29 = vadd.f32 %v1118_v38, %v1047_v31  ;;  %v1120_v18 = vpop.f32.mrb[21].mxu0 }
 0xc5d   :  { %v1124_v34 = vadd.f32 %v1120_v18, %v1048_v35  ;;  %v3946_v35 = vld [vmem:[#allocation4 + $0x30] sm:$0xff]  ;;  %v1292_v18 = vld [vmem:[%s4657_s5 + $0x58] sm:$0xff] }
 0xc5e   :  { %3193 = vtanh.f32 %v1123_v29  ;;  %vm1148_vm5 = vcmp.ne.f32.partialorder %v3946_v35, 0.0  ;;  %v1290_v29 = vld [vmem:[%s4657_s5 + $0x48] sm:$0xff] }
 0xc5f   :  { %3195 = vtanh.f32 %v1124_v34  ;;  %v2955_v34 = vpack.c.bf16 %v1292_v18, %v1290_v29 }
 0xc68   :  { %v3194_v59 = vpop.eup %3193 }
 0xc69   :  { %v3196_v4 = vpop.eup %3195  ;;  %v1127_v8 = vmul.f32 0.5, %v3194_v59  ;;  %v1289_v59 = vld [vmem:[%s4657_s5 + $0x40] sm:$0xff] }
 0xc6a   :  { %v1128_v7 = vmul.f32 0.5, %v3196_v4 }
 0xc6b   :  { %v1129_v61 = vadd.f32 0.5, %v1127_v8 }
 0xc6c   :  { %v1130_v51 = vadd.f32 0.5, %v1128_v7  ;;  %v1294_v7 = vld [vmem:[%s4657_s5 + $0x68] sm:$0xff] }
 0xc6d   :  { %v1137_v31 = vmul.f32 %v1135_v25, %v1129_v61 }
 0xc6e   :  { %v1132_v6 = vsel %vm80_vm11, %v3196_v4, %v1130_v51  ;;  %v1291_v4 = vld [vmem:[%s4657_s5 + $0x50] sm:$0xff]  ;;  %v1296_v51 = vld [vmem:[%s4657_s5 + $0x78] sm:$0xff] }
 0xc6f   :  { %v1138_v50 = vmul.f32 %v1132_v6, %v1129_v61  ;;  %v2957_v8 = vpack.c.bf16 %v1291_v4, %v1289_v59  ;;  %v1293_v61 = vld [vmem:[%s4657_s5 + $0x60] sm:$0xff] }
 0xc70   :  { %v1313_v4 = vld [vmem:[%s4659_s7] sm:$0x3] }
 0xc71   :  { %1140 = vrot.lane.b32.xlu0 %v1138_v50, %s3378_s0  ;;  %v1295_v50 = vld [vmem:[%s4657_s5 + $0x70] sm:$0xff] }
 0xc72   :  { %v2961_v25 = vpack.c.bf16 %v1295_v50, %v1293_v61  ;;  %v1330_v61 = vrot.slane %v1313_v4, %v143_v44 }
 0xce3   :  { %v1141_v48 = vpop.permute.xlu0 %1140 }
 0xce4   :  { %v1143_v22 = vadd.f32 %v1141_v48, %v1137_v31 }
 0xce6   :  { %3197 = vtanh.f32 %v1143_v22  ;;  %1155 = vrot.lane.b32.xlu0 %v1143_v22, %s3378_s0  ;;  %v1298_v22 = vld [vmem:[%s4658_s6 + $0x8] sm:$0xff] }
 0xcf0   :  { %v3198_v52 = vpop.eup %3197 }
 0xcf1   :  { %v1145_v27 = vmul.f32 %v3198_v52, %v1132_v6  ;;  %v2959_v6 = vpack.c.bf16 %v1296_v51, %v1294_v7  ;;  %v1300_v52 = vld [vmem:[%s4658_s6 + $0x18] sm:$0xff]  ;;  %v1326_v51 = vrot.slane %v1313_v4, %v139_v41 }
 0xcf3   :  { %1150 = vrot.lane.b32.xlu1 %v1145_v27, %s3378_s0  ;;  %v4037_v27 = vpack.c.bf16 %v1300_v52, %v1298_v22 }
 0xcf5   :  { %2964 = vmatprep.subr.bf16.mxu1 %v4037_v27 }
 0xd58   :  { %v1156_v10 = vpop.permute.xlu0 %1155 }
 0xd59   :  { %v3951_v56 = vsel %vm1148_vm5, %v1156_v10, %v1039_v2  ;;  %v2953_v2 = vpack.c.bf16 %v1287_v15, %v1285_v17  ;;  %v1297_v10 = vld [vmem:[%s4658_s6] sm:$0xff] }
 0xd5a   :  { %1253 = vrot.lane.b32.xlu1 %v3951_v56, %s3378_s0 }
 0xd65   :  { %v1151_v62 = vpop.permute.xlu1 %1150 }
 0xd66   :  { %v3957_v5 = vsel %vm1148_vm5, %v1151_v62, %v1034_v26  ;;  %v1159_v13 = vsel %vm1148_vm5, %v1151_v62, 0.0  ;;  %v1299_v62 = vld [vmem:[%s4658_s6 + $0x10] sm:$0xff] }
 0xd67   :  { %1160 = vst.msk [vmem:[#allocation3 + $0x30] sm:$0xff] %vm419_vm13, %v1159_v13  ;;  %2693 = vmatmul.mubr.msk.f32.vlgmr.msra.gmra.mrb[8].mxu1 %vm313_vm15, %v3957_v5 }
 0xd68   :  { %1161 = vst.msk [vmem:[#allocation3 + $0x8] sm:$0xff] %vm422_vm14, %v1159_v13  ;;  %1556 = vmatprep.mubr.f32.mxu1 %v3377_v0  ;;  %v4045_v13 = vpack.c.bf16 %v1299_v62, %v1297_v10 }
 0xd6a   :  { %2966 = vmatpush1.bf16.msra.mxu1 %v4045_v13 }
 0xd6e   :  { %v1320_v29 = vld [vmem:[#allocation3 + $0x30] sm:$0xff] }
 0xd6f   :  { %v1315_v15 = vld [vmem:[#allocation3 + $0x8] sm:$0xff] }
 0xdcc   :  { %v1254_v20 = vpop.permute.xlu1 %1253 }
 0xe3a   :  { %v1237_v54 = vpop.f32.mrb[8].mxu1 }
 0xe3b   :  { %v1242_v16 = vadd.f32 %v1237_v54, %v1166_v49  ;;  %v1239_v21 = vpop.f32.mrb[9].mxu1  ;;  %v2947_v49 = vpack.c.bf16 %v1284_v39, %v1282_v37  ;;  %v1302_v54 = vld [vmem:[%s4658_s6 + $0x28] sm:$0xff]  ;;  %v1312_v39 = vld [vmem:[%s4658_s6 + $0x78] sm:$0xff] }
 0xe3c   :  { %v1243_v23 = vadd.f32 %v1239_v21, %v1167_v45  ;;  %v1283_v45 = vld [vmem:[%s4657_s5 + $0x10] sm:$0xff]  ;;  %v1310_v37 = vld [vmem:[%s4658_s6 + $0x68] sm:$0xff] }
 0xe3d   :  { %3199 = vtanh.f32 %v1242_v16  ;;  %v2949_v1 = vpack.c.bf16 %v1283_v45, %v1281_v42  ;;  %2948 = vmatprep.subr.bf16.mxu0 %v2947_v49  ;;  %v1304_v16 = vld [vmem:[%s4658_s6 + $0x38] sm:$0xff]  ;;  %v4092_v42 = vpack.c.bf16 %v1312_v39, %v1310_v37  ;;  %v1309_v49 = vld [vmem:[%s4658_s6 + $0x60] sm:$0xff]  ;;  %v1311_v45 = vld [vmem:[%s4658_s6 + $0x70] sm:$0xff] }
 0xe3e   :  { %3201 = vtanh.f32 %v1243_v23  ;;  %v4056_v21 = vpack.c.bf16 %v1304_v16, %v1302_v54  ;;  %v1301_v23 = vld [vmem:[%s4658_s6 + $0x20] sm:$0xff]  ;;  %v4100_v19 = vpack.c.bf16 %v1311_v45, %v1309_v49 }
 0xe3f   :  { %2950 = vmatpush1.bf16.msra.mxu0 %v2949_v1 }
 0xe40   :  { %2952 = vmatprep.subr.bf16.mxu0 %v2951_v57  ;;  %2968 = vmatprep.subr.bf16.mxu1 %v4056_v21 }
 0xe43   :  { %2954 = vmatpush1.bf16.msra.mxu0 %v2953_v2  ;;  %v1316_v2 = vld [vmem:[#allocation3 + $0x10] sm:$0xff] }
 0xe44   :  { %2956 = vmatprep.subr.bf16.mxu0 %v2955_v34 }
 0xe47   :  { %v3200_v28 = vpop.eup %3199  ;;  %2958 = vmatpush1.bf16.msra.mxu0 %v2957_v8 }
 0xe48   :  { %v3202_v30 = vpop.eup %3201  ;;  %v1246_v33 = vmul.f32 0.5, %v3200_v28  ;;  %2960 = vmatprep.subr.bf16.mxu0 %v2959_v6  ;;  %v1303_v28 = vld [vmem:[%s4658_s6 + $0x30] sm:$0xff] }
 0xe49   :  { %v1247_v58 = vmul.f32 0.5, %v3202_v30 }
 0xe4a   :  { %v1248_v55 = vadd.f32 0.5, %v1246_v33  ;;  %v1306_v33 = vld [vmem:[%s4658_s6 + $0x48] sm:$0xff] }
 0xe4b   :  { %v1249_v9 = vadd.f32 0.5, %v1247_v58  ;;  %2962 = vmatpush1.bf16.msra.mxu0 %v2961_v25  ;;  %v1308_v58 = vld [vmem:[%s4658_s6 + $0x58] sm:$0xff] }
 0xe4c   :  { %v1256_v26 = vmul.f32 %v1254_v20, %v1248_v55  ;;  %2996 = vmatprep.subr.bf16.mxu0 %v4037_v27  ;;  %v1317_v20 = vld [vmem:[#allocation3 + $0x18] sm:$0xff] }
 0xe4d   :  { %v1251_v14 = vsel %vm80_vm11, %v3202_v30, %v1249_v9  ;;  %v4064_v30 = vpack.c.bf16 %v1303_v28, %v1301_v23  ;;  %v4074_v9 = vpack.c.bf16 %v1308_v58, %v1306_v33 }
 0xe4e   :  { %v1257_v36 = vmul.f32 %v1251_v14, %v1248_v55  ;;  %v1305_v55 = vld [vmem:[%s4658_s6 + $0x40] sm:$0xff] }
 0xe4f   :  { %2970 = vmatpush1.bf16.msra.mxu1 %v4064_v30 }
 0xe50   :  { %1259 = vrot.lane.b32.xlu0 %v1257_v36, %s3378_s0  ;;  %2972 = vmatprep.subr.bf16.mxu1 %v4074_v9 }
 0xec2   :  { %v1260_v12 = vpop.permute.xlu0 %1259 }
 0xec3   :  { %v4003_v38 = vadd.f32 %v1260_v12, %v1256_v26  ;;  %v1318_v26 = vld [vmem:[#allocation3 + $0x20] sm:$0xff]  ;;  %v1319_v12 = vld [vmem:[#allocation3 + $0x28] sm:$0xff] }
 0xec5   :  { %3203 = vtanh.f32 %v4003_v38 }
 0xecf   :  { %v3204_v31 = vpop.eup %3203 }
 0xed0   :  { %v1264_v48 = vmul.f32 %v3204_v31, %v1251_v14  ;;  %v1307_v14 = vld [vmem:[%s4658_s6 + $0x50] sm:$0xff] }
 0xed1   :  { %v4082_v36 = vpack.c.bf16 %v1307_v14, %v1305_v55 }
 0xed2   :  { %1269 = vrot.lane.b32.xlu1 %v1264_v48, %s3378_s0 }
 0xed3   :  { %2974 = vmatpush1.bf16.msra.mxu1 %v4082_v36 }
 0xed4   :  { %2976 = vmatprep.subr.bf16.mxu1 %v4092_v42 }
 0xed7   :  { %2978 = vmatpush1.bf16.msra.mxu1 %v4100_v19 }
 0xed8   :  { %2980 = vmatprep.subr.bf16.mxu1 %v4037_v27 }
 0xeda   :  { %1557 = vmatmul.mubr.f32.vlgmr.msra.gmra.mrb[10].mxu1 %v3377_v0 }
 0xedb   :  { %2982 = vmatpush1.bf16.msra.mxu1 %v4045_v13  ;;  %1670 = vmatprep.mubr.f32.mxu1 %v3377_v0 }
 0xedc   :  { %2984 = vmatprep.subr.bf16.mxu1 %v4056_v21 }
 0xedf   :  { %2986 = vmatpush1.bf16.msra.mxu1 %v4064_v30 }
 0xee0   :  { %2988 = vmatprep.subr.bf16.mxu1 %v4074_v9 }
 0xee3   :  { %2990 = vmatpush1.bf16.msra.mxu1 %v4082_v36 }
 0xee4   :  { %2992 = vmatprep.subr.bf16.mxu1 %v4092_v42 }
 0xee7   :  { %2994 = vmatpush1.bf16.msra.mxu1 %v4100_v19 }
 0xee8   :  { %3012 = vmatprep.subr.bf16.mxu1 %v4037_v27 }
 0xf44   :  { %v4118_v1 = vpop.permute.xlu1 %1269 }
 0xf45   :  { %v1278_v57 = vsel %vm1267_vm6, %v4118_v1, 0.0 }
 0xf46   :  { %1279 = vst.msk [vmem:[#allocation3 + $0x38] sm:$0xff] %vm419_vm13, %v1278_v57 }
 0xf47   :  { %1280 = vst.msk [vmem:[#allocation3] sm:$0xff] %vm422_vm14, %v1278_v57 }
 0xf4d   :  { %v1321_v18 = vld [vmem:[#allocation3 + $0x38] sm:$0xff] }
 0xf4e   :  { %v1314_v17 = vld [vmem:[#allocation3] sm:$0xff] }
 0xf4f   :  { %2694 = vmatmul.mubr.msk.f32.vlgmr.msra.gmra.mrb[22].mxu0 %vm313_vm15, %v1314_v17 }
 0xf50   :  { %1427 = vmatprep.mubr.f32.mxu0 %v3377_v0  ;;  %2998 = vmatpush1.bf16.msra.mxu0 %v4045_v13 }
 0xf51   :  { %3000 = vmatprep.subr.bf16.mxu0 %v4056_v21 }
 0xf53   :  { %2695 = vmatmul.mubr.msk.f32.gmra.mrb[24].mxu0 %vm313_vm15, %v1315_v15 }
 0xf54   :  { %1433 = vmatprep.mubr.f32.mxu0 %v3377_v0  ;;  %3002 = vmatpush1.bf16.msra.mxu0 %v4064_v30 }
 0xf55   :  { %3004 = vmatprep.subr.bf16.mxu0 %v4074_v9 }
 0xf57   :  { %2696 = vmatmul.mubr.msk.f32.gmra.mrb[26].mxu0 %vm313_vm15, %v1316_v2 }
 0xf58   :  { %1439 = vmatprep.mubr.f32.mxu0 %v3377_v0  ;;  %3006 = vmatpush1.bf16.msra.mxu0 %v4082_v36 }
 0xf59   :  { %3008 = vmatprep.subr.bf16.mxu0 %v4092_v42 }
 0xf5b   :  { %2697 = vmatmul.mubr.msk.f32.gmra.mrb[28].mxu0 %vm313_vm15, %v1317_v20 }
 0xf5c   :  { %1445 = vmatprep.mubr.f32.mxu0 %v3377_v0  ;;  %3010 = vmatpush1.bf16.msra.mxu0 %v4100_v19 }
 0xf5d   :  { %3028 = vmatprep.subr.bf16.mxu0 %v4037_v27 }
 0xf5f   :  { %2698 = vmatmul.mubr.msk.f32.gmra.mrb[30].mxu0 %vm313_vm15, %v1318_v26 }
 0xf60   :  { %1451 = vmatprep.mubr.f32.mxu0 %v3377_v0 }
 0xf63   :  { %2699 = vmatmul.mubr.msk.f32.gmra.mrb[32].mxu0 %vm313_vm15, %v1319_v12 }
 0xf64   :  { %1457 = vmatprep.mubr.f32.mxu0 %v3377_v0 }
 0xf67   :  { %2700 = vmatmul.mubr.msk.f32.gmra.mrb[34].mxu0 %vm313_vm15, %v1320_v29 }
 0xf68   :  { %1463 = vmatprep.mubr.f32.mxu0 %v3377_v0 }
 0xf6b   :  { %2701 = vmatmul.mubr.msk.f32.gmra.mrb[36].mxu0 %vm313_vm15, %v1321_v18 }
 0xf6c   :  { %1790 = vmatprep.mubr.f32.mxu0 %v3377_v0 }
 0xfad   :  { %v1558_v34 = vpop.f32.mrb[10].mxu1 }
 0xfae   :  { %v1560_v59 = vpop.f32.mrb[11].mxu1 }
0x1022   :  { %v1423_v8 = vpop.f32.mrb[22].mxu0 }
0x1023   :  { %v1425_v7 = vpop.f32.mrb[23].mxu0 }
0x1026   :  { %v1429_v6 = vpop.f32.mrb[24].mxu0 }
0x1027   :  { %v4156_v50 = vadd.f32 %v1429_v6, %v1326_v51  ;;  %v1431_v25 = vpop.f32.mrb[25].mxu0 }
0x1028   :  { %v4158_v31 = vadd.f32 %v1431_v25, %v1330_v61 }
0x102a   :  { %v1435_v48 = vpop.f32.mrb[26].mxu0 }
0x102b   :  { %v4160_v22 = vadd.f32 %v1435_v48, %v1326_v51  ;;  %v1437_v52 = vpop.f32.mrb[27].mxu0 }
0x102c   :  { %v4162_v10 = vadd.f32 %v1437_v52, %v1330_v61  ;;  %v4228_v52 = vadd.f32 %v1423_v8, %v1326_v51 }
0x102e   :  { %v1441_v62 = vpop.f32.mrb[28].mxu0 }
0x102f   :  { %v4164_v54 = vadd.f32 %v1441_v62, %v1326_v51  ;;  %v1443_v16 = vpop.f32.mrb[29].mxu0 }
0x1030   :  { %v4166_v41 = vadd.f32 %v1443_v16, %v1330_v61 }
0x1032   :  { %v1447_v40 = vpop.f32.mrb[30].mxu0 }
0x1033   :  { %v4168_v44 = vadd.f32 %v1447_v40, %v1326_v51  ;;  %v1449_v23 = vpop.f32.mrb[31].mxu0  ;;  %v4232_v40 = vadd.f32 %v1425_v7, %v1330_v61 }
0x1034   :  { %v4170_v28 = vadd.f32 %v1449_v23, %v1330_v61 }
0x1035   :  { %v1841_v33 = vsel %vm3648_vm9, %v4164_v54, %v4168_v44  ;;  %v1961_v58 = vsel %vm3648_vm9, %v4168_v44, %v4164_v54 }
0x1036   :  { %v1453_v55 = vpop.f32.mrb[32].mxu0  ;;  %v1842_v14 = vsel %vm3652_vm10, %v4166_v41, %v4170_v28  ;;  %v1962_v37 = vsel %vm3652_vm10, %v4170_v28, %v4166_v41 }
0x1037   :  { %v4188_v39 = vadd.f32 %v1453_v55, %v1326_v51  ;;  %v1455_v49 = vpop.f32.mrb[33].mxu0 }
0x1038   :  { %v4190_v45 = vadd.f32 %v1455_v49, %v1330_v61 }
0x1039   :  { %v1721_v57 = vsel %vm3648_vm9, %v4160_v22, %v4188_v39 }
0x103a   :  { %v1459_v15 = vpop.f32.mrb[34].mxu0  ;;  %v1722_v2 = vsel %vm3652_vm10, %v4162_v10, %v4190_v45 }
0x103b   :  { %v4208_v26 = vadd.f32 %v1459_v15, %v1326_v51  ;;  %v1461_v12 = vpop.f32.mrb[35].mxu0 }
0x103c   :  { %v4210_v29 = vadd.f32 %v1461_v12, %v1330_v61 }
0x103d   :  { %v1601_v18 = vsel %vm3648_vm9, %v4156_v50, %v4208_v26 }
0x103e   :  { %v1465_v6 = vpop.f32.mrb[36].mxu0  ;;  %v1602_v25 = vsel %vm3652_vm10, %v4158_v31, %v4210_v29  ;;  %v4674_v24 = vsel %vm3652_vm10, %v4210_v29, %v4158_v31 }
0x103f   :  { %v4230_v62 = vadd.f32 %v1465_v6, %v1326_v51  ;;  %v1467_v16 = vpop.f32.mrb[37].mxu0 }
0x1040   :  { %v4234_v23 = vadd.f32 %v1467_v16, %v1330_v61 }
0x1041   :  { %v1490_v55 = vsel %vm3648_vm9, %v4228_v52, %v4230_v62 }
0x1042   :  { %v1563_v15 = vadd.f32 %v1558_v34, %v1490_v55  ;;  %v1491_v8 = vsel %vm3652_vm10, %v4232_v40, %v4234_v23  ;;  %v4676_v35 = vsel %vm3652_vm10, %v4234_v23, %v4232_v40  ;;  %v2439_v40 = vld [vmem:[%s4660_s8] sm:$0xff]  ;;  %v2440_v23 = vld [vmem:[%s4660_s8 + $0x8] sm:$0xff] }
0x1043   :  { %v1564_v51 = vadd.f32 %v1560_v59, %v1491_v8 }
0x1044   :  { %3205 = vtanh.f32 %v1563_v15 }
0x1045   :  { %3207 = vtanh.f32 %v1564_v51 }
0x104e   :  { %v3206_v61 = vpop.eup %3205 }
0x104f   :  { %v3208_v12 = vpop.eup %3207  ;;  %v1567_v6 = vmul.f32 0.5, %v3206_v61 }
0x1050   :  { %v1568_v16 = vmul.f32 0.5, %v3208_v12 }
0x1051   :  { %v1569_v49 = vadd.f32 0.5, %v1567_v6 }
0x1052   :  { %v1570_v48 = vadd.f32 0.5, %v1568_v16 }
0x1053   :  { %v1573_v4 = vmul.f32 0.0, %v1569_v49 }
0x1054   :  { %v1572_v34 = vsel %vm80_vm11, %v3208_v12, %v1570_v48 }
0x1055   :  { %v1574_v55 = vmul.f32 %v1572_v34, %v1569_v49 }
0x1057   :  { %1576 = vrot.lane.b32.xlu0 %v1574_v55, %s3378_s0 }
0x10c9   :  { %v1577_v20 = vpop.permute.xlu0 %1576 }
0x10ca   :  { %v1579_v17 = vadd.f32 %v1577_v20, %v1573_v4 }
0x10cc   :  { %3209 = vtanh.f32 %v1579_v17  ;;  %1590 = vrot.lane.b32.xlu0 %v1579_v17, %s3378_s0 }
0x10d6   :  { %v3210_v59 = vpop.eup %3209 }
0x10d7   :  { %v1581_v15 = vmul.f32 %v3210_v59, %v1572_v34 }
0x10d9   :  { %1585 = vrot.lane.b32.xlu1 %v1581_v15, %s3378_s0 }
0x113e   :  { %v1591_v8 = vpop.permute.xlu0 %1590 }
0x113f   :  { %v1593_v51 = vsel %vm408_vm12, %v1591_v8, 0.0 }
0x1140   :  { %1688 = vrot.lane.b32.xlu1 %v1593_v51, %s3378_s0 }
0x114b   :  { %v1586_v48 = vpop.permute.xlu1 %1585 }
0x114c   :  { %v1588_v61 = vsel %vm408_vm12, %v1586_v48, 0.0 }
0x114d   :  { %1594 = vst.msk [vmem:[#allocation9] sm:$0xff] %vm419_vm13, %v1588_v61  ;;  %2702 = vmatmul.mubr.msk.f32.vlgmr.msra.gmra.mrb[12].mxu1 %vm313_vm15, %v1588_v61 }
0x114e   :  { %1596 = vst.msk [vmem:[#allocation9 + $0x38] sm:$0xff] %vm422_vm14, %v1588_v61  ;;  %3014 = vmatpush1.bf16.msra.mxu1 %v4045_v13  ;;  %1910 = vmatprep.mubr.f32.mxu1 %v3377_v0 }
0x114f   :  { %3016 = vmatprep.subr.bf16.mxu1 %v4056_v21 }
0x1152   :  { %3018 = vmatpush1.bf16.msra.mxu1 %v4064_v30 }
0x1153   :  { %3020 = vmatprep.subr.bf16.mxu1 %v4074_v9 }
0x1156   :  { %3022 = vmatpush1.bf16.msra.mxu1 %v4082_v36 }
0x1157   :  { %3024 = vmatprep.subr.bf16.mxu1 %v4092_v42 }
0x115a   :  { %3026 = vmatpush1.bf16.msra.mxu1 %v4100_v19 }
0x115b   :  { %3044 = vmatprep.subr.bf16.mxu1 %v4037_v27 }
0x11b2   :  { %v1689_v8 = vpop.permute.xlu1 %1688 }
0x1220   :  { %v1672_v32 = vpop.f32.mrb[12].mxu1 }
0x1221   :  { %v1677_v17 = vadd.f32 %v1672_v32, %v1601_v18  ;;  %v1674_v20 = vpop.f32.mrb[13].mxu1 }
0x1222   :  { %v1678_v4 = vadd.f32 %v1674_v20, %v1602_v25 }
0x1223   :  { %3211 = vtanh.f32 %v1677_v17 }
0x1224   :  { %3213 = vtanh.f32 %v1678_v4 }
0x122d   :  { %v3212_v49 = vpop.eup %3211 }
0x122e   :  { %v3214_v12 = vpop.eup %3213  ;;  %v1681_v6 = vmul.f32 0.5, %v3212_v49 }
0x122f   :  { %v1682_v16 = vmul.f32 0.5, %v3214_v12 }
0x1230   :  { %v1683_v55 = vadd.f32 0.5, %v1681_v6 }
0x1231   :  { %v1684_v34 = vadd.f32 0.5, %v1682_v16 }
0x1232   :  { %v1691_v48 = vmul.f32 %v1689_v8, %v1683_v55 }
0x1233   :  { %v1686_v59 = vsel %vm80_vm11, %v3214_v12, %v1684_v34 }
0x1234   :  { %v1692_v15 = vmul.f32 %v1686_v59, %v1683_v55 }
0x1236   :  { %1694 = vrot.lane.b32.xlu0 %v1692_v15, %s3378_s0 }
0x12a8   :  { %v1695_v7 = vpop.permute.xlu0 %1694 }
0x12a9   :  { %v1697_v18 = vadd.f32 %v1695_v7, %v1691_v48 }
0x12ab   :  { %3215 = vtanh.f32 %v1697_v18  ;;  %1708 = vrot.lane.b32.xlu0 %v1697_v18, %s3378_s0 }
0x12b5   :  { %v3216_v25 = vpop.eup %3215 }
0x12b6   :  { %v1699_v32 = vmul.f32 %v3216_v25, %v1686_v59 }
0x12b8   :  { %1703 = vrot.lane.b32.xlu1 %v1699_v32, %s3378_s0 }
0x131d   :  { %v1709_v17 = vpop.permute.xlu0 %1708 }
0x131e   :  { %v1711_v20 = vsel %vm535_vm0, %v1709_v17, %v1593_v51 }
0x131f   :  { %1808 = vrot.lane.b32.xlu1 %v1711_v20, %s3378_s0 }
0x132a   :  { %v1704_v4 = vpop.permute.xlu1 %1703 }
0x132b   :  { %v1706_v49 = vsel %vm535_vm0, %v1704_v4, %v1588_v61  ;;  %v1712_v7 = vsel %vm535_vm0, %v1704_v4, 0.0 }
0x132c   :  { %1714 = vst.msk [vmem:[#allocation9 + $0x8] sm:$0xff] %vm419_vm13, %v1712_v7  ;;  %2703 = vmatmul.mubr.msk.f32.vlgmr.msra.gmra.mrb[38].mxu0 %vm313_vm15, %v1706_v49 }
0x132d   :  { %1716 = vst.msk [vmem:[#allocation9 + $0x30] sm:$0xff] %vm422_vm14, %v1712_v7  ;;  %3030 = vmatpush1.bf16.msra.mxu0 %v4045_v13  ;;  %2030 = vmatprep.mubr.f32.mxu0 %v3377_v0 }
0x132e   :  { %3032 = vmatprep.subr.bf16.mxu0 %v4056_v21 }
0x1331   :  { %3034 = vmatpush1.bf16.msra.mxu0 %v4064_v30 }
0x1332   :  { %3036 = vmatprep.subr.bf16.mxu0 %v4074_v9 }
0x1335   :  { %3038 = vmatpush1.bf16.msra.mxu0 %v4082_v36 }
0x1336   :  { %3040 = vmatprep.subr.bf16.mxu0 %v4092_v42 }
0x1339   :  { %3042 = vmatpush1.bf16.msra.mxu0 %v4100_v19 }
0x133a   :  { %3060 = vmatprep.subr.bf16.mxu0 %v4037_v27 }
0x13ff   :  { %v1792_v47 = vpop.f32.mrb[38].mxu0 }
0x1400   :  { %v1797_v51 = vadd.f32 %v1792_v47, %v1721_v57  ;;  %v1794_v61 = vpop.f32.mrb[39].mxu0  ;;  %v1809_v57 = vpop.permute.xlu1 %1808 }
0x1401   :  { %v1798_v12 = vadd.f32 %v1794_v61, %v1722_v2 }
0x1402   :  { %3217 = vtanh.f32 %v1797_v51 }
0x1403   :  { %3219 = vtanh.f32 %v1798_v12 }
0x140c   :  { %v3218_v6 = vpop.eup %3217 }
0x140d   :  { %v3220_v16 = vpop.eup %3219  ;;  %v1801_v34 = vmul.f32 0.5, %v3218_v6 }
0x140e   :  { %v1802_v55 = vmul.f32 0.5, %v3220_v16 }
0x140f   :  { %v1803_v15 = vadd.f32 0.5, %v1801_v34 }
0x1410   :  { %v1804_v59 = vadd.f32 0.5, %v1802_v55 }
0x1411   :  { %v1811_v18 = vmul.f32 %v1809_v57, %v1803_v15 }
0x1412   :  { %v1806_v8 = vsel %vm80_vm11, %v3220_v16, %v1804_v59 }
0x1413   :  { %v1812_v48 = vmul.f32 %v1806_v8, %v1803_v15 }
0x1415   :  { %1814 = vrot.lane.b32.xlu0 %v1812_v48, %s3378_s0 }
0x1487   :  { %v1815_v25 = vpop.permute.xlu0 %1814 }
0x1488   :  { %v1817_v32 = vadd.f32 %v1815_v25, %v1811_v18 }
0x148a   :  { %3221 = vtanh.f32 %v1817_v32  ;;  %1828 = vrot.lane.b32.xlu0 %v1817_v32, %s3378_s0 }
0x1494   :  { %v3222_v2 = vpop.eup %3221 }
0x1495   :  { %v1819_v17 = vmul.f32 %v3222_v2, %v1806_v8 }
0x1497   :  { %1823 = vrot.lane.b32.xlu1 %v1819_v17, %s3378_s0 }
0x14fc   :  { %v1829_v4 = vpop.permute.xlu0 %1828 }
0x14fd   :  { %v1831_v7 = vsel %vm662_vm1, %v1829_v4, %v1711_v20 }
0x14fe   :  { %1928 = vrot.lane.b32.xlu1 %v1831_v7, %s3378_s0 }
0x1509   :  { %v1824_v47 = vpop.permute.xlu1 %1823 }
0x150a   :  { %v1826_v51 = vsel %vm662_vm1, %v1824_v47, %v1706_v49  ;;  %v1832_v61 = vsel %vm662_vm1, %v1824_v47, 0.0 }
0x150b   :  { %1834 = vst.msk [vmem:[#allocation9 + $0x10] sm:$0xff] %vm419_vm13, %v1832_v61  ;;  %2704 = vmatmul.mubr.msk.f32.vlgmr.msra.gmra.mrb[14].mxu1 %vm313_vm15, %v1826_v51 }
0x150c   :  { %1836 = vst.msk [vmem:[#allocation9 + $0x28] sm:$0xff] %vm422_vm14, %v1832_v61  ;;  %3046 = vmatpush1.bf16.msra.mxu1 %v4045_v13  ;;  %2148 = vmatprep.mubr.f32.mxu1 %v3377_v0 }
0x150d   :  { %3048 = vmatprep.subr.bf16.mxu1 %v4056_v21 }
0x1510   :  { %3050 = vmatpush1.bf16.msra.mxu1 %v4064_v30 }
0x1511   :  { %3052 = vmatprep.subr.bf16.mxu1 %v4074_v9 }
0x1514   :  { %3054 = vmatpush1.bf16.msra.mxu1 %v4082_v36 }
0x1515   :  { %3056 = vmatprep.subr.bf16.mxu1 %v4092_v42 }
0x1518   :  { %3058 = vmatpush1.bf16.msra.mxu1 %v4100_v19 }
0x1519   :  { %3076 = vmatprep.subr.bf16.mxu1 %v4037_v27 }
0x15de   :  { %v1912_v60 = vpop.f32.mrb[14].mxu1 }
0x15df   :  { %v1917_v20 = vadd.f32 %v1912_v60, %v1841_v33  ;;  %v1914_v49 = vpop.f32.mrb[15].mxu1  ;;  %v1929_v33 = vpop.permute.xlu1 %1928 }
0x15e0   :  { %v1918_v12 = vadd.f32 %v1914_v49, %v1842_v14 }
0x15e1   :  { %3223 = vtanh.f32 %v1917_v20 }
0x15e2   :  { %3225 = vtanh.f32 %v1918_v12 }
0x15eb   :  { %v3224_v6 = vpop.eup %3223 }
0x15ec   :  { %v3226_v16 = vpop.eup %3225  ;;  %v1921_v34 = vmul.f32 0.5, %v3224_v6 }
0x15ed   :  { %v1922_v27 = vmul.f32 0.5, %v3226_v16 }
0x15ee   :  { %v1923_v59 = vadd.f32 0.5, %v1921_v34 }
0x15ef   :  { %v1924_v55 = vadd.f32 0.5, %v1922_v27 }
0x15f0   :  { %v1931_v48 = vmul.f32 %v1929_v33, %v1923_v59 }
0x15f1   :  { %v1926_v15 = vsel %vm80_vm11, %v3226_v16, %v1924_v55 }
0x15f2   :  { %v1932_v8 = vmul.f32 %v1926_v15, %v1923_v59 }
0x15f4   :  { %1934 = vrot.lane.b32.xlu0 %v1932_v8, %s3378_s0 }
0x1666   :  { %v1935_v57 = vpop.permute.xlu0 %1934 }
0x1667   :  { %v1937_v18 = vadd.f32 %v1935_v57, %v1931_v48 }
0x1669   :  { %3227 = vtanh.f32 %v1937_v18  ;;  %1948 = vrot.lane.b32.xlu0 %v1937_v18, %s3378_s0 }
0x1673   :  { %v3228_v14 = vpop.eup %3227 }
0x1674   :  { %v1939_v25 = vmul.f32 %v3228_v14, %v1926_v15 }
0x1676   :  { %1943 = vrot.lane.b32.xlu1 %v1939_v25, %s3378_s0 }
0x16db   :  { %v1949_v32 = vpop.permute.xlu0 %1948 }
0x16dc   :  { %v1951_v2 = vsel %vm789_vm2, %v1949_v32, %v1831_v7 }
0x16dd   :  { %2048 = vrot.lane.b32.xlu1 %v1951_v2, %s3378_s0 }
0x16e8   :  { %v1944_v17 = vpop.permute.xlu1 %1943 }
0x16e9   :  { %v1946_v4 = vsel %vm789_vm2, %v1944_v17, %v1826_v51  ;;  %v1952_v47 = vsel %vm789_vm2, %v1944_v17, 0.0 }
0x16ea   :  { %1954 = vst.msk [vmem:[#allocation9 + $0x18] sm:$0xff] %vm419_vm13, %v1952_v47  ;;  %2705 = vmatmul.mubr.msk.f32.vlgmr.msra.gmra.mrb[40].mxu0 %vm313_vm15, %v1946_v4 }
0x16eb   :  { %1956 = vst.msk [vmem:[#allocation9 + $0x20] sm:$0xff] %vm422_vm14, %v1952_v47  ;;  %3062 = vmatpush1.bf16.msra.mxu0 %v4045_v13  ;;  %2266 = vmatprep.mubr.f32.mxu0 %v3377_v0 }
0x16ec   :  { %3064 = vmatprep.subr.bf16.mxu0 %v4056_v21 }
0x16ef   :  { %3066 = vmatpush1.bf16.msra.mxu0 %v4064_v30 }
0x16f0   :  { %3068 = vmatprep.subr.bf16.mxu0 %v4074_v9 }
0x16f3   :  { %3070 = vmatpush1.bf16.msra.mxu0 %v4082_v36 }
0x16f4   :  { %3072 = vmatprep.subr.bf16.mxu0 %v4092_v42 }
0x16f7   :  { %3074 = vmatpush1.bf16.msra.mxu0 %v4100_v19 }
0x174f   :  { %v2049_v44 = vpop.permute.xlu1 %2048 }
0x17bd   :  { %v2032_v46 = vpop.f32.mrb[40].mxu0 }
0x17be   :  { %v2037_v7 = vadd.f32 %v2032_v46, %v1961_v58  ;;  %v2034_v51 = vpop.f32.mrb[41].mxu0 }
0x17bf   :  { %v2038_v61 = vadd.f32 %v2034_v51, %v1962_v37 }
0x17c0   :  { %3229 = vtanh.f32 %v2037_v7 }
0x17c1   :  { %3231 = vtanh.f32 %v2038_v61 }
0x17ca   :  { %v3230_v60 = vpop.eup %3229 }
0x17cb   :  { %v3232_v20 = vpop.eup %3231  ;;  %v2041_v49 = vmul.f32 0.5, %v3230_v60  ;;  %v4673_v60 = vsel %vm3648_vm9, %v4208_v26, %v4156_v50 }
0x17cc   :  { %v2042_v12 = vmul.f32 0.5, %v3232_v20 }
0x17cd   :  { %v2043_v16 = vadd.f32 0.5, %v2041_v49 }
0x17ce   :  { %v2044_v6 = vadd.f32 0.5, %v2042_v12 }
0x17cf   :  { %v2051_v58 = vmul.f32 %v2049_v44, %v2043_v16 }
0x17d0   :  { %v2046_v34 = vsel %vm80_vm11, %v3232_v20, %v2044_v6 }
0x17d1   :  { %v2052_v54 = vmul.f32 %v2046_v34, %v2043_v16 }
0x17d3   :  { %2054 = vrot.lane.b32.xlu0 %v2052_v54, %s3378_s0 }
0x1845   :  { %v2055_v27 = vpop.permute.xlu0 %2054 }
0x1846   :  { %v2057_v55 = vadd.f32 %v2055_v27, %v2051_v58 }
0x1848   :  { %3233 = vtanh.f32 %v2057_v55  ;;  %2068 = vrot.lane.b32.xlu0 %v2057_v55, %s3378_s0 }
0x1852   :  { %v3234_v41 = vpop.eup %3233 }
0x1853   :  { %v2059_v28 = vmul.f32 %v3234_v41, %v2046_v34 }
0x1855   :  { %2063 = vrot.lane.b32.xlu1 %v2059_v28, %s3378_s0 }
0x18ba   :  { %v2069_v37 = vpop.permute.xlu0 %2068 }
0x18bb   :  { %v2071_v59 = vsel %vm910_vm3, %v2069_v37, %v1951_v2 }
0x18bc   :  { %2166 = vrot.lane.b32.xlu1 %v2071_v59, %s3378_s0 }
0x18c7   :  { %v2064_v15 = vpop.permute.xlu1 %2063 }
0x18c8   :  { %v2066_v8 = vsel %vm910_vm3, %v2064_v15, %v1946_v4  ;;  %v2072_v33 = vsel %vm910_vm3, %v2064_v15, 0.0 }
0x18c9   :  { %2073 = vst.msk [vmem:[#allocation9 + $0x20] sm:$0xff] %vm419_vm13, %v2072_v33  ;;  %2706 = vmatmul.mubr.msk.f32.vlgmr.msra.gmra.mrb[16].mxu1 %vm313_vm15, %v2066_v8 }
0x18ca   :  { %2074 = vst.msk [vmem:[#allocation9 + $0x18] sm:$0xff] %vm422_vm14, %v2072_v33  ;;  %3078 = vmatpush1.bf16.msra.mxu1 %v4045_v13  ;;  %2384 = vmatprep.mubr.f32.mxu1 %v3377_v0  ;;  %v4671_v13 = vsel %vm3648_vm9, %v4188_v39, %v4160_v22 }
0x18cb   :  { %3080 = vmatprep.subr.bf16.mxu1 %v4056_v21  ;;  %v4672_v21 = vsel %vm3652_vm10, %v4190_v45, %v4162_v10 }
0x18ce   :  { %3082 = vmatpush1.bf16.msra.mxu1 %v4064_v30 }
0x18cf   :  { %3084 = vmatprep.subr.bf16.mxu1 %v4074_v9 }
0x18d2   :  { %3086 = vmatpush1.bf16.msra.mxu1 %v4082_v36 }
0x18d3   :  { %3088 = vmatprep.subr.bf16.mxu1 %v4092_v42 }
0x18d6   :  { %3090 = vmatpush1.bf16.msra.mxu1 %v4100_v19 }
0x192e   :  { %v2167_v39 = vpop.permute.xlu1 %2166 }
0x199c   :  { %v2150_v11 = vpop.f32.mrb[16].mxu1 }
0x199d   :  { %v2155_v48 = vadd.f32 %v2150_v11, %v4671_v13  ;;  %v2152_v57 = vpop.f32.mrb[17].mxu1  ;;  %v4675_v13 = vsel %vm3648_vm9, %v4230_v62, %v4228_v52 }
0x199e   :  { %v2156_v30 = vadd.f32 %v2152_v57, %v4672_v21 }
0x199f   :  { %3235 = vtanh.f32 %v2155_v48 }
0x19a0   :  { %3237 = vtanh.f32 %v2156_v30 }
0x19a9   :  { %v3236_v9 = vpop.eup %3235 }
0x19aa   :  { %v3238_v36 = vpop.eup %3237  ;;  %v2159_v42 = vmul.f32 0.5, %v3236_v9 }
0x19ab   :  { %v2160_v19 = vmul.f32 0.5, %v3238_v36 }
0x19ac   :  { %v2161_v14 = vadd.f32 0.5, %v2159_v42 }
0x19ad   :  { %v2162_v18 = vadd.f32 0.5, %v2160_v19 }
0x19ae   :  { %v2169_v32 = vmul.f32 %v2167_v39, %v2161_v14  ;;  %v3092_v39 = vpack.c.bf16 %v2440_v23, %v2439_v40 }
0x19af   :  { %v2164_v25 = vsel %vm80_vm11, %v3238_v36, %v2162_v18 }
0x19b0   :  { %v2170_v22 = vmul.f32 %v2164_v25, %v2161_v14 }
0x19b2   :  { %2172 = vrot.lane.b32.xlu0 %v2170_v22, %s3378_s0  ;;  %v3379_v22 = vmov 0.0|0.0  }
0x19b3   :  { %3091 = vmatprep.subr.bf16.mxu0 %v3379_v22  ;;  %3115 = vmatprep.subr.bf16.mxu1 %v3379_v22 }
0x1a24   :  { %v2173_v2 = vpop.permute.xlu0 %2172 }
0x1a25   :  { %v2175_v17 = vadd.f32 %v2173_v2, %v2169_v32  ;;  %v2534_v32 = vld [vmem:[%s4662_s10 + $0x8] sm:$0xff]  ;;  %v2441_v2 = vld [vmem:[%s4660_s8 + $0x10] sm:$0xff] }
0x1a27   :  { %3239 = vtanh.f32 %v2175_v17  ;;  %2186 = vrot.lane.b32.xlu0 %v2175_v17, %s3378_s0  ;;  %v2442_v17 = vld [vmem:[%s4660_s8 + $0x18] sm:$0xff] }
0x1a31   :  { %v3240_v10 = vpop.eup %3239 }
0x1a32   :  { %v2177_v45 = vmul.f32 %v3240_v10, %v2164_v25  ;;  %v3116_v10 = vpack.c.bf16 %v2534_v32, %v2533_v53 }
0x1a34   :  { %2181 = vrot.lane.b32.xlu1 %v2177_v45, %s3378_s0  ;;  %v2535_v45 = vld [vmem:[%s4662_s10 + $0x10] sm:$0xff] }
0x1a99   :  { %v2187_v4 = vpop.permute.xlu0 %2186 }
0x1a9a   :  { %v2189_v47 = vsel %vm1029_vm4, %v2187_v4, %v2071_v59  ;;  %v2536_v4 = vld [vmem:[%s4662_s10 + $0x18] sm:$0xff] }
0x1a9b   :  { %2284 = vrot.lane.b32.xlu1 %v2189_v47, %s3378_s0 }
0x1aa6   :  { %v2182_v46 = vpop.permute.xlu1 %2181 }
0x1aa7   :  { %v2184_v7 = vsel %vm1029_vm4, %v2182_v46, %v2066_v8  ;;  %v2190_v51 = vsel %vm1029_vm4, %v2182_v46, 0.0  ;;  %v3119_v46 = vpack.c.bf16 %v2536_v4, %v2535_v45 }
0x1aa8   :  { %2191 = vst.msk [vmem:[#allocation9 + $0x28] sm:$0xff] %vm419_vm13, %v2190_v51  ;;  %2707 = vmatmul.mubr.msk.f32.vlgmr.msra.gmra.mrb[42].mxu0 %vm313_vm15, %v2184_v7 }
0x1aa9   :  { %2192 = vst.msk [vmem:[#allocation9 + $0x10] sm:$0xff] %vm422_vm14, %v2190_v51  ;;  %3093 = vmatpush3.bf16.msra.mxu0 %v3092_v39  ;;  %v2444_v51 = vld [vmem:[%s4660_s8 + $0x28] sm:$0xff]  ;;  %2777 = vmatprep.mubr.msk.f32.mxu0 %vm3380_vm7, %v3377_v0 }
0x1aaa   :  { %3094 = vmatprep.subr.bf16.mxu0 %v3379_v22 }
0x1b0d   :  { %v2285_v26 = vpop.permute.xlu1 %2284 }
0x1b7b   :  { %v2268_v61 = vpop.f32.mrb[42].mxu0 }
0x1b7c   :  { %v2273_v20 = vadd.f32 %v2268_v61, %v4673_v60  ;;  %v2270_v49 = vpop.f32.mrb[43].mxu0  ;;  %v2537_v61 = vld [vmem:[%s4662_s10 + $0x20] sm:$0xff]  ;;  %v2538_v60 = vld [vmem:[%s4662_s10 + $0x28] sm:$0xff] }
0x1b7d   :  { %v2274_v12 = vadd.f32 %v2270_v49, %v4674_v24 }
0x1b7e   :  { %3241 = vtanh.f32 %v2273_v20 }
0x1b7f   :  { %3243 = vtanh.f32 %v2274_v12  ;;  %v3122_v12 = vpack.c.bf16 %v2538_v60, %v2537_v61 }
0x1b88   :  { %v3242_v6 = vpop.eup %3241 }
0x1b89   :  { %v3244_v16 = vpop.eup %3243  ;;  %v2277_v34 = vmul.f32 0.5, %v3242_v6  ;;  %v2445_v6 = vld [vmem:[%s4660_s8 + $0x30] sm:$0xff] }
0x1b8a   :  { %v2278_v54 = vmul.f32 0.5, %v3244_v16 }
0x1b8b   :  { %v2279_v58 = vadd.f32 0.5, %v2277_v34 }
0x1b8c   :  { %v2280_v44 = vadd.f32 0.5, %v2278_v54  ;;  %v2539_v54 = vld [vmem:[%s4662_s10 + $0x30] sm:$0xff] }
0x1b8d   :  { %v2287_v55 = vmul.f32 %v2285_v26, %v2279_v58  ;;  %v2541_v26 = vld [vmem:[%s4662_s10 + $0x40] sm:$0xff] }
0x1b8e   :  { %v2282_v27 = vsel %vm80_vm11, %v3244_v16, %v2280_v44  ;;  %v2446_v16 = vld [vmem:[%s4660_s8 + $0x38] sm:$0xff] }
0x1b8f   :  { %v2288_v50 = vmul.f32 %v2282_v27, %v2279_v58  ;;  %v3101_v34 = vpack.c.bf16 %v2446_v16, %v2445_v6  ;;  %v2540_v44 = vld [vmem:[%s4662_s10 + $0x38] sm:$0xff] }
0x1b90   :  { %v3125_v58 = vpack.c.bf16 %v2540_v44, %v2539_v54 }
0x1b91   :  { %2290 = vrot.lane.b32.xlu0 %v2288_v50, %s3378_s0  ;;  %v2448_v50 = vld [vmem:[%s4660_s8 + $0x48] sm:$0xff] }
0x1c03   :  { %v2291_v41 = vpop.permute.xlu0 %2290 }
0x1c04   :  { %v2293_v28 = vadd.f32 %v2291_v41, %v2287_v55  ;;  %v2542_v41 = vld [vmem:[%s4662_s10 + $0x48] sm:$0xff] }
0x1c06   :  { %3245 = vtanh.f32 %v2293_v28  ;;  %2304 = vrot.lane.b32.xlu0 %v2293_v28, %s3378_s0  ;;  %v2449_v28 = vld [vmem:[%s4660_s8 + $0x50] sm:$0xff] }
0x1c10   :  { %v3246_v31 = vpop.eup %3245 }
0x1c11   :  { %v2295_v29 = vmul.f32 %v3246_v31, %v2282_v27  ;;  %v2447_v27 = vld [vmem:[%s4660_s8 + $0x40] sm:$0xff]  ;;  %v2450_v31 = vld [vmem:[%s4660_s8 + $0x58] sm:$0xff] }
0x1c12   :  { %v3104_v55 = vpack.c.bf16 %v2448_v50, %v2447_v27 }
0x1c13   :  { %2299 = vrot.lane.b32.xlu1 %v2295_v29, %s3378_s0  ;;  %v3128_v29 = vpack.c.bf16 %v2542_v41, %v2541_v26 }
0x1c78   :  { %v2305_v37 = vpop.permute.xlu0 %2304 }
0x1c79   :  { %v4440_v59 = vsel %vm1148_vm5, %v2305_v37, %v2189_v47  ;;  %v3095_v47 = vpack.c.bf16 %v2442_v17, %v2441_v2  ;;  %v2543_v37 = vld [vmem:[%s4662_s10 + $0x50] sm:$0xff] }
0x1c7a   :  { %2402 = vrot.lane.b32.xlu1 %v4440_v59, %s3378_s0 }
0x1c7b   :  { %3096 = vmatpush3.bf16.msra.mxu0 %v3095_v47 }
0x1c7c   :  { %3097 = vmatprep.subr.bf16.mxu0 %v3379_v22 }
0x1c85   :  { %v2300_v15 = vpop.permute.xlu1 %2299 }
0x1c86   :  { %v4446_v8 = vsel %vm1148_vm5, %v2300_v15, %v2184_v7  ;;  %v2308_v33 = vsel %vm1148_vm5, %v2300_v15, 0.0  ;;  %v2443_v7 = vld [vmem:[%s4660_s8 + $0x20] sm:$0xff]  ;;  %v2544_v15 = vld [vmem:[%s4662_s10 + $0x58] sm:$0xff] }
0x1c87   :  { %2309 = vst.msk [vmem:[#allocation9 + $0x30] sm:$0xff] %vm419_vm13, %v2308_v33  ;;  %2708 = vmatmul.mubr.msk.f32.vlgmr.msra.gmra.mrb[18].mxu1 %vm313_vm15, %v4446_v8  ;;  %v3098_v49 = vpack.c.bf16 %v2444_v51, %v2443_v7 }
0x1c88   :  { %2310 = vst.msk [vmem:[#allocation9 + $0x8] sm:$0xff] %vm422_vm14, %v2308_v33  ;;  %3117 = vmatpush3.bf16.msra.mxu1 %v3116_v10  ;;  %v3107_v33 = vpack.c.bf16 %v2450_v31, %v2449_v28  ;;  %2812 = vmatprep.mubr.msk.f32.mxu1 %vm3380_vm7, %v3377_v0  ;;  %v1272_v0 = vsel %vm1267_vm6, %v4118_v1, %v3957_v5 }
0x1c89   :  { %3118 = vmatprep.subr.bf16.mxu1 %v3379_v22  ;;  %3099 = vmatpush3.bf16.msra.mxu0 %v3098_v49 }
0x1c8a   :  { %3100 = vmatprep.subr.bf16.mxu0 %v3379_v22 }
0x1c8c   :  { %3120 = vmatpush3.bf16.msra.mxu1 %v3119_v46 }
0x1c8d   :  { %3121 = vmatprep.subr.bf16.mxu1 %v3379_v22  ;;  %3102 = vmatpush3.bf16.msra.mxu0 %v3101_v34 }
0x1c8e   :  { %3103 = vmatprep.subr.bf16.mxu0 %v3379_v22 }
0x1c90   :  { %3123 = vmatpush3.bf16.msra.mxu1 %v3122_v12 }
0x1c91   :  { %3124 = vmatprep.subr.bf16.mxu1 %v3379_v22  ;;  %3105 = vmatpush3.bf16.msra.mxu0 %v3104_v55 }
0x1c92   :  { %3106 = vmatprep.subr.bf16.mxu0 %v3379_v22 }
0x1c94   :  { %3126 = vmatpush3.bf16.msra.mxu1 %v3125_v58 }
0x1c95   :  { %3127 = vmatprep.subr.bf16.mxu1 %v3379_v22  ;;  %3108 = vmatpush3.bf16.msra.mxu0 %v3107_v33 }
0x1c96   :  { %3109 = vmatprep.subr.bf16.mxu0 %v3379_v22 }
0x1c98   :  { %3129 = vmatpush3.bf16.msra.mxu1 %v3128_v29 }
0x1c99   :  { %3130 = vmatprep.subr.bf16.mxu1 %v3379_v22 }
0x1cec   :  { %v2403_v62 = vpop.permute.xlu1 %2402 }
0x1d5a   :  { %v2386_v11 = vpop.f32.mrb[18].mxu1 }
0x1d5b   :  { %v2391_v48 = vadd.f32 %v2386_v11, %v4675_v13  ;;  %v2388_v57 = vpop.f32.mrb[19].mxu1  ;;  %v2451_v11 = vld [vmem:[%s4660_s8 + $0x60] sm:$0xff]  ;;  %v2452_v13 = vld [vmem:[%s4660_s8 + $0x68] sm:$0xff] }
0x1d5c   :  { %v2392_v21 = vadd.f32 %v2388_v57, %v4676_v35  ;;  %v2545_v57 = vld [vmem:[%s4662_s10 + $0x60] sm:$0xff]  ;;  %v2546_v35 = vld [vmem:[%s4662_s10 + $0x68] sm:$0xff] }
0x1d5d   :  { %3247 = vtanh.f32 %v2391_v48  ;;  %v3131_v48 = vpack.c.bf16 %v2544_v15, %v2543_v37 }
0x1d5e   :  { %3249 = vtanh.f32 %v2392_v21  ;;  %v3110_v21 = vpack.c.bf16 %v2452_v13, %v2451_v11 }
0x1d5f   :  { %3132 = vmatpush3.bf16.msra.mxu1 %v3131_v48 }
0x1d60   :  { %3133 = vmatprep.subr.bf16.mxu1 %v3379_v22  ;;  %3111 = vmatpush3.bf16.msra.mxu0 %v3110_v21 }
0x1d61   :  { %3112 = vmatprep.subr.bf16.mxu0 %v3379_v22 }
0x1d67   :  { %v3248_v30 = vpop.eup %3247 }
0x1d68   :  { %v3250_v9 = vpop.eup %3249  ;;  %v2395_v36 = vmul.f32 0.5, %v3248_v30  ;;  %v3134_v30 = vpack.c.bf16 %v2546_v35, %v2545_v57 }
0x1d69   :  { %v2396_v42 = vmul.f32 0.5, %v3250_v9 }
0x1d6a   :  { %v2397_v18 = vadd.f32 0.5, %v2395_v36  ;;  %3135 = vmatpush3.bf16.msra.mxu1 %v3134_v30 }
0x1d6b   :  { %v2398_v19 = vadd.f32 0.5, %v2396_v42  ;;  %v2453_v42 = vld [vmem:[%s4660_s8 + $0x70] sm:$0xff]  ;;  %3136 = vmatprep.subr.bf16.mxu1 %v3379_v22 }
0x1d6c   :  { %v2405_v3 = vmul.f32 %v2403_v62, %v2397_v18 }
0x1d6d   :  { %v2400_v63 = vsel %vm80_vm11, %v3250_v9, %v2398_v19  ;;  %v2454_v19 = vld [vmem:[%s4660_s8 + $0x78] sm:$0xff]  ;;  %s3381_s8 = smov [#allocation9]  }
0x1d6e   :  { %v2406_v52 = vmul.f32 %v2400_v63, %v2397_v18  ;;  %v3113_v18 = vpack.c.bf16 %v2454_v19, %v2453_v42 }
0x1d70   :  { %2408 = vrot.lane.b32.xlu0 %v2406_v52, %s3378_s0  ;;  %3114 = vmatpush3.bf16.msra.mxu0 %v3113_v18 }
0x1de2   :  { %v2409_v14 = vpop.permute.xlu0 %2408 }
0x1de3   :  { %v2411_v25 = vadd.f32 %v2409_v14, %v2405_v3 }
0x1de5   :  { %3251 = vtanh.f32 %v2411_v25  ;;  %2422 = vrot.lane.b32.xlu0 %v2411_v25, %s3378_s0 }
0x1def   :  { %v3252_v20 = vpop.eup %3251 }
0x1df0   :  { %v2413_v24 = vmul.f32 %v3252_v20, %v2400_v63  ;;  %v2547_v63 = vld [vmem:[%s4662_s10 + $0x70] sm:$0xff] }
0x1df2   :  { %2417 = vrot.lane.b32.xlu1 %v2413_v24, %s3378_s0 }
0x1e57   :  { %v2423_v9 = vpop.permute.xlu0 %2422 }
0x1e58   :  { %v2425_v36 = vsel %vm1267_vm6, %v2423_v9, %v4440_v59  ;;  %v2548_v59 = vld [vmem:[%s4662_s10 + $0x78] sm:$0xff]  ;;  %s2632_s10 = sshll.u32 %s3381_s8, 4  ;;  %s2633_s10 = int_to_ptr.vmem [resolvable:$true] %s2632_s10 }
0x1e59   :  { %2435 = vrot.lane.b32.xlu0 %v2425_v36, %s3378_s0  ;;  %v3137_v52 = vpack.c.bf16 %v2548_v59, %v2547_v63  ;;  %p3302_p3 = scmp.lt.s32.totalorder %s2633_s10, %s2633_s10 }
0x1e5b   :  { %3138 = vmatpush3.bf16.msra.mxu1 %v3137_v52 }
0x1e64   :  { %v2418_v62 = vpop.permute.xlu1 %2417 }
0x1e65   :  { %v2420_v3 = vsel %vm1267_vm6, %v2418_v62, %v4446_v8  ;;  %v2426_v14 = vsel %vm1267_vm6, %v2418_v62, 0.0 }
0x1e66   :  { %2427 = vst.msk [vmem:[#allocation9 + $0x38] sm:$0xff] %vm419_vm13, %v2426_v14  ;;  %v3152_v25 = vpack.i.bf16 %v2420_v3, %v4003_v38 }
0x1e67   :  { %2428 = vst.msk [vmem:[#allocation9] sm:$0xff] %vm422_vm14, %v2426_v14 }
0x1e68   :  { %3153 = vrot.lane.b32.xlu1 %v3152_v25, %s3378_s0  ;;  %s3297_s0 = scalar_lea.vmem %s2633_s10, 1024 }
0x1e69   :  { %p3298_p2 = scmp.ne.s32.totalorder %s2633_s10, %s3297_s0  ;;  %p3303_p4 = scmp.lt.s32.totalorder %s3297_s0, %s3297_s0 }
0x1e6b   :  { %p3304_p5 = por %p3303_p4, %p3302_p3 }
0x1e6d   :  { %p3305_p6 = pnand %p3304_p5, %p3298_p2 }
0x1ecb   :  { %v2436_v8 = vpop.permute.xlu0 %2435 }
0x1eda   :  { %v3154_v40 = vpop.permute.xlu1 %3153 }
0x1edb   :  { %v3156_v23 = vunpack.i.h.bf16 %v3154_v40  ;;  %v3155_v53 = vunpack.i.l.bf16 %v3154_v40 }
0x1edd   :  { %v1277_v22 = vsel %vm1267_vm6, %v3155_v53, %v3951_v56  ;;  %v2433_v39 = vsel %vm313_vm15, %v1272_v0, %v3156_v23 }
0x1ede   :  { %2778 = vmatmul.mubr.f32.vlgmr.msra.gmra.mrb[44].mxu0 %v2433_v39  ;;  %v2438_v38 = vsel %vm313_vm15, %v1277_v22, %v2436_v8 }
0x1edf   :  { %2813 = vmatmul.mubr.f32.vlgmr.msra.gmra.mrb[20].mxu1 %v2438_v38 }
0x1ee0   :  { %3308 = shalt.err (!%p3305_p6)
}
0x1ee1   :  { %s3309_s20 = scalar_lea.hbm %s4664_s12, 1024 }
0x1ee2   :  { %p3310_p7 = scmp.ne.s32.totalorder %s4664_s12, %s3309_s20  ;;  %p3313_p8 = scmp.lt.u32.totalorder %s3309_s20, %s4664_s12 }
0x1ee4   :  { %p3315_p9 = pnand %p3313_p8, %p3310_p7 }
0x1ee6   :  { %3318 = shalt.err (!%p3315_p9)
}
0x1ee7   :  { %2638 = dma.vmem_to_hbm [thread:$0]  %s2633_s10, 1024, %s4664_s12, [#allocation6], %s3372_s23, %s3372_s23, %s3373_s24  }
0x1ee8   :  { %v2709_v56 = vld [vmem:[%s4661_s9] ss:$0 sm:$0xff]  ;;  %s3382_s5 = smov [#allocation10]   ;;  %s3383_s15 = smov [#allocation12]  }
0x1ee9   :  { %s2645_s2 = sshll.u32 %s3382_s5, 4  ;;  %v2710_v5 = vld [vmem:[%s4663_s11] ss:$0 sm:$0xff]  ;;  %s2655_s16 = sshll.u32 %s3383_s15, 4  ;;  %s2646_s2 = int_to_ptr.vmem [resolvable:$true] %s2645_s2  ;;  %s2656_s16 = int_to_ptr.vmem [resolvable:$true] %s2655_s16 }
0x1eea   :  { %s3319_s9 = scalar_lea.vmem %s2646_s2, 128  ;;  %p3324_p11 = scmp.lt.s32.totalorder %s2646_s2, %s2646_s2 }
0x1eeb   :  { %p3320_p10 = scmp.ne.s32.totalorder %s2646_s2, %s3319_s9  ;;  %p3325_p12 = scmp.lt.s32.totalorder %s3319_s9, %s3319_s9 }
0x1eed   :  { %p3326_p13 = por %p3325_p12, %p3324_p11 }
0x1eef   :  { %p3327_p0 = pnand %p3326_p13, %p3320_p10 }
0x1fb1   :  { %v2528_v43 = vpop.f32.mrb[44].mxu0 }
0x1fb2   :  { %v2529_v1 = vadd.f32 %v2709_v56, %v2528_v43  ;;  %v2779_v32 = vpop.f32.mrb[45].mxu0  ;;  %v2622_v2 = vpop.f32.mrb[20].mxu1 }
0x1fb3   :  { %v2623_v17 = vadd.f32 %v2710_v5, %v2622_v2  ;;  %v2814_v10 = vpop.f32.mrb[21].mxu1 }
0x1fb4   :  { %2532 = vst.msk [vmem:[#allocation10] sm:$0xff] %vm419_vm13, %v2529_v1 }
0x1fb5   :  { %2626 = vst.msk [vmem:[#allocation12] sm:$0xff] %vm419_vm13, %v2623_v17 }
0x1fb6   :  { %3330 = shalt.err (!%p3327_p0)
}
0x1fb7   :  { %s3331_s23 = scalar_lea.hbm %s4665_s13, 128 }
0x1fb8   :  { %p3332_p1 = scmp.ne.s32.totalorder %s4665_s13, %s3331_s23  ;;  %p3335_p2 = scmp.lt.u32.totalorder %s3331_s23, %s4665_s13 }
0x1fba   :  { %p3337_p3 = pnand %p3335_p2, %p3332_p1 }
0x1fbc   :  { %3340 = shalt.err (!%p3337_p3)
}
0x1fbd   :  { %2648 = dma.vmem_to_hbm [thread:$0]  %s2646_s2, 128, %s4665_s13, [#allocation11]  }
0x1fbe   :  { %s3341_s10 = scalar_lea.vmem %s2656_s16, 128  ;;  %p3346_p5 = scmp.lt.s32.totalorder %s2656_s16, %s2656_s16 }
0x1fbf   :  { %p3342_p4 = scmp.ne.s32.totalorder %s2656_s16, %s3341_s10  ;;  %p3347_p6 = scmp.lt.s32.totalorder %s3341_s10, %s3341_s10 }
0x1fc1   :  { %p3348_p7 = por %p3347_p6, %p3346_p5 }
0x1fc3   :  { %p3349_p8 = pnand %p3348_p7, %p3342_p4 }
0x1fc5   :  { %3352 = shalt.err (!%p3349_p8)
}
0x1fc6   :  { %s3353_s19 = scalar_lea.hbm %s4666_s14, 128 }
0x1fc7   :  { %p3354_p9 = scmp.ne.s32.totalorder %s4666_s14, %s3353_s19  ;;  %p3357_p10 = scmp.lt.u32.totalorder %s3353_s19, %s4666_s14 }
0x1fc9   :  { %p3359_p11 = pnand %p3357_p10, %p3354_p9 }
0x1fcb   :  { %3362 = shalt.err (!%p3359_p11)
}
0x1fcc   :  { %2658 = dma.vmem_to_hbm [thread:$0]  %s2656_s16, 128, %s4666_s14, [#allocation11]  }
0x1fcd   :  { %3367 = dma.done.wait [#allocation6], 1024  }
0x1fce   :  { %3368 = vsyncadd [#allocation6], 4294966272 }
0x1fcf   :  { %3369 = dma.done.wait [#allocation11], 256  }
0x1fd0   :  { %3370 = vsyncadd [#allocation11], 4294967040 }
0x1fd1   :  { %2668 = vsyncpa [#allocation5], 1 }
0x1fd2   :  { %2669 = vsyncpa [#allocation8], 1 }
0x1fd3   :  { %2670 = vsyncpa [#allocation6], 1 }
0x1fd4   :  { %2671 = vsyncpa [#allocation11], 1 }

</bundles_post_ra>
